<compile_context>
chip_gen: v7x
topology: tpu7x:2x2x1
jax: 0.10.0
libtpu: 0.0.40
codegen_flags: <defaults>
</compile_context>

<pallas_src>
import functools

import jax
import jax.numpy as jnp
import numpy as np
from jax import lax
from jax.experimental import pallas as pl
from jax.experimental.pallas import tpu as pltpu


def _fused_attention_kernel(x_ref, wqkv_ref, *rest, num_heads, head_dim,
                            has_qkv_bias):
    """One grid step = full attention forward for one batch element."""
    if has_qkv_bias:
        bqkv_ref, wproj_ref, bproj_ref, o_ref, qkv_s = rest
    else:
        wproj_ref, bproj_ref, o_ref, qkv_s = rest

    N = x_ref.shape[0]
    C = num_heads * head_dim

    # QKV projection: one (N, C) @ (C, 3C) GEMM, f32 MXU accumulation.
    # The softmax scale is already folded into the Q columns of wqkv (and bqkv).
    qkv = jnp.dot(x_ref[...], wqkv_ref[...], preferred_element_type=jnp.float32)
    if has_qkv_bias:
        qkv = qkv + bqkv_ref[...]
    qkv_s[...] = qkv.astype(qkv_s.dtype)            # bf16 scratch (MXU operands)

    # Output accumulator initialized with the broadcast proj bias (folds the
    # bias add into the init).  Lane-dense (N, C) f32, carried in registers.
    o_acc = jnp.broadcast_to(bproj_ref[...], (N, C)).astype(jnp.float32)

    # Per-head exact softmax attention.  Each head's intermediates feed
    # straight into o_acc, so live ranges stay bounded per head.  H is small
    # (8) and head_dim=16 lane slices with a dynamic start are a lowering
    # risk, so the loop is kept statically unrolled.
    for h in range(num_heads):
        lo = h * head_dim
        q = qkv_s[:, lo:lo + head_dim]                       # (N, hd) bf16, pre-scaled
        k = qkv_s[:, C + lo:C + lo + head_dim]               # (N, hd) bf16
        v = qkv_s[:, 2 * C + lo:2 * C + lo + head_dim]       # (N, hd) bf16

        # scores = (q*scale) @ k^T  (scale folded into q via the weights)
        s = lax.dot_general(q, k, (((1,), (1,)), ((), ())),
                            preferred_element_type=jnp.float32)      # (N, N) f32
        s = s - jnp.max(s, axis=-1, keepdims=True)
        p = jnp.exp(s)                                                # unnormalized
        denom = jnp.sum(p, axis=-1, keepdims=True)                    # (N, 1) f32

        # attn_drop has p=0.0 -> identity.
        pv = jnp.dot(p.astype(jnp.bfloat16), v,
                     preferred_element_type=jnp.float32)              # (N, hd) f32
        # Deferred normalization on the small (N, hd) result, reciprocal on EUP.
        pv = pv * pl.reciprocal(denom, approx=True)

        # Lane-dense accumulation of the output projection, per head (K = hd).
        o_acc = o_acc + jnp.dot(pv, wproj_ref[lo:lo + head_dim, :],
                                preferred_element_type=jnp.float32)

    # proj_drop has p=0.0 -> identity.  Single lane-dense (N, C) store.
    o_ref[...] = o_acc.astype(o_ref.dtype)


def prepare_attention_params(w_qkv, b_qkv, w_proj, b_proj, num_heads,
                             dtype=jnp.float32):
    """One-time host-side parameter prep (hoisted out of the per-call path).

    w_qkv:  (3C, C)  PyTorch nn.Linear weight layout (out, in)
    b_qkv:  (3C,) or None (qkv_bias=False default)
    w_proj: (C, C)
    b_proj: (C,)
    Transposes to row-major GEMM layout and folds the softmax scale into the
    Q columns of the QKV projection (and its bias, if present).
    """
    C = w_proj.shape[0]
    assert C % num_heads == 0, "dim should be divisible by num_heads"
    head_dim = C // num_heads
    scale = float(head_dim) ** -0.5

    wqkv_t = jnp.asarray(w_qkv, dtype=jnp.float32).T            # (C, 3C)
    wqkv_t = wqkv_t.at[:, :C].multiply(scale)                   # fold scale into Q
    wproj_t = jnp.asarray(w_proj, dtype=jnp.float32).T          # (C, C)
    bproj = jnp.asarray(b_proj, dtype=jnp.float32).reshape(1, C)

    if b_qkv is not None:
        bqkv = jnp.asarray(b_qkv, dtype=jnp.float32)
        bqkv = bqkv.at[:C].multiply(scale).reshape(1, 3 * C)
    else:
        bqkv = None

    return dict(wqkv_t=wqkv_t.astype(dtype),
                bqkv=bqkv,
                wproj_t=wproj_t.astype(dtype),
                bproj=bproj)


def attention_pallas(x, params, *, num_heads):
    """Forward of Latte's Attention module ('math' mode, dropout disabled)."""
    B, N, C = x.shape
    head_dim = C // num_heads
    wqkv_t, wproj_t = params["wqkv_t"], params["wproj_t"]
    bqkv, bproj = params["bqkv"], params["bproj"]
    has_qkv_bias = bqkv is not None

    kernel = functools.partial(_fused_attention_kernel, num_heads=num_heads,
                               head_dim=head_dim, has_qkv_bias=has_qkv_bias)

    # x[b]: (N, C) block, batch dim squeezed.  Weights/biases use constant
    # index maps so they stay resident in VMEM across grid steps.
    in_specs = [pl.BlockSpec((None, N, C), lambda b: (b, 0, 0)),
                pl.BlockSpec((C, 3 * C), lambda b: (0, 0))]
    inputs = [x, wqkv_t]
    if has_qkv_bias:
        in_specs.append(pl.BlockSpec((1, 3 * C), lambda b: (0, 0)))
        inputs.append(bqkv)
    in_specs += [pl.BlockSpec((C, C), lambda b: (0, 0)),
                 pl.BlockSpec((1, C), lambda b: (0, 0))]
    inputs += [wproj_t, bproj]

    # Explicit VMEM budget with headroom (double-buffered blocks + scratch),
    # clamped so it is safe on v5e (16 MiB default) through v7x (64 MiB phys).
    f32 = 4
    resident = (2 * N * C * f32                       # x block
                + 2 * N * C * f32                     # out block
                + 2 * (3 * C * C + C * C + 4 * C) * f32   # weights + biases
                + N * 3 * C * 2)                      # bf16 qkv scratch
    vmem_limit = int(min(64 * 2**20, max(16 * 2**20, 2 * resident)))

    return pl.pallas_call(
        kernel,
        out_shape=jax.ShapeDtypeStruct((B, N, C), x.dtype),
        grid_spec=pltpu.PrefetchScalarGridSpec(
            num_scalar_prefetch=0,
            grid=(B,),
            in_specs=in_specs,
            out_specs=pl.BlockSpec((None, N, C), lambda b: (b, 0, 0)),
            scratch_shapes=[pltpu.VMEM((N, 3 * C), jnp.bfloat16)],  # fused qkv
        ),
        compiler_params=pltpu.CompilerParams(
            dimension_semantics=("parallel",),
            vmem_limit_bytes=vmem_limit),
    )(*inputs)


def attention_ref(x, w_qkv, b_qkv, w_proj, b_proj, num_heads):
    """Pure-JAX f32 reference mirroring the PyTorch module ('math' mode)."""
    B, N, C = x.shape
    hd = C // num_heads
    qkv = jnp.einsum('bnc,dc->bnd', x, w_qkv, precision='highest')
    if b_qkv is not None:
        qkv = qkv + b_qkv
    qkv = qkv.reshape(B, N, 3, num_heads, hd).transpose(2, 0, 3, 1, 4)
    q, k, v = qkv[0], qkv[1], qkv[2]                         # (B, H, N, hd)
    attn = jnp.einsum('bhqd,bhkd->bhqk', q, k,
                      precision='highest') * (hd ** -0.5)
    attn = jax.nn.softmax(attn, axis=-1)
    y = jnp.einsum('bhqk,bhkd->bhqd', attn, v, precision='highest')
    y = y.transpose(0, 2, 1, 3).reshape(B, N, C)
    return jnp.einsum('bnc,dc->bnd', y, w_proj, precision='highest') + b_proj


if __name__ == "__main__":
    key = jax.random.PRNGKey(0)
    kx, kw1, kw2, kb1, kb2 = jax.random.split(key, 5)

    # Small shapes consistent with the module: dim=128, num_heads=8 (head_dim=16).
    B, N, C, H = 2, 128, 128, 8

    x = jax.random.normal(kx, (B, N, C), dtype=jnp.float32)
    w_qkv = jax.random.normal(kw1, (3 * C, C), dtype=jnp.float32) / np.sqrt(C)
    w_proj = jax.random.normal(kw2, (C, C), dtype=jnp.float32) / np.sqrt(C)
    b_proj = 0.02 * jax.random.normal(kb2, (C,), dtype=jnp.float32)

    # Tolerance reflects bf16 MXU operands for the attention matmuls
    # (f32 accumulation / f32 softmax stats); projections stay f32.
    TOL = dict(atol=2e-2, rtol=2e-2)

    # Default module config: qkv_bias=False.
    params = prepare_attention_params(w_qkv, None, w_proj, b_proj, num_heads=H)
    out = jax.block_until_ready(attention_pallas(x, params, num_heads=H))
    ref = attention_ref(x, w_qkv, None, w_proj, b_proj, H)
    assert out.shape == ref.shape == (B, N, C)
    np.testing.assert_allclose(np.asarray(out), np.asarray(ref), **TOL)

    # qkv_bias=True path.
    b_qkv = 0.02 * jax.random.normal(kb1, (3 * C,), dtype=jnp.float32)
    params_b = prepare_attention_params(w_qkv, b_qkv, w_proj, b_proj, num_heads=H)
    out_b = jax.block_until_ready(attention_pallas(x, params_b, num_heads=H))
    ref_b = attention_ref(x, w_qkv, b_qkv, w_proj, b_proj, H)
    np.testing.assert_allclose(np.asarray(out_b), np.asarray(ref_b), **TOL)

    print("KERNEL_OK")
</pallas_src>

<mosaic_0001>
module attributes {stable_mosaic.version = 11 : i64} {
  func.func @_fused_attention_kernel(%arg0: i32, %arg1: memref<1x128x128xf32, #tpu.memory_space<vmem>>, %arg2: memref<128x384xf32, #tpu.memory_space<vmem>>, %arg3: memref<128x128xf32, #tpu.memory_space<vmem>>, %arg4: memref<1x128xf32, #tpu.memory_space<vmem>>, %arg5: memref<1x128x128xf32, #tpu.memory_space<vmem>>, %arg6: memref<128x384xbf16, #tpu.memory_space<vmem>>) attributes {dimension_semantics = [#tpu.dimension_semantics<parallel>], iteration_bounds = array<i64: 2>, scalar_prefetch = 0 : i64, scratch_operands = 1 : i64, tpu.core_type = #tpu.core_type<tc>, window_params = [{transform_indices = @transform_0, window_bounds = array<i64: 1, 128, 128>}, {pipeline_mode = #tpu.pipeline_mode<synchronous>, transform_indices = @transform_1, window_bounds = array<i64: 128, 384>}, {pipeline_mode = #tpu.pipeline_mode<synchronous>, transform_indices = @transform_2, window_bounds = array<i64: 128, 128>}, {pipeline_mode = #tpu.pipeline_mode<synchronous>, transform_indices = @transform_3, window_bounds = array<i64: 1, 128>}, {transform_indices = @transform_4, window_bounds = array<i64: 1, 128, 128>}]} {
    %c0 = arith.constant 0 : index
    %c0_0 = arith.constant 0 : index
    %c0_1 = arith.constant 0 : index
    %0 = vector.load %arg1[%c0, %c0_0, %c0_1] : memref<1x128x128xf32, #tpu.memory_space<vmem>>, vector<1x128x128xf32>
    %1 = vector.shape_cast %0 : vector<1x128x128xf32> to vector<128x128xf32>
    %c0_2 = arith.constant 0 : index
    %c0_3 = arith.constant 0 : index
    %2 = vector.load %arg2[%c0_2, %c0_3] : memref<128x384xf32, #tpu.memory_space<vmem>>, vector<128x384xf32>
    %cst = arith.constant dense<0.000000e+00> : vector<128x384xf32>
    %3 = tpu.matmul %1, %2, %cst {dimension_numbers = #tpu.dot_dimension_numbers<[1], [0], [0], [1], [0, 0, 1, 1], [], []>} : vector<128x128xf32>, vector<128x384xf32>, vector<128x384xf32> -> vector<128x384xf32>
    %4 = arith.truncf %3 : vector<128x384xf32> to vector<128x384xbf16>
    %c0_4 = arith.constant 0 : index
    %c0_5 = arith.constant 0 : index
    %5 = vector.load %arg6[%c0_4, %c0_5] : memref<128x384xbf16, #tpu.memory_space<vmem>>, vector<128x384xbf16>
    tpu.vector_store %arg6[%c0_4, %c0_5], %4 {strides = array<i32>} : memref<128x384xbf16, #tpu.memory_space<vmem>>, vector<128x384xbf16>,
    %c0_6 = arith.constant 0 : index
    %c0_7 = arith.constant 0 : index
    %6 = vector.load %arg4[%c0_6, %c0_7] : memref<1x128xf32, #tpu.memory_space<vmem>>, vector<1x128xf32>
    %7 = vector.shape_cast %6 : vector<1x128xf32> to vector<1x128xf32>
    %8 = vector.broadcast %7 : vector<1x128xf32> to vector<128x128xf32>
    %c0_8 = arith.constant 0 : index
    %c0_9 = arith.constant 0 : index
    %9 = vector.load %arg6[%c0_8, %c0_9] : memref<128x384xbf16, #tpu.memory_space<vmem>>, vector<128x16xbf16>
    %c0_10 = arith.constant 0 : index
    %c128 = arith.constant 128 : index
    %10 = vector.load %arg6[%c0_10, %c128] : memref<128x384xbf16, #tpu.memory_space<vmem>>, vector<128x16xbf16>
    %c0_11 = arith.constant 0 : index
    %c256 = arith.constant 256 : index
    %11 = vector.load %arg6[%c0_11, %c256] : memref<128x384xbf16, #tpu.memory_space<vmem>>, vector<128x16xbf16>
    %cst_12 = arith.constant dense<0.000000e+00> : vector<128x128xf32>
    %12 = tpu.matmul %9, %10, %cst_12 {dimension_numbers = #tpu.dot_dimension_numbers<[1], [1], [0], [0], [0, 0, 1, 0], [], []>} : vector<128x16xbf16>, vector<128x16xbf16>, vector<128x128xf32> -> vector<128x128xf32>
    %cst_13 = arith.constant dense<0xFF800000> : vector<128xf32>
    %13 = vector.multi_reduction <maximumf>, %12, %cst_13 [1] : vector<128x128xf32> to vector<128xf32>
    %14 = vector.shape_cast %13 : vector<128xf32> to vector<128x1xf32>
    %15 = vector.broadcast %14 : vector<128x1xf32> to vector<128x128xf32>
    %16 = arith.subf %12, %15 : vector<128x128xf32>
    %17 = math.exp %16 : vector<128x128xf32>
    %cst_14 = arith.constant dense<0.000000e+00> : vector<128xf32>
    %18 = vector.multi_reduction <add>, %17, %cst_14 [1] : vector<128x128xf32> to vector<128xf32>
    %19 = vector.shape_cast %18 : vector<128xf32> to vector<128x1xf32>
    %20 = arith.truncf %17 : vector<128x128xf32> to vector<128x128xbf16>
    %cst_15 = arith.constant dense<0.000000e+00> : vector<128x16xf32>
    %21 = tpu.matmul %20, %11, %cst_15 {dimension_numbers = #tpu.dot_dimension_numbers<[1], [0], [0], [1], [0, 0, 1, 1], [], []>} : vector<128x128xbf16>, vector<128x16xbf16>, vector<128x16xf32> -> vector<128x16xf32>
    %22 = tpu.reciprocal %19 {approx = true} : vector<128x1xf32> -> vector<128x1xf32>
    %23 = vector.broadcast %22 : vector<128x1xf32> to vector<128x16xf32>
    %24 = arith.mulf %21, %23 : vector<128x16xf32>
    %c0_16 = arith.constant 0 : index
    %c0_17 = arith.constant 0 : index
    %25 = vector.load %arg3[%c0_16, %c0_17] : memref<128x128xf32, #tpu.memory_space<vmem>>, vector<16x128xf32>
    %cst_18 = arith.constant dense<0.000000e+00> : vector<128x128xf32>
    %26 = tpu.matmul %24, %25, %cst_18 {dimension_numbers = #tpu.dot_dimension_numbers<[1], [0], [0], [1], [0, 0, 1, 1], [], []>} : vector<128x16xf32>, vector<16x128xf32>, vector<128x128xf32> -> vector<128x128xf32>
    %27 = arith.addf %8, %26 : vector<128x128xf32>
    %c0_19 = arith.constant 0 : index
    %c16 = arith.constant 16 : index
    %28 = vector.load %arg6[%c0_19, %c16] : memref<128x384xbf16, #tpu.memory_space<vmem>>, vector<128x16xbf16>
    %c0_20 = arith.constant 0 : index
    %c144 = arith.constant 144 : index
    %29 = vector.load %arg6[%c0_20, %c144] : memref<128x384xbf16, #tpu.memory_space<vmem>>, vector<128x16xbf16>
    %c0_21 = arith.constant 0 : index
    %c272 = arith.constant 272 : index
    %30 = vector.load %arg6[%c0_21, %c272] : memref<128x384xbf16, #tpu.memory_space<vmem>>, vector<128x16xbf16>
    %cst_22 = arith.constant dense<0.000000e+00> : vector<128x128xf32>
    %31 = tpu.matmul %28, %29, %cst_22 {dimension_numbers = #tpu.dot_dimension_numbers<[1], [1], [0], [0], [0, 0, 1, 0], [], []>} : vector<128x16xbf16>, vector<128x16xbf16>, vector<128x128xf32> -> vector<128x128xf32>
    %cst_23 = arith.constant dense<0xFF800000> : vector<128xf32>
    %32 = vector.multi_reduction <maximumf>, %31, %cst_23 [1] : vector<128x128xf32> to vector<128xf32>
    %33 = vector.shape_cast %32 : vector<128xf32> to vector<128x1xf32>
    %34 = vector.broadcast %33 : vector<128x1xf32> to vector<128x128xf32>
    %35 = arith.subf %31, %34 : vector<128x128xf32>
    %36 = math.exp %35 : vector<128x128xf32>
    %cst_24 = arith.constant dense<0.000000e+00> : vector<128xf32>
    %37 = vector.multi_reduction <add>, %36, %cst_24 [1] : vector<128x128xf32> to vector<128xf32>
    %38 = vector.shape_cast %37 : vector<128xf32> to vector<128x1xf32>
    %39 = arith.truncf %36 : vector<128x128xf32> to vector<128x128xbf16>
    %cst_25 = arith.constant dense<0.000000e+00> : vector<128x16xf32>
    %40 = tpu.matmul %39, %30, %cst_25 {dimension_numbers = #tpu.dot_dimension_numbers<[1], [0], [0], [1], [0, 0, 1, 1], [], []>} : vector<128x128xbf16>, vector<128x16xbf16>, vector<128x16xf32> -> vector<128x16xf32>
    %41 = tpu.reciprocal %38 {approx = true} : vector<128x1xf32> -> vector<128x1xf32>
    %42 = vector.broadcast %41 : vector<128x1xf32> to vector<128x16xf32>
    %43 = arith.mulf %40, %42 : vector<128x16xf32>
    %c16_26 = arith.constant 16 : index
    %c0_27 = arith.constant 0 : index
    %44 = vector.load %arg3[%c16_26, %c0_27] : memref<128x128xf32, #tpu.memory_space<vmem>>, vector<16x128xf32>
    %cst_28 = arith.constant dense<0.000000e+00> : vector<128x128xf32>
    %45 = tpu.matmul %43, %44, %cst_28 {dimension_numbers = #tpu.dot_dimension_numbers<[1], [0], [0], [1], [0, 0, 1, 1], [], []>} : vector<128x16xf32>, vector<16x128xf32>, vector<128x128xf32> -> vector<128x128xf32>
    %46 = arith.addf %27, %45 : vector<128x128xf32>
    %c0_29 = arith.constant 0 : index
    %c32 = arith.constant 32 : index
    %47 = vector.load %arg6[%c0_29, %c32] : memref<128x384xbf16, #tpu.memory_space<vmem>>, vector<128x16xbf16>
    %c0_30 = arith.constant 0 : index
    %c160 = arith.constant 160 : index
    %48 = vector.load %arg6[%c0_30, %c160] : memref<128x384xbf16, #tpu.memory_space<vmem>>, vector<128x16xbf16>
    %c0_31 = arith.constant 0 : index
    %c288 = arith.constant 288 : index
    %49 = vector.load %arg6[%c0_31, %c288] : memref<128x384xbf16, #tpu.memory_space<vmem>>, vector<128x16xbf16>
    %cst_32 = arith.constant dense<0.000000e+00> : vector<128x128xf32>
    %50 = tpu.matmul %47, %48, %cst_32 {dimension_numbers = #tpu.dot_dimension_numbers<[1], [1], [0], [0], [0, 0, 1, 0], [], []>} : vector<128x16xbf16>, vector<128x16xbf16>, vector<128x128xf32> -> vector<128x128xf32>
    %cst_33 = arith.constant dense<0xFF800000> : vector<128xf32>
    %51 = vector.multi_reduction <maximumf>, %50, %cst_33 [1] : vector<128x128xf32> to vector<128xf32>
    %52 = vector.shape_cast %51 : vector<128xf32> to vector<128x1xf32>
    %53 = vector.broadcast %52 : vector<128x1xf32> to vector<128x128xf32>
    %54 = arith.subf %50, %53 : vector<128x128xf32>
    %55 = math.exp %54 : vector<128x128xf32>
    %cst_34 = arith.constant dense<0.000000e+00> : vector<128xf32>
    %56 = vector.multi_reduction <add>, %55, %cst_34 [1] : vector<128x128xf32> to vector<128xf32>
    %57 = vector.shape_cast %56 : vector<128xf32> to vector<128x1xf32>
    %58 = arith.truncf %55 : vector<128x128xf32> to vector<128x128xbf16>
    %cst_35 = arith.constant dense<0.000000e+00> : vector<128x16xf32>
    %59 = tpu.matmul %58, %49, %cst_35 {dimension_numbers = #tpu.dot_dimension_numbers<[1], [0], [0], [1], [0, 0, 1, 1], [], []>} : vector<128x128xbf16>, vector<128x16xbf16>, vector<128x16xf32> -> vector<128x16xf32>
    %60 = tpu.reciprocal %57 {approx = true} : vector<128x1xf32> -> vector<128x1xf32>
    %61 = vector.broadcast %60 : vector<128x1xf32> to vector<128x16xf32>
    %62 = arith.mulf %59, %61 : vector<128x16xf32>
    %c32_36 = arith.constant 32 : index
    %c0_37 = arith.constant 0 : index
    %63 = vector.load %arg3[%c32_36, %c0_37] : memref<128x128xf32, #tpu.memory_space<vmem>>, vector<16x128xf32>
    %cst_38 = arith.constant dense<0.000000e+00> : vector<128x128xf32>
    %64 = tpu.matmul %62, %63, %cst_38 {dimension_numbers = #tpu.dot_dimension_numbers<[1], [0], [0], [1], [0, 0, 1, 1], [], []>} : vector<128x16xf32>, vector<16x128xf32>, vector<128x128xf32> -> vector<128x128xf32>
    %65 = arith.addf %46, %64 : vector<128x128xf32>
    %c0_39 = arith.constant 0 : index
    %c48 = arith.constant 48 : index
    %66 = vector.load %arg6[%c0_39, %c48] : memref<128x384xbf16, #tpu.memory_space<vmem>>, vector<128x16xbf16>
    %c0_40 = arith.constant 0 : index
    %c176 = arith.constant 176 : index
    %67 = vector.load %arg6[%c0_40, %c176] : memref<128x384xbf16, #tpu.memory_space<vmem>>, vector<128x16xbf16>
    %c0_41 = arith.constant 0 : index
    %c304 = arith.constant 304 : index
    %68 = vector.load %arg6[%c0_41, %c304] : memref<128x384xbf16, #tpu.memory_space<vmem>>, vector<128x16xbf16>
    %cst_42 = arith.constant dense<0.000000e+00> : vector<128x128xf32>
    %69 = tpu.matmul %66, %67, %cst_42 {dimension_numbers = #tpu.dot_dimension_numbers<[1], [1], [0], [0], [0, 0, 1, 0], [], []>} : vector<128x16xbf16>, vector<128x16xbf16>, vector<128x128xf32> -> vector<128x128xf32>
    %cst_43 = arith.constant dense<0xFF800000> : vector<128xf32>
    %70 = vector.multi_reduction <maximumf>, %69, %cst_43 [1] : vector<128x128xf32> to vector<128xf32>
    %71 = vector.shape_cast %70 : vector<128xf32> to vector<128x1xf32>
    %72 = vector.broadcast %71 : vector<128x1xf32> to vector<128x128xf32>
    %73 = arith.subf %69, %72 : vector<128x128xf32>
    %74 = math.exp %73 : vector<128x128xf32>
    %cst_44 = arith.constant dense<0.000000e+00> : vector<128xf32>
    %75 = vector.multi_reduction <add>, %74, %cst_44 [1] : vector<128x128xf32> to vector<128xf32>
    %76 = vector.shape_cast %75 : vector<128xf32> to vector<128x1xf32>
    %77 = arith.truncf %74 : vector<128x128xf32> to vector<128x128xbf16>
    %cst_45 = arith.constant dense<0.000000e+00> : vector<128x16xf32>
    %78 = tpu.matmul %77, %68, %cst_45 {dimension_numbers = #tpu.dot_dimension_numbers<[1], [0], [0], [1], [0, 0, 1, 1], [], []>} : vector<128x128xbf16>, vector<128x16xbf16>, vector<128x16xf32> -> vector<128x16xf32>
    %79 = tpu.reciprocal %76 {approx = true} : vector<128x1xf32> -> vector<128x1xf32>
    %80 = vector.broadcast %79 : vector<128x1xf32> to vector<128x16xf32>
    %81 = arith.mulf %78, %80 : vector<128x16xf32>
    %c48_46 = arith.constant 48 : index
    %c0_47 = arith.constant 0 : index
    %82 = vector.load %arg3[%c48_46, %c0_47] : memref<128x128xf32, #tpu.memory_space<vmem>>, vector<16x128xf32>
    %cst_48 = arith.constant dense<0.000000e+00> : vector<128x128xf32>
    %83 = tpu.matmul %81, %82, %cst_48 {dimension_numbers = #tpu.dot_dimension_numbers<[1], [0], [0], [1], [0, 0, 1, 1], [], []>} : vector<128x16xf32>, vector<16x128xf32>, vector<128x128xf32> -> vector<128x128xf32>
    %84 = arith.addf %65, %83 : vector<128x128xf32>
    %c0_49 = arith.constant 0 : index
    %c64 = arith.constant 64 : index
    %85 = vector.load %arg6[%c0_49, %c64] : memref<128x384xbf16, #tpu.memory_space<vmem>>, vector<128x16xbf16>
    %c0_50 = arith.constant 0 : index
    %c192 = arith.constant 192 : index
    %86 = vector.load %arg6[%c0_50, %c192] : memref<128x384xbf16, #tpu.memory_space<vmem>>, vector<128x16xbf16>
    %c0_51 = arith.constant 0 : index
    %c320 = arith.constant 320 : index
    %87 = vector.load %arg6[%c0_51, %c320] : memref<128x384xbf16, #tpu.memory_space<vmem>>, vector<128x16xbf16>
    %cst_52 = arith.constant dense<0.000000e+00> : vector<128x128xf32>
    %88 = tpu.matmul %85, %86, %cst_52 {dimension_numbers = #tpu.dot_dimension_numbers<[1], [1], [0], [0], [0, 0, 1, 0], [], []>} : vector<128x16xbf16>, vector<128x16xbf16>, vector<128x128xf32> -> vector<128x128xf32>
    %cst_53 = arith.constant dense<0xFF800000> : vector<128xf32>
    %89 = vector.multi_reduction <maximumf>, %88, %cst_53 [1] : vector<128x128xf32> to vector<128xf32>
    %90 = vector.shape_cast %89 : vector<128xf32> to vector<128x1xf32>
    %91 = vector.broadcast %90 : vector<128x1xf32> to vector<128x128xf32>
    %92 = arith.subf %88, %91 : vector<128x128xf32>
    %93 = math.exp %92 : vector<128x128xf32>
    %cst_54 = arith.constant dense<0.000000e+00> : vector<128xf32>
    %94 = vector.multi_reduction <add>, %93, %cst_54 [1] : vector<128x128xf32> to vector<128xf32>
    %95 = vector.shape_cast %94 : vector<128xf32> to vector<128x1xf32>
    %96 = arith.truncf %93 : vector<128x128xf32> to vector<128x128xbf16>
    %cst_55 = arith.constant dense<0.000000e+00> : vector<128x16xf32>
    %97 = tpu.matmul %96, %87, %cst_55 {dimension_numbers = #tpu.dot_dimension_numbers<[1], [0], [0], [1], [0, 0, 1, 1], [], []>} : vector<128x128xbf16>, vector<128x16xbf16>, vector<128x16xf32> -> vector<128x16xf32>
    %98 = tpu.reciprocal %95 {approx = true} : vector<128x1xf32> -> vector<128x1xf32>
    %99 = vector.broadcast %98 : vector<128x1xf32> to vector<128x16xf32>
    %100 = arith.mulf %97, %99 : vector<128x16xf32>
    %c64_56 = arith.constant 64 : index
    %c0_57 = arith.constant 0 : index
    %101 = vector.load %arg3[%c64_56, %c0_57] : memref<128x128xf32, #tpu.memory_space<vmem>>, vector<16x128xf32>
    %cst_58 = arith.constant dense<0.000000e+00> : vector<128x128xf32>
    %102 = tpu.matmul %100, %101, %cst_58 {dimension_numbers = #tpu.dot_dimension_numbers<[1], [0], [0], [1], [0, 0, 1, 1], [], []>} : vector<128x16xf32>, vector<16x128xf32>, vector<128x128xf32> -> vector<128x128xf32>
    %103 = arith.addf %84, %102 : vector<128x128xf32>
    %c0_59 = arith.constant 0 : index
    %c80 = arith.constant 80 : index
    %104 = vector.load %arg6[%c0_59, %c80] : memref<128x384xbf16, #tpu.memory_space<vmem>>, vector<128x16xbf16>
    %c0_60 = arith.constant 0 : index
    %c208 = arith.constant 208 : index
    %105 = vector.load %arg6[%c0_60, %c208] : memref<128x384xbf16, #tpu.memory_space<vmem>>, vector<128x16xbf16>
    %c0_61 = arith.constant 0 : index
    %c336 = arith.constant 336 : index
    %106 = vector.load %arg6[%c0_61, %c336] : memref<128x384xbf16, #tpu.memory_space<vmem>>, vector<128x16xbf16>
    %cst_62 = arith.constant dense<0.000000e+00> : vector<128x128xf32>
    %107 = tpu.matmul %104, %105, %cst_62 {dimension_numbers = #tpu.dot_dimension_numbers<[1], [1], [0], [0], [0, 0, 1, 0], [], []>} : vector<128x16xbf16>, vector<128x16xbf16>, vector<128x128xf32> -> vector<128x128xf32>
    %cst_63 = arith.constant dense<0xFF800000> : vector<128xf32>
    %108 = vector.multi_reduction <maximumf>, %107, %cst_63 [1] : vector<128x128xf32> to vector<128xf32>
    %109 = vector.shape_cast %108 : vector<128xf32> to vector<128x1xf32>
    %110 = vector.broadcast %109 : vector<128x1xf32> to vector<128x128xf32>
    %111 = arith.subf %107, %110 : vector<128x128xf32>
    %112 = math.exp %111 : vector<128x128xf32>
    %cst_64 = arith.constant dense<0.000000e+00> : vector<128xf32>
    %113 = vector.multi_reduction <add>, %112, %cst_64 [1] : vector<128x128xf32> to vector<128xf32>
    %114 = vector.shape_cast %113 : vector<128xf32> to vector<128x1xf32>
    %115 = arith.truncf %112 : vector<128x128xf32> to vector<128x128xbf16>
    %cst_65 = arith.constant dense<0.000000e+00> : vector<128x16xf32>
    %116 = tpu.matmul %115, %106, %cst_65 {dimension_numbers = #tpu.dot_dimension_numbers<[1], [0], [0], [1], [0, 0, 1, 1], [], []>} : vector<128x128xbf16>, vector<128x16xbf16>, vector<128x16xf32> -> vector<128x16xf32>
    %117 = tpu.reciprocal %114 {approx = true} : vector<128x1xf32> -> vector<128x1xf32>
    %118 = vector.broadcast %117 : vector<128x1xf32> to vector<128x16xf32>
    %119 = arith.mulf %116, %118 : vector<128x16xf32>
    %c80_66 = arith.constant 80 : index
    %c0_67 = arith.constant 0 : index
    %120 = vector.load %arg3[%c80_66, %c0_67] : memref<128x128xf32, #tpu.memory_space<vmem>>, vector<16x128xf32>
    %cst_68 = arith.constant dense<0.000000e+00> : vector<128x128xf32>
    %121 = tpu.matmul %119, %120, %cst_68 {dimension_numbers = #tpu.dot_dimension_numbers<[1], [0], [0], [1], [0, 0, 1, 1], [], []>} : vector<128x16xf32>, vector<16x128xf32>, vector<128x128xf32> -> vector<128x128xf32>
    %122 = arith.addf %103, %121 : vector<128x128xf32>
    %c0_69 = arith.constant 0 : index
    %c96 = arith.constant 96 : index
    %123 = vector.load %arg6[%c0_69, %c96] : memref<128x384xbf16, #tpu.memory_space<vmem>>, vector<128x16xbf16>
    %c0_70 = arith.constant 0 : index
    %c224 = arith.constant 224 : index
    %124 = vector.load %arg6[%c0_70, %c224] : memref<128x384xbf16, #tpu.memory_space<vmem>>, vector<128x16xbf16>
    %c0_71 = arith.constant 0 : index
    %c352 = arith.constant 352 : index
    %125 = vector.load %arg6[%c0_71, %c352] : memref<128x384xbf16, #tpu.memory_space<vmem>>, vector<128x16xbf16>
    %cst_72 = arith.constant dense<0.000000e+00> : vector<128x128xf32>
    %126 = tpu.matmul %123, %124, %cst_72 {dimension_numbers = #tpu.dot_dimension_numbers<[1], [1], [0], [0], [0, 0, 1, 0], [], []>} : vector<128x16xbf16>, vector<128x16xbf16>, vector<128x128xf32> -> vector<128x128xf32>
    %cst_73 = arith.constant dense<0xFF800000> : vector<128xf32>
    %127 = vector.multi_reduction <maximumf>, %126, %cst_73 [1] : vector<128x128xf32> to vector<128xf32>
    %128 = vector.shape_cast %127 : vector<128xf32> to vector<128x1xf32>
    %129 = vector.broadcast %128 : vector<128x1xf32> to vector<128x128xf32>
    %130 = arith.subf %126, %129 : vector<128x128xf32>
    %131 = math.exp %130 : vector<128x128xf32>
    %cst_74 = arith.constant dense<0.000000e+00> : vector<128xf32>
    %132 = vector.multi_reduction <add>, %131, %cst_74 [1] : vector<128x128xf32> to vector<128xf32>
    %133 = vector.shape_cast %132 : vector<128xf32> to vector<128x1xf32>
    %134 = arith.truncf %131 : vector<128x128xf32> to vector<128x128xbf16>
    %cst_75 = arith.constant dense<0.000000e+00> : vector<128x16xf32>
    %135 = tpu.matmul %134, %125, %cst_75 {dimension_numbers = #tpu.dot_dimension_numbers<[1], [0], [0], [1], [0, 0, 1, 1], [], []>} : vector<128x128xbf16>, vector<128x16xbf16>, vector<128x16xf32> -> vector<128x16xf32>
    %136 = tpu.reciprocal %133 {approx = true} : vector<128x1xf32> -> vector<128x1xf32>
    %137 = vector.broadcast %136 : vector<128x1xf32> to vector<128x16xf32>
    %138 = arith.mulf %135, %137 : vector<128x16xf32>
    %c96_76 = arith.constant 96 : index
    %c0_77 = arith.constant 0 : index
    %139 = vector.load %arg3[%c96_76, %c0_77] : memref<128x128xf32, #tpu.memory_space<vmem>>, vector<16x128xf32>
    %cst_78 = arith.constant dense<0.000000e+00> : vector<128x128xf32>
    %140 = tpu.matmul %138, %139, %cst_78 {dimension_numbers = #tpu.dot_dimension_numbers<[1], [0], [0], [1], [0, 0, 1, 1], [], []>} : vector<128x16xf32>, vector<16x128xf32>, vector<128x128xf32> -> vector<128x128xf32>
    %141 = arith.addf %122, %140 : vector<128x128xf32>
    %c0_79 = arith.constant 0 : index
    %c112 = arith.constant 112 : index
    %142 = vector.load %arg6[%c0_79, %c112] : memref<128x384xbf16, #tpu.memory_space<vmem>>, vector<128x16xbf16>
    %c0_80 = arith.constant 0 : index
    %c240 = arith.constant 240 : index
    %143 = vector.load %arg6[%c0_80, %c240] : memref<128x384xbf16, #tpu.memory_space<vmem>>, vector<128x16xbf16>
    %c0_81 = arith.constant 0 : index
    %c368 = arith.constant 368 : index
    %144 = vector.load %arg6[%c0_81, %c368] : memref<128x384xbf16, #tpu.memory_space<vmem>>, vector<128x16xbf16>
    %cst_82 = arith.constant dense<0.000000e+00> : vector<128x128xf32>
    %145 = tpu.matmul %142, %143, %cst_82 {dimension_numbers = #tpu.dot_dimension_numbers<[1], [1], [0], [0], [0, 0, 1, 0], [], []>} : vector<128x16xbf16>, vector<128x16xbf16>, vector<128x128xf32> -> vector<128x128xf32>
    %cst_83 = arith.constant dense<0xFF800000> : vector<128xf32>
    %146 = vector.multi_reduction <maximumf>, %145, %cst_83 [1] : vector<128x128xf32> to vector<128xf32>
    %147 = vector.shape_cast %146 : vector<128xf32> to vector<128x1xf32>
    %148 = vector.broadcast %147 : vector<128x1xf32> to vector<128x128xf32>
    %149 = arith.subf %145, %148 : vector<128x128xf32>
    %150 = math.exp %149 : vector<128x128xf32>
    %cst_84 = arith.constant dense<0.000000e+00> : vector<128xf32>
    %151 = vector.multi_reduction <add>, %150, %cst_84 [1] : vector<128x128xf32> to vector<128xf32>
    %152 = vector.shape_cast %151 : vector<128xf32> to vector<128x1xf32>
    %153 = arith.truncf %150 : vector<128x128xf32> to vector<128x128xbf16>
    %cst_85 = arith.constant dense<0.000000e+00> : vector<128x16xf32>
    %154 = tpu.matmul %153, %144, %cst_85 {dimension_numbers = #tpu.dot_dimension_numbers<[1], [0], [0], [1], [0, 0, 1, 1], [], []>} : vector<128x128xbf16>, vector<128x16xbf16>, vector<128x16xf32> -> vector<128x16xf32>
    %155 = tpu.reciprocal %152 {approx = true} : vector<128x1xf32> -> vector<128x1xf32>
    %156 = vector.broadcast %155 : vector<128x1xf32> to vector<128x16xf32>
    %157 = arith.mulf %154, %156 : vector<128x16xf32>
    %c112_86 = arith.constant 112 : index
    %c0_87 = arith.constant 0 : index
    %158 = vector.load %arg3[%c112_86, %c0_87] : memref<128x128xf32, #tpu.memory_space<vmem>>, vector<16x128xf32>
    %cst_88 = arith.constant dense<0.000000e+00> : vector<128x128xf32>
    %159 = tpu.matmul %157, %158, %cst_88 {dimension_numbers = #tpu.dot_dimension_numbers<[1], [0], [0], [1], [0, 0, 1, 1], [], []>} : vector<128x16xf32>, vector<16x128xf32>, vector<128x128xf32> -> vector<128x128xf32>
    %160 = arith.addf %141, %159 : vector<128x128xf32>
    %c0_89 = arith.constant 0 : index
    %c0_90 = arith.constant 0 : index
    %c0_91 = arith.constant 0 : index
    %161 = vector.load %arg5[%c0_89, %c0_90, %c0_91] : memref<1x128x128xf32, #tpu.memory_space<vmem>>, vector<1x128x128xf32>
    %162 = vector.shape_cast %161 : vector<1x128x128xf32> to vector<128x128xf32>
    %163 = vector.shape_cast %160 : vector<128x128xf32> to vector<1x128x128xf32>
    tpu.vector_store %arg5[%c0_89, %c0_90, %c0_91], %163 {strides = array<i32>} : memref<1x128x128xf32, #tpu.memory_space<vmem>>, vector<1x128x128xf32>,
    return
  }
  func.func @transform_0(%arg0: i32) -> (i32, i32, i32) {
    %c0_i32 = arith.constant 0 : i32
    %c0_i32_0 = arith.constant 0 : i32
    %c0_i32_1 = arith.constant 0 : i32
    return %arg0, %c0_i32, %c0_i32_0 : i32, i32, i32
  }
  func.func @transform_1(%arg0: i32) -> (i32, i32) {
    %c0_i32 = arith.constant 0 : i32
    %c0_i32_0 = arith.constant 0 : i32
    %c0_i32_1 = arith.constant 0 : i32
    return %c0_i32, %c0_i32_0 : i32, i32
  }
  func.func @transform_2(%arg0: i32) -> (i32, i32) {
    %c0_i32 = arith.constant 0 : i32
    %c0_i32_0 = arith.constant 0 : i32
    %c0_i32_1 = arith.constant 0 : i32
    return %c0_i32, %c0_i32_0 : i32, i32
  }
  func.func @transform_3(%arg0: i32) -> (i32, i32) {
    %c0_i32 = arith.constant 0 : i32
    %c0_i32_0 = arith.constant 0 : i32
    %c0_i32_1 = arith.constant 0 : i32
    return %c0_i32, %c0_i32_0 : i32, i32
  }
  func.func @transform_4(%arg0: i32) -> (i32, i32, i32) {
    %c0_i32 = arith.constant 0 : i32
    %c0_i32_0 = arith.constant 0 : i32
    %c0_i32_1 = arith.constant 0 : i32
    return %arg0, %c0_i32, %c0_i32_0 : i32, i32, i32
  }
}

</mosaic_0001>

<bundles_post_ra>
// kernel: tpu_custom_call.1
= control target key start
LH: loop header
LB: loop body
LE: loop exit
PB: predicated region body
PF: predicated region fallthrough
CT: control target
= control target key end

     0   :  { %9 = vsyncpa [#allocation4], 0  ;;  %s10690_s0 = inlined_call_operand.hbm [shape: f32[2,128,128], index: 0, kind: input, shape index: {}]   ;;  %s10691_s1 = inlined_call_operand.hbm [shape: f32[128,384], index: 1, kind: input, shape index: {}]   ;;  %s10692_s2 = inlined_call_operand.hbm [shape: f32[128,128], index: 2, kind: input, shape index: {}]   ;;  %s10693_s3 = inlined_call_operand.vmem [shape: f32[1,128], index: 3, kind: input, shape index: {}]   ;;  %s10694_s4 = inlined_call_operand.hbm [shape: f32[2,128,128], index: 4, kind: output, shape index: {}]  }
   0x1   :  { %11 = vsyncpa [#allocation4 + $0x1], 0 }
   0x2   :  { %12 = vsyncpa [#allocation7], 0 }
   0x3   :  { %13 = vsyncpa [#allocation5], 0 }
   0x4   :  { %15 = vsyncpa [#allocation5 + $0x1], 0  ;;  %s8593_s15 = smov 0   ;;  %s8595_s16 = smov 0  }
   0x5   :  { %s8597_s17 = smov 0   ;;  %s8599_s18 = smov 0  }
   0x6 LB: > { %s8614_s19 = sadd.s32 4294967295, %s8548_s18   ;;  %s6074_s20 = sadd.s32 4294967294, %s8548_s18   ;;  %s8548_s18 = sphi %s8599_s18, %s10847_s18   ;;  %s8544_s17 = sphi %s8597_s17, %s10846_s17   ;;  %s8540_s16 = sphi %s8595_s16, %s10845_s16   ;;  %s8536_s15 = sphi %s8593_s15, %s10844_s15  }
   0x7   : > { %p41_p0 = scmp.ne.s32.totalorder %s8540_s16, %s8536_s15  ;;  %p10695_p1 = scmp.eq.s32.totalorder %s8614_s19, 0 }
   0x8   : > { %p134_p3 = scmp.eq.s32.totalorder %s6074_s20, 1  ;;  %p6075_p5 = scmp.ge.s32.totalorder %s8548_s18, 1 }
   0x9   : > { %p8623_p4 = por %p10695_p1, %p41_p0  ;;  %p141_p7 = scmp.lt.s32.totalorder %s8548_s18, 3 }
   0xa   : > { %p8628_p6 = por %p134_p3, %p41_p0  ;;  %s8550_s24 = smov [#allocation6]  }
   0xb   : > { %s10749_s21 = scalar_select %p8623_p4, 1, 0 }
   0xc   : > { %s10750_s22 = scalar_select %p8628_p6, 1, 0 }
   0xd   : > { %p8633_p8 = pnand %p6075_p5, %p141_p7  ;;  %s153_s25 = sshll.u32 %s8550_s24, 4  ;;  %s8637_s25 = int_to_ptr.vmem [resolvable:$true] %s153_s25 }
   0xe   : > { %s8551_s27 = smov [#allocation8]   ;;  %s8392_s5 = scalar_lea.hbm %s10691_s1, 6144 }
   0xf   : > { %p7811_p9 = pneg %p8633_p8  ;;  %s166_s28 = sshll.u32 %s8551_s27, 4  ;;  %s8648_s28 = int_to_ptr.vmem [resolvable:$true] %s166_s28 }
  0x10   : > { %p8393_p12 = scmp.ne.s32.totalorder %s10691_s1, %s8392_s5  ;;  %p8399_p5 = scmp.lt.u32.totalorder %s8392_s5, %s10691_s1 }
  0x11   : > { %p8644_p11 = pnand %p7811_p9, %p10695_p1 }
  0x13   : > { %p8394_p13 = pneg %p8644_p11 }
  0x15   : > { %p8395_p0 = pnand %p8394_p13, %p8393_p12 }
  0x17   : > { %p8396_p3 = pneg %p8395_p0 }
  0x19   : > { %p8401_p7 = pnand %p8399_p5, %p8396_p3 }
  0x1b   : > { %8404 = shalt.err (!%p8401_p7)
}
  0x1c   : > { %s8405_s10 = scalar_lea.vmem %s8637_s25, 6144  ;;  %p8413_p2 = scmp.lt.s32.totalorder %s8637_s25, %s8637_s25 }
  0x1d   : > { %p8406_p9 = scmp.ne.s32.totalorder %s8637_s25, %s8405_s10  ;;  %p8414_p12 = scmp.lt.s32.totalorder %s8405_s10, %s8405_s10 }
  0x1f   : > { %p8408_p10 = pnand %p8406_p9, %p8394_p13  ;;  %p8415_p0 = por %p8414_p12, %p8413_p2 }
  0x21   : > { %p8409_p1 = pneg %p8408_p10 }
  0x23   : > { %p8416_p6 = pnand %p8415_p0, %p8409_p1 }
  0x25   : > { %8419 = shalt.err (!%p8416_p6)
}
  0x26   : > { %s8552_s11 = smov 384   ;;  %s8553_s12 = smov 24  }
  0x27   : > { %7814 = dma.hbm_to_vmem [thread:$0]  (!%p8644_p11), %s10691_s1, 6144, %s8637_s25, [#allocation7], %s8552_s11, %s8552_s11, %s8553_s12  }
  0x28   : > { %s8420_s27 = scalar_lea.hbm %s10692_s2, 2048 }
  0x29   : > { %p8421_p2 = scmp.ne.s32.totalorder %s10692_s2, %s8420_s27  ;;  %p8427_p10 = scmp.lt.u32.totalorder %s8420_s27, %s10692_s2 }
  0x2b   : > { %p8423_p1 = pnand %p8421_p2, %p8394_p13 }
  0x2d   : > { %p8424_p6 = pneg %p8423_p1 }
  0x2f   : > { %p8429_p3 = pnand %p8427_p10, %p8424_p6 }
  0x31   : > { %8432 = shalt.err (!%p8429_p3)
}
  0x32   : > { %s8433_s25 = scalar_lea.vmem %s8648_s28, 2048  ;;  %p8441_p12 = scmp.lt.s32.totalorder %s8648_s28, %s8648_s28 }
  0x33   : > { %p8434_p5 = scmp.ne.s32.totalorder %s8648_s28, %s8433_s25  ;;  %p8442_p0 = scmp.lt.s32.totalorder %s8433_s25, %s8433_s25 }
  0x35   : > { %p8436_p7 = pnand %p8434_p5, %p8394_p13  ;;  %p8443_p2 = por %p8442_p0, %p8441_p12 }
  0x37   : > { %p8437_p9 = pneg %p8436_p7 }
  0x39   : > { %p8444_p1 = pnand %p8443_p2, %p8437_p9 }
  0x3b   : > { %8447 = shalt.err (!%p8444_p1)
}
  0x3c   : > { %s8554_s7 = smov 128   ;;  %s8555_s8 = smov 8  }
  0x3d   : > { %7817 = dma.hbm_to_vmem [thread:$0]  (!%p8644_p11), %s10692_s2, 2048, %s8648_s28, [#allocation7], %s8554_s7, %s8554_s7, %s8555_s8  }
  0x3e   : > { %s8706_s11 = sadd.s32 1, %s8548_s18   ;;  %s28_s13 = sadd.s32 1, %s8544_s17 }
  0x3f   : > { %s25_s12 = ssub.s32 %s8548_s18, %s8706_s11  ;;  %p35_p6 = scmp.ne.s32.totalorder %s8544_s17, %s8540_s16 }
  0x40   : > { %p26_p13 = scmp.eq.s32.totalorder %s25_s12, 0  ;;  %p36_p10 = scmp.eq.s32.totalorder %s8548_s18, 0 }
  0x41   : > { %p10753_p5 = scmp.eq.s32.totalorder %s8614_s19, 1  ;;  %p7828_p9 = scmp.lt.s32.totalorder %s8548_s18, 2 }
  0x42   : > { %s8715_s14 = scalar_select %p26_p13, %s8544_s17, %s28_s13  }
  0x43   : > { %p37_p3 = por %p36_p10, %p35_p6  ;;  %p8719_p7 = por %p10753_p5, %p35_p6 }
  0x44   : > { %s183_s20 = sand.u32 1, %s8544_s17   ;;  %s6285_s28 = sshll.u32 %s8548_s18, 11 }
  0x45   : > { %s10754_s26 = scalar_select %p8719_p7, 1, 0 }
  0x46   : > { %s6079_s24 = sshll.u32 %s183_s20, 7  ;;  %s8729_s30 = scalar_lea.hbm %s10690_s0, %s6285_s28 }
  0x47   : > { %s187_s5 = scalar_lea.vmem [#allocation3], %s6079_s24  ;;  %p8733_p11 = pnand %p7828_p9, %p37_p3 }
  0x48   : > { %s194_s6 = sshll.u32 %s187_s5, 4  ;;  %s8737_s9 = scalar_lea.sflag [#allocation4], %s183_s20  ;;  %s8731_s6 = int_to_ptr.vmem [resolvable:$true] %s194_s6 }
  0x49   : > { %s8448_s10 = scalar_lea.hbm %s8729_s30, 2048  ;;  %p8450_p0 = pneg %p8733_p11 }
  0x4a   : > { %p8449_p12 = scmp.ne.s32.totalorder %s8729_s30, %s8448_s10  ;;  %s8453_s24 = scalar_lea.hbm %s10690_s0, 4096 }
  0x4b   : > { %p8454_p13 = scmp.lt.u32.totalorder %s8729_s30, %s10690_s0  ;;  %p8455_p6 = scmp.lt.u32.totalorder %s8453_s24, %s8448_s10 }
  0x4c   : > { %p8451_p2 = pnand %p8450_p0, %p8449_p12  ;;  %p8457_p3 = scmp.lt.u32.totalorder %s8448_s10, %s8729_s30 }
  0x4d   : > { %p8456_p10 = por %p8455_p6, %p8454_p13 }
  0x4e   : > { %p8452_p1 = pneg %p8451_p2 }
  0x4f   : > { %p8458_p5 = por %p8457_p3, %p8456_p10 }
  0x51   : > { %p8459_p9 = pnand %p8458_p5, %p8452_p1 }
  0x53   : > { %8462 = shalt.err (!%p8459_p9)
}
  0x54   : > { %s8463_s20 = scalar_lea.vmem %s8731_s6, 2048  ;;  %s8556_s29 = smov [#allocation3]  }
  0x55   : > { %p8464_p12 = scmp.ne.s32.totalorder %s8731_s6, %s8463_s20  ;;  %s8468_s5 = sshll.u32 %s8556_s29, 4  ;;  %s8469_s5 = int_to_ptr.vmem [resolvable:$false] %s8468_s5 }
  0x56   : > { %s8470_s12 = scalar_lea.vmem %s8469_s5, 4096  ;;  %p8471_p4 = scmp.lt.s32.totalorder %s8731_s6, %s8469_s5 }
  0x57   : > { %p8466_p2 = pnand %p8464_p12, %p8450_p0  ;;  %p8472_p13 = scmp.lt.s32.totalorder %s8470_s12, %s8463_s20 }
  0x59   : > { %p8467_p7 = pneg %p8466_p2  ;;  %p8473_p6 = por %p8472_p13, %p8471_p4 }
  0x5b   : > { %p8474_p10 = pnand %p8473_p6, %p8467_p7 }
  0x5d   : > { %8477 = shalt.err (!%p8474_p10)
}
  0x5e   : > { %7821 = dma.hbm_to_vmem [thread:$0]  (!%p8733_p11), %s8729_s30, 2048, %s8731_s6, %s8737_s9, %s8554_s7, %s8554_s7, %s8555_s8  }
  0x5f   : > { %206 = sbr.rel (%p8633_p8) target bundleno = 4074 (0xfea), region = 36 }
  0x66   : > { %s8771_s10 = sand.u32 1, %s8540_s16   ;;  %p10756_p4 = scmp.ne.s32.totalorder %s10749_s21, 0 }
  0x67   : > { %s6083_s13 = sshll.u32 %s8771_s10, 7  ;;  %s209_s24 = scalar_lea.sflag [#allocation4], %s8771_s10 }
  0x68   : > { %s8777_s25 = scalar_lea.vmem [#allocation3], %s6083_s13 }
  0x69   : > { %8523 = dma.done.wait (%p10756_p4), %s209_s24, 2048  }
  0x6a   : > { %8525 = vsyncadd (%p10756_p4), %s209_s24, 4294965248  ;;  %p10757_p7 = scmp.eq.s32.totalorder %s8614_s19, 0 }
  0x6c   : > { %8527 = dma.done.wait (%p10757_p7), [#allocation7], 8192   ;;  %p10758_p8 = pmov %p10757_p7 }
  0x6d   : > { %v8557_v0 = vmov 0.0   ;;  %v263_v1 = vld [vmem:[#allocation6 + $0x8] sm:$0xff]  ;;  %v266_v2 = vld [vmem:[#allocation6 + $0x20] sm:$0xff]  ;;  %v264_v3 = vld [vmem:[#allocation6 + $0x10] sm:$0xff]  ;;  %vm695_vm0 = vcmask 130048   ;;  %s8558_s21 = smov 112  }
  0x6e   : > { %8529 = vsyncadd (%p10758_p8), [#allocation7], 4294959104  ;;  %374 = vmatprep.mubr.f32.mxu0 %v8557_v0  ;;  %v7511_v4 = vpack.c.bf16 %v266_v2, %v263_v1  ;;  %v267_v5 = vld [vmem:[#allocation6 + $0x28] sm:$0xff]  ;;  %v262_v6 = vld [vmem:[#allocation6] sm:$0xff]  ;;  %s8559_s23 = smov 80   ;;  %s8560_s7 = smov 96  }
  0x6f   : > { %v265_v7 = vld [vmem:[#allocation6 + $0x18] sm:$0xff]  ;;  %v7543_v8 = vpack.c.bf16 %v267_v5, %v264_v3  ;;  %v272_v11 = vld [vmem:[#allocation6 + $0x50] sm:$0xff]  ;;  %v270_v12 = vld [vmem:[#allocation6 + $0x40] sm:$0xff]  ;;  %s8561_s8 = smov 64   ;;  %s8562_s30 = smov 48  }
  0x70   : > { %v7513_v9 = vpack.c.bf16 %v265_v7, %v262_v6  ;;  %v269_v10 = vld [vmem:[#allocation6 + $0x38] sm:$0xff]  ;;  %7512 = vmatprep.subr.bf16.mxu0 %v7511_v4  ;;  %v268_v15 = vld [vmem:[#allocation6 + $0x30] sm:$0xff]  ;;  %v271_v16 = vld [vmem:[#allocation6 + $0x48] sm:$0xff]  ;;  %s8563_s6 = smov 32   ;;  %s8564_s9 = smov 16  }
  0x71   : > { %v7515_v13 = vpack.c.bf16 %v272_v11, %v269_v10  ;;  %v273_v14 = vld [vmem:[#allocation6 + $0x58] sm:$0xff]  ;;  %7544 = vmatprep.subr.bf16.mxu1 %v7543_v8  ;;  %v7517_v18 = vpack.c.bf16 %v271_v16, %v268_v15  ;;  %v275_v19 = vld [vmem:[#allocation6 + $0x68] sm:$0xff]  ;;  %v278_v20 = vld [vmem:[#allocation6 + $0x80] sm:$0xff]  ;;  %s10621_s20 = scalar_lea.vmem [#allocation9], %s6083_s13  ;;  %s6286_s29 = sshll.u32 %s8614_s19, 11 }
  0x72   : > { %7514 = vmatpush1.bf16.msra.mxu0 %v7513_v9  ;;  %v7547_v17 = vpack.c.bf16 %v273_v14, %v270_v12  ;;  %v276_v21 = vld [vmem:[#allocation6 + $0x70] sm:$0xff]  ;;  %7546 = vmatpush3.bf16.msra.mxu1 %v7543_v8  ;;  %v7519_v22 = vpack.c.bf16 %v278_v20, %v275_v19  ;;  %v279_v23 = vld [vmem:[#allocation6 + $0x88] sm:$0xff]  ;;  %v274_v24 = vld [vmem:[#allocation6 + $0x60] sm:$0xff]  ;;  %s5982_s5 = sshll.u32 %s10621_s20, 4  ;;  %s10642_s24 = scalar_lea.hbm %s10694_s4, %s6286_s29  ;;  %s10644_s5 = int_to_ptr.vmem [resolvable:$true] %s5982_s5 }
  0x73   : > { %7516 = vmatprep.subr.bf16.mxu0 %v7515_v13  ;;  %v277_v25 = vld [vmem:[#allocation6 + $0x78] sm:$0xff]  ;;  %v7551_v26 = vpack.c.bf16 %v279_v23, %v276_v21  ;;  %v284_v28 = vld [vmem:[#allocation6 + $0xb0] sm:$0xff]  ;;  %v282_v29 = vld [vmem:[#allocation6 + $0xa0] sm:$0xff]  ;;  %s5969_s19 = scalar_lea.sflag [#allocation5], %s8771_s10  ;;  %p10841_p0 = scmp.ne.s32.totalorder %s10754_s26, 0 }
  0x74   : > { %7548 = vmatprep.subr.bf16.mxu1 %v7547_v17  ;;  %v281_v27 = vld [vmem:[#allocation6 + $0x98] sm:$0xff]  ;;  %v7521_v31 = vpack.c.bf16 %v277_v25, %v274_v24  ;;  %v280_v33 = vld [vmem:[#allocation6 + $0x90] sm:$0xff]  ;;  %v283_v34 = vld [vmem:[#allocation6 + $0xa8] sm:$0xff] }
  0x75   : > { %v285_v30 = vld [vmem:[#allocation6 + $0xb8] sm:$0xff]  ;;  %v7523_v32 = vpack.c.bf16 %v284_v28, %v281_v27  ;;  %v287_v36 = vld [vmem:[#allocation6 + $0xc8] sm:$0xff]  ;;  %v290_v37 = vld [vmem:[#allocation6 + $0xe0] sm:$0xff]  ;;  %v7525_v40 = vpack.c.bf16 %v283_v34, %v280_v33 }
  0x76   : > { %7518 = vmatpush1.bf16.msra.mxu0 %v7517_v18  ;;  %7550 = vmatpush3.bf16.msra.mxu1 %v7547_v17  ;;  %v7555_v35 = vpack.c.bf16 %v285_v30, %v282_v29  ;;  %v288_v38 = vld [vmem:[#allocation6 + $0xd0] sm:$0xff]  ;;  %v291_v39 = vld [vmem:[#allocation6 + $0xe8] sm:$0xff]  ;;  %v7527_v41 = vpack.c.bf16 %v290_v37, %v287_v36  ;;  %v286_v42 = vld [vmem:[#allocation6 + $0xc0] sm:$0xff] }
  0x77   : > { %7520 = vmatprep.subr.bf16.mxu0 %v7519_v22  ;;  %7552 = vmatprep.subr.bf16.mxu1 %v7551_v26  ;;  %v289_v43 = vld [vmem:[#allocation6 + $0xd8] sm:$0xff]  ;;  %v7559_v44 = vpack.c.bf16 %v291_v39, %v288_v38  ;;  %v296_v46 = vld [vmem:[#allocation6 + $0x110] sm:$0xff]  ;;  %v294_v47 = vld [vmem:[#allocation6 + $0x100] sm:$0xff] }
  0x78   : > { %v293_v45 = vld [vmem:[#allocation6 + $0xf8] sm:$0xff]  ;;  %v7529_v49 = vpack.c.bf16 %v289_v43, %v286_v42  ;;  %v246_v50 = vld [vmem:[%s8777_s25] sm:$0xff]  ;;  %v292_v52 = vld [vmem:[#allocation6 + $0xf0] sm:$0xff] }
  0x79   : > { %v297_v48 = vld [vmem:[#allocation6 + $0x118] sm:$0xff]  ;;  %v7531_v51 = vpack.c.bf16 %v296_v46, %v293_v45  ;;  %v295_v53 = vld [vmem:[#allocation6 + $0x108] sm:$0xff]  ;;  %v302_v56 = vld [vmem:[#allocation6 + $0x140] sm:$0xff]  ;;  %6751 = vmatprep.mubr.f32.mxu1 %v246_v50 }
  0x7a   : > { %7522 = vmatpush1.bf16.msra.mxu0 %v7521_v31  ;;  %7554 = vmatpush3.bf16.msra.mxu1 %v7551_v26  ;;  %v7563_v54 = vpack.c.bf16 %v297_v48, %v294_v47  ;;  %v299_v55 = vld [vmem:[#allocation6 + $0x128] sm:$0xff]  ;;  %v300_v57 = vld [vmem:[#allocation6 + $0x130] sm:$0xff]  ;;  %v7533_v59 = vpack.c.bf16 %v295_v53, %v292_v52  ;;  %v298_v61 = vld [vmem:[#allocation6 + $0x120] sm:$0xff] }
  0x7b   : > { %7524 = vmatprep.subr.bf16.mxu0 %v7523_v32  ;;  %7556 = vmatprep.subr.bf16.mxu1 %v7555_v35  ;;  %v303_v58 = vld [vmem:[#allocation6 + $0x148] sm:$0xff]  ;;  %v7535_v60 = vpack.c.bf16 %v302_v56, %v299_v55  ;;  %v301_v62 = vld [vmem:[#allocation6 + $0x138] sm:$0xff]  ;;  %v308_v2 = vld [vmem:[#allocation6 + $0x170] sm:$0xff] }
  0x7c   : > { %v7567_v63 = vpack.c.bf16 %v303_v58, %v300_v57  ;;  %v305_v1 = vld [vmem:[#allocation6 + $0x158] sm:$0xff]  ;;  %v306_v3 = vld [vmem:[#allocation6 + $0x160] sm:$0xff]  ;;  %v7537_v5 = vpack.c.bf16 %v301_v62, %v298_v61  ;;  %v304_v7 = vld [vmem:[#allocation6 + $0x150] sm:$0xff] }
  0x7d   : > { %v309_v4 = vld [vmem:[#allocation6 + $0x178] sm:$0xff]  ;;  %v7539_v6 = vpack.c.bf16 %v308_v2, %v305_v1  ;;  %v307_v8 = vld [vmem:[#allocation6 + $0x168] sm:$0xff]  ;;  %v248_v12 = vld [vmem:[%s8777_s25 + $0x10] sm:$0xff] }
  0x7e   : > { %7526 = vmatpush1.bf16.msra.mxu0 %v7525_v40  ;;  %7558 = vmatpush3.bf16.msra.mxu1 %v7555_v35  ;;  %v7571_v9 = vpack.c.bf16 %v309_v4, %v306_v3  ;;  %v7541_v10 = vpack.c.bf16 %v307_v8, %v304_v7  ;;  %v247_v11 = vld [vmem:[%s8777_s25 + $0x8] sm:$0xff]  ;;  %v249_v13 = vld [vmem:[%s8777_s25 + $0x18] sm:$0xff]  ;;  %v250_v14 = vld [vmem:[%s8777_s25 + $0x20] sm:$0xff] }
  0x7f   : > { %7528 = vmatprep.subr.bf16.mxu0 %v7527_v41  ;;  %7560 = vmatprep.subr.bf16.mxu1 %v7559_v44  ;;  %v251_v15 = vld [vmem:[%s8777_s25 + $0x28] sm:$0xff]  ;;  %v252_v16 = vld [vmem:[%s8777_s25 + $0x30] sm:$0xff]  ;;  %v253_v17 = vld [vmem:[%s8777_s25 + $0x38] sm:$0xff] }
  0x80   : > { %v254_v18 = vld [vmem:[%s8777_s25 + $0x40] sm:$0xff]  ;;  %v255_v19 = vld [vmem:[%s8777_s25 + $0x48] sm:$0xff]  ;;  %v256_v20 = vld [vmem:[%s8777_s25 + $0x50] sm:$0xff] }
  0x81   : > { %v257_v21 = vld [vmem:[%s8777_s25 + $0x58] sm:$0xff]  ;;  %v258_v22 = vld [vmem:[%s8777_s25 + $0x60] sm:$0xff]  ;;  %v259_v23 = vld [vmem:[%s8777_s25 + $0x68] sm:$0xff] }
  0x82   : > { %7530 = vmatpush1.bf16.msra.mxu0 %v7529_v49  ;;  %7562 = vmatpush3.bf16.msra.mxu1 %v7559_v44  ;;  %v260_v24 = vld [vmem:[%s8777_s25 + $0x70] sm:$0xff]  ;;  %v261_v25 = vld [vmem:[%s8777_s25 + $0x78] sm:$0xff]  ;;  %s8478_s25 = scalar_lea.vmem %s10644_s5, 2048 }
  0x83   : > { %7532 = vmatprep.subr.bf16.mxu0 %v7531_v51  ;;  %7564 = vmatprep.subr.bf16.mxu1 %v7563_v54  ;;  %p8479_p11 = scmp.ne.s32.totalorder %s10644_s5, %s8478_s25 }
  0x85   : > { %p8480_p1 = pnand %p8479_p11, %p10841_p0 }
  0x86   : > { %7534 = vmatpush1.bf16.msra.mxu0 %v7533_v59  ;;  %7566 = vmatpush3.bf16.msra.mxu1 %v7563_v54 }
  0x87   : > { %7536 = vmatprep.subr.bf16.mxu0 %v7535_v60  ;;  %7568 = vmatprep.subr.bf16.mxu1 %v7567_v63  ;;  %p8481_p3 = pneg %p8480_p1 }
  0x8a   : > { %7538 = vmatpush1.bf16.msra.mxu0 %v7537_v5  ;;  %7570 = vmatpush3.bf16.msra.mxu1 %v7567_v63 }
  0x8b   : > { %7540 = vmatprep.subr.bf16.mxu0 %v7539_v6  ;;  %7572 = vmatprep.subr.bf16.mxu1 %v7571_v9 }
  0x8e   : > { %7542 = vmatpush1.bf16.msra.mxu0 %v7541_v10  ;;  %7574 = vmatpush3.bf16.msra.mxu1 %v7571_v9 }
  0x91   : > { %375 = vmatmul.mubr.f32.vlgmr.msra.gmra.mrb[0].mxu0 %v246_v50  ;;  %6752 = vmatmul.mubr.f32.vlgmr.msra.gmra.mrb[0].mxu1 %v247_v11 }
  0x92   : > { %380 = vmatprep.mubr.f32.mxu0 %v8557_v0  ;;  %6754 = vmatprep.mubr.f32.mxu1 %v248_v12 }
  0x95   : > { %381 = vmatmul.mubr.f32.gmra.mrb[2].mxu0 %v247_v11  ;;  %6755 = vmatmul.mubr.f32.gmra.mrb[2].mxu1 %v249_v13 }
  0x96   : > { %386 = vmatprep.mubr.f32.mxu0 %v8557_v0  ;;  %6757 = vmatprep.mubr.f32.mxu1 %v250_v14 }
  0x99   : > { %387 = vmatmul.mubr.f32.gmra.mrb[4].mxu0 %v248_v12  ;;  %6758 = vmatmul.mubr.f32.gmra.mrb[4].mxu1 %v251_v15 }
  0x9a   : > { %392 = vmatprep.mubr.f32.mxu0 %v8557_v0  ;;  %6760 = vmatprep.mubr.f32.mxu1 %v252_v16 }
  0x9d   : > { %393 = vmatmul.mubr.f32.gmra.mrb[6].mxu0 %v249_v13  ;;  %6761 = vmatmul.mubr.f32.gmra.mrb[6].mxu1 %v253_v17 }
  0x9e   : > { %398 = vmatprep.mubr.f32.mxu0 %v8557_v0  ;;  %6763 = vmatprep.mubr.f32.mxu1 %v254_v18 }
  0xa1   : > { %399 = vmatmul.mubr.f32.gmra.mrb[8].mxu0 %v250_v14  ;;  %6764 = vmatmul.mubr.f32.gmra.mrb[8].mxu1 %v255_v19 }
  0xa2   : > { %404 = vmatprep.mubr.f32.mxu0 %v8557_v0  ;;  %6766 = vmatprep.mubr.f32.mxu1 %v256_v20 }
  0xa5   : > { %405 = vmatmul.mubr.f32.gmra.mrb[10].mxu0 %v251_v15  ;;  %6767 = vmatmul.mubr.f32.gmra.mrb[10].mxu1 %v257_v21 }
  0xa6   : > { %410 = vmatprep.mubr.f32.mxu0 %v8557_v0  ;;  %6769 = vmatprep.mubr.f32.mxu1 %v258_v22 }
  0xa9   : > { %411 = vmatmul.mubr.f32.gmra.mrb[12].mxu0 %v252_v16  ;;  %6770 = vmatmul.mubr.f32.gmra.mrb[12].mxu1 %v259_v23 }
  0xaa   : > { %416 = vmatprep.mubr.f32.mxu0 %v8557_v0  ;;  %6772 = vmatprep.mubr.f32.mxu1 %v260_v24 }
  0xad   : > { %417 = vmatmul.mubr.f32.gmra.mrb[14].mxu0 %v253_v17  ;;  %6773 = vmatmul.mubr.f32.gmra.mrb[14].mxu1 %v261_v25 }
  0xae   : > { %422 = vmatprep.mubr.f32.mxu0 %v8557_v0 }
  0xb1   : > { %423 = vmatmul.mubr.f32.gmra.mrb[16].mxu0 %v254_v18 }
  0xb2   : > { %428 = vmatprep.mubr.f32.mxu0 %v8557_v0 }
  0xb5   : > { %429 = vmatmul.mubr.f32.gmra.mrb[18].mxu0 %v255_v19 }
  0xb6   : > { %434 = vmatprep.mubr.f32.mxu0 %v8557_v0 }
  0xb9   : > { %435 = vmatmul.mubr.f32.gmra.mrb[20].mxu0 %v256_v20 }
  0xba   : > { %440 = vmatprep.mubr.f32.mxu0 %v8557_v0 }
  0xbd   : > { %441 = vmatmul.mubr.f32.gmra.mrb[22].mxu0 %v257_v21 }
  0xbe   : > { %446 = vmatprep.mubr.f32.mxu0 %v8557_v0 }
  0xc1   : > { %447 = vmatmul.mubr.f32.gmra.mrb[24].mxu0 %v258_v22 }
  0xc2   : > { %452 = vmatprep.mubr.f32.mxu0 %v8557_v0 }
  0xc5   : > { %453 = vmatmul.mubr.f32.gmra.mrb[26].mxu0 %v259_v23 }
  0xc6   : > { %458 = vmatprep.mubr.f32.mxu0 %v8557_v0 }
  0xc9   : > { %459 = vmatmul.mubr.f32.gmra.mrb[28].mxu0 %v260_v24 }
  0xca   : > { %464 = vmatprep.mubr.f32.mxu0 %v8557_v0 }
  0xcd   : > { %465 = vmatmul.mubr.f32.gmra.mrb[30].mxu0 %v261_v25 }
 0x164   : > { %v376_v26 = vpop.f32.mrb[0].mxu0  ;;  %v6753_v27 = vpop.f32.mrb[0].mxu1 }
 0x165   : > { %v378_v28 = vpop.f32.mrb[1].mxu0  ;;  %v537_v29 = vpop.f32.mrb[1].mxu1 }
 0x166   : > { %v8819_v30 = vpack.c.bf16 %v6753_v27, %v537_v29 }
 0x168   : > { %10759 = vst [vmem:[#allocation13_spill] sm:$0xff] %v8819_v30  ;;  %v382_v31 = vpop.f32.mrb[2].mxu0  ;;  %1622 = vrot.lane.b32.xlu1 %v8819_v30, %s8558_s21  ;;  %v6756_v34 = vpop.f32.mrb[2].mxu1  ;;  %6807 = vmatprep.subr.bf16.mxu1 %v8819_v30 }
 0x169   : > { %v8823_v32 = vpack.c.bf16 %v382_v31, %v376_v26  ;;  %v384_v33 = vpop.f32.mrb[3].mxu0  ;;  %v547_v35 = vpop.f32.mrb[3].mxu1  ;;  %6808 = vmatpush3.bf16.msra.mxu1 %v8819_v30 }
 0x16a   : > { %v8826_v0 = vpack.c.bf16 %v384_v33, %v378_v28  ;;  %v8829_v36 = vpack.c.bf16 %v6756_v34, %v547_v35 }
 0x16b   : > { %10760 = vst [vmem:[#allocation14_spill] sm:$0xff] %v8823_v32  ;;  %1309 = vrot.lane.b32.xlu0 %v8823_v32, %s8558_s21  ;;  %6791 = vmatprep.mubr.msk.bf16.mxu0 %vm695_vm0, %v8823_v32 }
 0x16c   : > { %10761 = vst [vmem:[#allocation15_spill] sm:$0xff] %v8826_v0  ;;  %7735 = vmatprep.subr.msk.bf16.mxu0 %vm695_vm0, %v8826_v0  ;;  %v721_v37 = vsel %vm695_vm0, %v8826_v0, 0  ;;  %v388_v38 = vpop.f32.mrb[4].mxu0  ;;  %v6759_v39 = vpop.f32.mrb[4].mxu1  ;;  %2663 = vrot.lane.b32.xlu1 %v8826_v0, %s8559_s23 }
 0x16d   : > { %6776 = vmatpush3.bf16.xpose.msra.mxu0 %v721_v37  ;;  %v390_v40 = vpop.f32.mrb[5].mxu0  ;;  %v557_v41 = vpop.f32.mrb[5].mxu1  ;;  %6809 = vmatprep.subr.bf16.mxu1 %v8829_v36 }
 0x16e   : > { %v8842_v42 = vpack.c.bf16 %v6759_v39, %v557_v41  ;;  %6810 = vmatpush3.bf16.msra.mxu1 %v8829_v36 }
 0x16f   : > { %1986 = vrot.lane.b32.xlu0 %v8823_v32, %s8560_s7 }
 0x170   : > { %v394_v43 = vpop.f32.mrb[6].mxu0  ;;  %1626 = vrot.lane.b32.xlu1 %v8842_v42, %s8558_s21  ;;  %6811 = vmatprep.subr.bf16.mxu1 %v8842_v42  ;;  %v6762_v46 = vpop.f32.mrb[6].mxu1 }
 0x171   : > { %v8849_v44 = vpack.c.bf16 %v394_v43, %v388_v38  ;;  %v396_v45 = vpop.f32.mrb[7].mxu0  ;;  %v567_v48 = vpop.f32.mrb[7].mxu1 }
 0x172   : > { %v8852_v47 = vpack.c.bf16 %v396_v45, %v390_v40  ;;  %6812 = vmatpush3.bf16.msra.mxu1 %v8842_v42  ;;  %v8857_v49 = vpack.c.bf16 %v6762_v46, %v567_v48 }
 0x173   : > { %10762 = vst [vmem:[#allocation16_spill] sm:$0xff] %v8849_v44  ;;  %2647 = vrot.lane.b32.xlu0 %v8823_v32, %s8559_s23 }
 0x174   : > { %7736 = vmatprep.subr.msk.bf16.mxu0 %vm695_vm0, %v8852_v47  ;;  %v724_v50 = vsel %vm695_vm0, %v8852_v47, 0  ;;  %v400_v51 = vpop.f32.mrb[8].mxu0  ;;  %1311 = vrot.lane.b32.xlu1 %v8849_v44, %s8558_s21  ;;  %v6765_v53 = vpop.f32.mrb[8].mxu1 }
 0x175   : > { %6778 = vmatpush3.bf16.xpose.msra.mxu0 %v724_v50  ;;  %v402_v52 = vpop.f32.mrb[9].mxu0  ;;  %v577_v54 = vpop.f32.mrb[9].mxu1  ;;  %6813 = vmatprep.subr.bf16.mxu1 %v8857_v49 }
 0x176   : > { %v8868_v55 = vpack.c.bf16 %v6765_v53, %v577_v54  ;;  %6814 = vmatpush3.bf16.msra.mxu1 %v8857_v49 }
 0x177   : > { %1333 = vrot.lane.b32.xlu0 %v8826_v0, %s8558_s21 }
 0x178   : > { %v406_v56 = vpop.f32.mrb[10].mxu0  ;;  %1988 = vrot.lane.b32.xlu1 %v8849_v44, %s8560_s7  ;;  %v6768_v59 = vpop.f32.mrb[10].mxu1  ;;  %6815 = vmatprep.subr.bf16.mxu1 %v8868_v55 }
 0x179   : > { %v8873_v57 = vpack.c.bf16 %v406_v56, %v400_v51  ;;  %v408_v58 = vpop.f32.mrb[11].mxu0  ;;  %v587_v61 = vpop.f32.mrb[11].mxu1 }
 0x17a   : > { %v8876_v60 = vpack.c.bf16 %v408_v58, %v402_v52  ;;  %v8880_v62 = vpack.c.bf16 %v6768_v59, %v587_v61  ;;  %6816 = vmatpush3.bf16.msra.mxu1 %v8868_v55 }
 0x17b   : > { %10763 = vst [vmem:[#allocation17_spill] sm:$0xff] %v8873_v57  ;;  %2002 = vrot.lane.b32.xlu0 %v8826_v0, %s8560_s7 }
 0x17c   : > { %10764 = vst [vmem:[#allocation18_spill] sm:$0xff] %v8876_v60  ;;  %7737 = vmatprep.subr.msk.bf16.mxu0 %vm695_vm0, %v8876_v60  ;;  %v727_v63 = vsel %vm695_vm0, %v8876_v60, 0  ;;  %v412_v1 = vpop.f32.mrb[12].mxu0  ;;  %2649 = vrot.lane.b32.xlu1 %v8849_v44, %s8559_s23  ;;  %v6771_v3 = vpop.f32.mrb[12].mxu1 }
 0x17d   : > { %6780 = vmatpush3.bf16.xpose.msra.mxu0 %v727_v63  ;;  %v414_v2 = vpop.f32.mrb[13].mxu0  ;;  %v597_v4 = vpop.f32.mrb[13].mxu1  ;;  %6817 = vmatprep.subr.bf16.mxu1 %v8880_v62 }
 0x17e   : > { %v8892_v5 = vpack.c.bf16 %v6771_v3, %v597_v4  ;;  %6818 = vmatpush3.bf16.msra.mxu1 %v8880_v62 }
 0x17f   : > { %1624 = vrot.lane.b32.xlu0 %v8829_v36, %s8558_s21 }
 0x180   : > { %v418_v6 = vpop.f32.mrb[14].mxu0  ;;  %2004 = vrot.lane.b32.xlu1 %v8852_v47, %s8560_s7  ;;  %v6774_v9 = vpop.f32.mrb[14].mxu1  ;;  %6819 = vmatprep.subr.bf16.mxu1 %v8892_v5 }
 0x181   : > { %v8897_v7 = vpack.c.bf16 %v418_v6, %v412_v1  ;;  %v420_v8 = vpop.f32.mrb[15].mxu0  ;;  %v607_v11 = vpop.f32.mrb[15].mxu1 }
 0x182   : > { %v8900_v10 = vpack.c.bf16 %v420_v8, %v414_v2  ;;  %v8904_v12 = vpack.c.bf16 %v6774_v9, %v607_v11  ;;  %6820 = vmatpush3.bf16.msra.mxu1 %v8892_v5 }
 0x183   : > { %10765 = vst [vmem:[#allocation19_spill] sm:$0xff] %v8897_v7  ;;  %1335 = vrot.lane.b32.xlu0 %v8852_v47, %s8558_s21 }
 0x184   : > { %10766 = vst [vmem:[#allocation20_spill] sm:$0xff] %v8900_v10  ;;  %7738 = vmatprep.subr.msk.bf16.mxu0 %vm695_vm0, %v8900_v10  ;;  %v730_v13 = vsel %vm695_vm0, %v8900_v10, 0  ;;  %v424_v14 = vpop.f32.mrb[16].mxu0  ;;  %1630 = vrot.lane.b32.xlu1 %v8868_v55, %s8558_s21 }
 0x185   : > { %6782 = vmatpush3.bf16.xpose.msra.mxu0 %v730_v13  ;;  %v426_v15 = vpop.f32.mrb[17].mxu0  ;;  %6821 = vmatprep.subr.bf16.mxu1 %v8904_v12 }
 0x186   : > { %6822 = vmatpush3.bf16.msra.mxu1 %v8904_v12 }
 0x187   : > { %1628 = vrot.lane.b32.xlu0 %v8857_v49, %s8558_s21 }
 0x188   : > { %v430_v16 = vpop.f32.mrb[18].mxu0  ;;  %1337 = vrot.lane.b32.xlu1 %v8876_v60, %s8558_s21 }
 0x189   : > { %v8919_v17 = vpack.c.bf16 %v430_v16, %v424_v14  ;;  %v432_v18 = vpop.f32.mrb[19].mxu0 }
 0x18a   : > { %v8921_v19 = vpack.c.bf16 %v432_v18, %v426_v15 }
 0x18b   : > { %10767 = vst [vmem:[#allocation21_spill] sm:$0xff] %v8919_v17  ;;  %2665 = vrot.lane.b32.xlu0 %v8852_v47, %s8559_s23 }
 0x18c   : > { %10768 = vst [vmem:[#allocation22_spill] sm:$0xff] %v8921_v19  ;;  %7739 = vmatprep.subr.msk.bf16.mxu0 %vm695_vm0, %v8921_v19  ;;  %v733_v20 = vsel %vm695_vm0, %v8921_v19, 0  ;;  %v436_v21 = vpop.f32.mrb[20].mxu0  ;;  %2006 = vrot.lane.b32.xlu1 %v8876_v60, %s8560_s7 }
 0x18d   : > { %6784 = vmatpush3.bf16.xpose.msra.mxu0 %v733_v20  ;;  %v438_v22 = vpop.f32.mrb[21].mxu0 }
 0x18f   : > { %1313 = vrot.lane.b32.xlu0 %v8873_v57, %s8558_s21 }
 0x190   : > { %v442_v23 = vpop.f32.mrb[22].mxu0  ;;  %1634 = vrot.lane.b32.xlu1 %v8892_v5, %s8558_s21 }
 0x191   : > { %v8935_v24 = vpack.c.bf16 %v442_v23, %v436_v21  ;;  %v444_v25 = vpop.f32.mrb[23].mxu0 }
 0x192   : > { %v8937_v26 = vpack.c.bf16 %v444_v25, %v438_v22 }
 0x193   : > { %10769 = vst [vmem:[#allocation23_spill] sm:$0xff] %v8935_v24  ;;  %1990 = vrot.lane.b32.xlu0 %v8873_v57, %s8560_s7 }
 0x194   : > { %10770 = vst [vmem:[#allocation24_spill] sm:$0xff] %v8937_v26  ;;  %7740 = vmatprep.subr.msk.bf16.mxu0 %vm695_vm0, %v8937_v26  ;;  %v736_v27 = vsel %vm695_vm0, %v8937_v26, 0  ;;  %v448_v28 = vpop.f32.mrb[24].mxu0  ;;  %1315 = vrot.lane.b32.xlu1 %v8897_v7, %s8558_s21 }
 0x195   : > { %6786 = vmatpush3.bf16.xpose.msra.mxu0 %v736_v27  ;;  %v450_v29 = vpop.f32.mrb[25].mxu0 }
 0x197   : > { %1632 = vrot.lane.b32.xlu0 %v8880_v62, %s8558_s21 }
 0x198   : > { %v454_v31 = vpop.f32.mrb[26].mxu0  ;;  %1992 = vrot.lane.b32.xlu1 %v8897_v7, %s8560_s7 }
 0x199   : > { %v8951_v33 = vpack.c.bf16 %v454_v31, %v448_v28  ;;  %v456_v34 = vpop.f32.mrb[27].mxu0 }
 0x19a   : > { %v8953_v35 = vpack.c.bf16 %v456_v34, %v450_v29 }
 0x19b   : > { %10771 = vst [vmem:[#allocation25_spill] sm:$0xff] %v8951_v33  ;;  %2667 = vrot.lane.b32.xlu0 %v8876_v60, %s8559_s23 }
 0x19c   : > { %10772 = vst [vmem:[#allocation26_spill] sm:$0xff] %v8953_v35  ;;  %7741 = vmatprep.subr.msk.bf16.mxu0 %vm695_vm0, %v8953_v35  ;;  %v739_v37 = vsel %vm695_vm0, %v8953_v35, 0  ;;  %v460_v38 = vpop.f32.mrb[28].mxu0  ;;  %1339 = vrot.lane.b32.xlu1 %v8900_v10, %s8558_s21 }
 0x19d   : > { %6788 = vmatpush3.bf16.xpose.msra.mxu0 %v739_v37  ;;  %v462_v39 = vpop.f32.mrb[29].mxu0 }
 0x19f   : > { %1636 = vrot.lane.b32.xlu0 %v8904_v12, %s8558_s21 }
 0x1a0   : > { %v466_v40 = vpop.f32.mrb[30].mxu0  ;;  %2008 = vrot.lane.b32.xlu1 %v8900_v10, %s8560_s7 }
 0x1a1   : > { %v8967_v41 = vpack.c.bf16 %v466_v40, %v460_v38  ;;  %v468_v43 = vpop.f32.mrb[31].mxu0 }
 0x1a2   : > { %v8969_v45 = vpack.c.bf16 %v468_v43, %v462_v39 }
 0x1a3   : > { %10773 = vst [vmem:[#allocation27_spill] sm:$0xff] %v8967_v41  ;;  %2669 = vrot.lane.b32.xlu0 %v8900_v10, %s8559_s23 }
 0x1a4   : > { %10774 = vst [vmem:[#allocation28_spill] sm:$0xff] %v8969_v45  ;;  %7742 = vmatprep.subr.msk.bf16.mxu0 %vm695_vm0, %v8969_v45  ;;  %v742_v46 = vsel %vm695_vm0, %v8969_v45, 0  ;;  %1319 = vrot.lane.b32.xlu1 %v8935_v24, %s8558_s21 }
 0x1a5   : > { %6790 = vmatpush3.bf16.xpose.msra.mxu0 %v742_v46 }
 0x1a7   : > { %1317 = vrot.lane.b32.xlu0 %v8919_v17, %s8558_s21 }
 0x1a8   : > { %1996 = vrot.lane.b32.xlu1 %v8935_v24, %s8560_s7 }
 0x1ab   : > { %1994 = vrot.lane.b32.xlu0 %v8919_v17, %s8560_s7 }
 0x1ac   : > { %6792 = vmatmul.mubr.msk.bf16.vlgmr.msra.gmra.mrb[32].mxu0 %vm695_vm0, %v8849_v44  ;;  %1343 = vrot.lane.b32.xlu1 %v8937_v26, %s8558_s21 }
 0x1ad   : > { %6795 = vmatprep.mubr.msk.bf16.mxu0 %vm695_vm0, %v8873_v57 }
 0x1af   : > { %1341 = vrot.lane.b32.xlu0 %v8921_v19, %s8558_s21 }
 0x1b0   : > { %2012 = vrot.lane.b32.xlu1 %v8937_v26, %s8560_s7 }
 0x1b3   : > { %2010 = vrot.lane.b32.xlu0 %v8921_v19, %s8560_s7 }
 0x1b4   : > { %6796 = vmatmul.mubr.msk.bf16.gmra.mrb[36].mxu0 %vm695_vm0, %v8897_v7  ;;  %2673 = vrot.lane.b32.xlu1 %v8937_v26, %s8559_s23 }
 0x1b5   : > { %6799 = vmatprep.mubr.msk.bf16.mxu0 %vm695_vm0, %v8919_v17 }
 0x1b7   : > { %2671 = vrot.lane.b32.xlu0 %v8921_v19, %s8559_s23 }
 0x1b8   : > { %2653 = vrot.lane.b32.xlu1 %v8897_v7, %s8559_s23 }
 0x1bb   : > { %1321 = vrot.lane.b32.xlu0 %v8951_v33, %s8558_s21 }
 0x1bc   : > { %6800 = vmatmul.mubr.msk.bf16.gmra.mrb[40].mxu0 %vm695_vm0, %v8935_v24  ;;  %2657 = vrot.lane.b32.xlu1 %v8935_v24, %s8559_s23 }
 0x1bd   : > { %6803 = vmatprep.mubr.msk.bf16.mxu0 %vm695_vm0, %v8951_v33 }
 0x1bf   : > { %1998 = vrot.lane.b32.xlu0 %v8951_v33, %s8560_s7 }
 0x1c0   : > { %1347 = vrot.lane.b32.xlu1 %v8969_v45, %s8558_s21 }
 0x1c3   : > { %1345 = vrot.lane.b32.xlu0 %v8953_v35, %s8558_s21 }
 0x1c4   : > { %6804 = vmatmul.mubr.msk.bf16.gmra.mrb[44].mxu0 %vm695_vm0, %v8967_v41  ;;  %2016 = vrot.lane.b32.xlu1 %v8969_v45, %s8560_s7 }
 0x1c7   : > { %2014 = vrot.lane.b32.xlu0 %v8953_v35, %s8560_s7 }
 0x1c8   : > { %2677 = vrot.lane.b32.xlu1 %v8969_v45, %s8559_s23 }
 0x1cb   : > { %2675 = vrot.lane.b32.xlu0 %v8953_v35, %s8559_s23 }
 0x1cf   : > { %1323 = vrot.lane.b32.xlu0 %v8967_v41, %s8558_s21  ;;  %s8565_s21 = smov [#allocation9]  }
 0x1d3   : > { %2000 = vrot.lane.b32.xlu0 %v8967_v41, %s8560_s7 }
 0x1d7   : > { %2651 = vrot.lane.b32.xlu0 %v8873_v57, %s8559_s23 }
 0x1da   : > { %v9037_v48 = vpop.permute.xlu1 %1622 }
 0x1db   : > { %2655 = vrot.lane.b32.xlu0 %v8919_v17, %s8559_s23 }
 0x1dd   : > { %v1310_v50 = vpop.permute.xlu0 %1309 }
 0x1de   : > { %6883 = vmatprep.mubr.msk.bf16.mxu0 %vm695_vm0, %v1310_v50  ;;  %v9042_v51 = vpop.permute.xlu1 %2663 }
 0x1e1   : > { %v9044_v52 = vpop.permute.xlu0 %1986 }
 0x1e2   : > { %v9046_v53 = vpop.permute.xlu1 %1626 }
 0x1e5   : > { %v9048_v54 = vpop.permute.xlu0 %2647 }
 0x1e6   : > { %v9050_v56 = vpop.permute.xlu1 %1311 }
 0x1e9   : > { %v1334_v58 = vpop.permute.xlu0 %1333 }
 0x1ea   : > { %7743 = vmatprep.subr.msk.bf16.mxu0 %vm695_vm0, %v1334_v58  ;;  %v1374_v59 = vsel %vm695_vm0, %v1334_v58, 0  ;;  %v9054_v61 = vpop.permute.xlu1 %1988 }
 0x1eb   : > { %6868 = vmatpush3.bf16.xpose.msra.mxu0 %v1374_v59 }
 0x1ed   : > { %v2003_v63 = vpop.permute.xlu0 %2002 }
 0x1ee   : > { %v9056_v1 = vpop.permute.xlu1 %2649 }
 0x1f1   : > { %v9058_v2 = vpop.permute.xlu0 %1624 }
 0x1f2   : > { %v2005_v3 = vpop.permute.xlu1 %2004 }
 0x1f5   : > { %v1336_v4 = vpop.permute.xlu0 %1335 }
 0x1f6   : > { %7744 = vmatprep.subr.msk.bf16.mxu0 %vm695_vm0, %v1336_v4  ;;  %v1377_v6 = vsel %vm695_vm0, %v1336_v4, 0  ;;  %v9062_v8 = vpop.permute.xlu1 %1630 }
 0x1f7   : > { %6870 = vmatpush3.bf16.xpose.msra.mxu0 %v1377_v6 }
 0x1f9   : > { %v9064_v9 = vpop.permute.xlu0 %1628 }
 0x1fa   : > { %v1338_v11 = vpop.permute.xlu1 %1337 }
 0x1fb   : > { %7745 = vmatprep.subr.msk.bf16.mxu0 %vm695_vm0, %v1338_v11  ;;  %v1380_v13 = vsel %vm695_vm0, %v1338_v11, 0 }
 0x1fd   : > { %v9068_v14 = vpop.permute.xlu0 %2665 }
 0x1fe   : > { %v2007_v15 = vpop.permute.xlu1 %2006 }
 0x1ff   : > { %6872 = vmatpush3.bf16.xpose.msra.mxu0 %v1380_v13 }
 0x201   : > { %v1314_v16 = vpop.permute.xlu0 %1313 }
 0x202   : > { %v9070_v18 = vpop.permute.xlu1 %1634 }
 0x205   : > { %v9072_v20 = vpop.permute.xlu0 %1990 }
 0x206   : > { %v1316_v21 = vpop.permute.xlu1 %1315 }
 0x209   : > { %v9074_v22 = vpop.permute.xlu0 %1632 }
 0x20a   : > { %v9076_v23 = vpop.permute.xlu1 %1992 }
 0x20d   : > { %v9078_v25 = vpop.permute.xlu0 %2667 }
 0x20e   : > { %v1340_v27 = vpop.permute.xlu1 %1339 }
 0x20f   : > { %7746 = vmatprep.subr.msk.bf16.mxu0 %vm695_vm0, %v1340_v27  ;;  %v1383_v28 = vsel %vm695_vm0, %v1340_v27, 0 }
 0x210   : > { %6874 = vmatpush3.bf16.xpose.msra.mxu0 %v1383_v28 }
 0x211   : > { %v9082_v29 = vpop.permute.xlu0 %1636 }
 0x212   : > { %v2009_v31 = vpop.permute.xlu1 %2008 }
 0x215   : > { %v9084_v34 = vpop.permute.xlu0 %2669 }
 0x216   : > { %v1320_v37 = vpop.permute.xlu1 %1319 }
 0x219   : > { %v1318_v38 = vpop.permute.xlu0 %1317 }
 0x21a   : > { %v9086_v39 = vpop.permute.xlu1 %1996 }
 0x21d   : > { %v9088_v40 = vpop.permute.xlu0 %1994 }
 0x21e   : > { %v1344_v43 = vpop.permute.xlu1 %1343 }
 0x21f   : > { %v1389_v11 = vsel %vm695_vm0, %v1344_v43, 0 }
 0x221   : > { %v1342_v46 = vpop.permute.xlu0 %1341 }
 0x222   : > { %7747 = vmatprep.subr.msk.bf16.mxu0 %vm695_vm0, %v1342_v46  ;;  %v1386_v50 = vsel %vm695_vm0, %v1342_v46, 0  ;;  %v2013_v58 = vpop.permute.xlu1 %2012 }
 0x223   : > { %6876 = vmatpush3.bf16.xpose.msra.mxu0 %v1386_v50 }
 0x224   : > { %7748 = vmatprep.subr.msk.bf16.mxu0 %vm695_vm0, %v1344_v43  ;;  %v2043_v43 = vsel %vm695_vm0, %v2003_v63, 0 }
 0x225   : > { %v2011_v59 = vpop.permute.xlu0 %2010 }
 0x226   : > { %v9093_v4 = vpop.permute.xlu1 %2673 }
 0x229   : > { %v9095_v6 = vpop.permute.xlu0 %2671 }
 0x22a   : > { %v9098_v13 = vpop.permute.xlu1 %2653 }
 0x22b   : > { %6878 = vmatpush3.bf16.xpose.msra.mxu0 %v1389_v11  ;;  %v2046_v11 = vsel %vm695_vm0, %v2005_v3, 0 }
 0x22d   : > { %v1322_v27 = vpop.permute.xlu0 %1321 }
 0x22e   : > { %v9100_v28 = vpop.permute.xlu1 %2657 }
 0x231   : > { %v9102_v24 = vpop.permute.xlu0 %1998 }
 0x232   : > { %v1348_v17 = vpop.permute.xlu1 %1347 }
 0x233   : > { %v1395_v7 = vsel %vm695_vm0, %v1348_v17, 0 }
 0x235   : > { %v1346_v46 = vpop.permute.xlu0 %1345 }
 0x236   : > { %7749 = vmatprep.subr.msk.bf16.mxu0 %vm695_vm0, %v1346_v46  ;;  %v1392_v50 = vsel %vm695_vm0, %v1346_v46, 0 }
 0x237   : > { %6880 = vmatpush3.bf16.xpose.msra.mxu0 %v1392_v50 }
 0x238   : > { %7750 = vmatprep.subr.msk.bf16.mxu0 %vm695_vm0, %v1348_v17  ;;  %v2049_v17 = vsel %vm695_vm0, %v2007_v15, 0 }
 0x23f   : > { %6882 = vmatpush3.bf16.xpose.msra.mxu0 %v1395_v7  ;;  %v2015_v7 = vpop.permute.xlu0 %2014 }
 0x240   : > { %7751 = vmatprep.subr.msk.bf16.mxu0 %vm695_vm0, %v2003_v63 }
 0x246   : > { %6884 = vmatmul.mubr.msk.bf16.vlgmr.msra.gmra.mrb[48].mxu0 %vm695_vm0, %v9050_v56  ;;  %v9120_v56 = vpop.permute.xlu0 %2675 }
 0x247   : > { %6887 = vmatprep.mubr.msk.bf16.mxu0 %vm695_vm0, %v1314_v16  ;;  %6960 = vmatpush3.bf16.xpose.msra.mxu0 %v2043_v43  ;;  %v2058_v16 = vsel %vm695_vm0, %v2013_v58, 0 }
 0x248   : > { %7752 = vmatprep.subr.msk.bf16.mxu0 %vm695_vm0, %v2005_v3  ;;  %v2052_v3 = vsel %vm695_vm0, %v2009_v31, 0 }
 0x24a   : > { %v1324_v63 = vpop.permute.xlu0 %1323 }
 0x24e   : > { %6888 = vmatmul.mubr.msk.bf16.gmra.mrb[52].mxu0 %vm695_vm0, %v1316_v21  ;;  %v2061_v21 = vsel %vm695_vm0, %v2015_v7, 0 }
 0x24f   : > { %6891 = vmatprep.mubr.msk.bf16.mxu0 %vm695_vm0, %v1318_v38  ;;  %6962 = vmatpush3.bf16.xpose.msra.mxu0 %v2046_v11 }
 0x250   : > { %7753 = vmatprep.subr.msk.bf16.mxu0 %vm695_vm0, %v2007_v15  ;;  %v2055_v15 = vsel %vm695_vm0, %v2011_v59, 0 }
 0x256   : > { %6892 = vmatmul.mubr.msk.bf16.gmra.mrb[56].mxu0 %vm695_vm0, %v1320_v37  ;;  %v2017_v37 = vpop.permute.xlu1 %2016 }
 0x257   : > { %6895 = vmatprep.mubr.msk.bf16.mxu0 %vm695_vm0, %v1322_v27  ;;  %6964 = vmatpush3.bf16.xpose.msra.mxu0 %v2049_v17  ;;  %v2704_v27 = vsel %vm695_vm0, %v9042_v51, 0 }
 0x258   : > { %7754 = vmatprep.subr.msk.bf16.mxu0 %vm695_vm0, %v2009_v31 }
 0x25e   : > { %6896 = vmatmul.mubr.msk.bf16.gmra.mrb[60].mxu0 %vm695_vm0, %v1324_v63 }
 0x25f   : > { %6966 = vmatpush3.bf16.xpose.msra.mxu0 %v2052_v3  ;;  %6975 = vmatprep.mubr.msk.bf16.mxu0 %vm695_vm0, %v9044_v52  ;;  %v2064_v52 = vsel %vm695_vm0, %v2017_v37, 0 }
 0x260   : > { %7755 = vmatprep.subr.msk.bf16.mxu0 %vm695_vm0, %v2011_v59 }
 0x267   : > { %6968 = vmatpush3.bf16.xpose.msra.mxu0 %v2055_v15  ;;  %v1091_v15 = vld [vmem:[#allocation8 + $0x8] sm:$0xff] }
 0x268   : > { %7756 = vmatprep.subr.msk.bf16.mxu0 %vm695_vm0, %v2013_v58 }
 0x26f   : > { %6970 = vmatpush3.bf16.xpose.msra.mxu0 %v2058_v16 }
 0x270   : > { %7757 = vmatprep.subr.msk.bf16.mxu0 %vm695_vm0, %v2015_v7 }
 0x277   : > { %6972 = vmatpush3.bf16.xpose.msra.mxu0 %v2061_v21  ;;  %v2716_v21 = vsel %vm695_vm0, %v9095_v6, 0 }
 0x278   : > { %7758 = vmatprep.subr.msk.bf16.mxu0 %vm695_vm0, %v2017_v37 }
 0x27f   : > { %v9136_v31 = vpop.f32.mrb[32].mxu0  ;;  %6974 = vmatpush3.bf16.xpose.msra.mxu0 %v2064_v52 }
 0x280   : > { %7759 = vmatprep.subr.msk.bf16.mxu0 %vm695_vm0, %v9042_v51  ;;  %845 = vmax.xlane.f32.xlu1 %v9136_v31  ;;  %v9141_v38 = vpop.f32.mrb[33].mxu0  ;;  %v2707_v51 = vsel %vm695_vm0, %v9068_v14, 0 }
 0x281   : > { %v9143_v58 = vpop.f32.mrb[34].mxu0 }
 0x282   : > { %v9145_v59 = vpop.f32.mrb[35].mxu0 }
 0x283   : > { %843 = vmax.xlane.f32.xlu0 %v9145_v59 }
 0x284   : > { %841 = vmax.xlane.f32.xlu1 %v9141_v38 }
 0x286   : > { %6976 = vmatmul.mubr.msk.bf16.vlgmr.msra.gmra.mrb[64].mxu0 %vm695_vm0, %v9054_v61 }
 0x287   : > { %v9153_v46 = vpop.f32.mrb[36].mxu0  ;;  %6979 = vmatprep.mubr.msk.bf16.mxu0 %vm695_vm0, %v9072_v20  ;;  %7052 = vmatpush3.bf16.xpose.msra.mxu0 %v2704_v27 }
 0x288   : > { %7760 = vmatprep.subr.msk.bf16.mxu0 %vm695_vm0, %v9068_v14  ;;  %847 = vmax.xlane.f32.xlu1 %v9143_v58  ;;  %v9160_v50 = vpop.f32.mrb[37].mxu0  ;;  %v2710_v14 = vsel %vm695_vm0, %v9078_v25, 0 }
 0x289   : > { %v9162_v43 = vpop.f32.mrb[38].mxu0 }
 0x28a   : > { %v9164_v11 = vpop.f32.mrb[39].mxu0 }
 0x28c   : > { %853 = vmax.xlane.f32.xlu1 %v9153_v46 }
 0x28e   : > { %6980 = vmatmul.mubr.msk.bf16.gmra.mrb[68].mxu0 %vm695_vm0, %v9076_v23 }
 0x28f   : > { %v9171_v61 = vpop.f32.mrb[40].mxu0  ;;  %6983 = vmatprep.mubr.msk.bf16.mxu0 %vm695_vm0, %v9088_v40  ;;  %7054 = vmatpush3.bf16.xpose.msra.mxu0 %v2707_v51 }
 0x290   : > { %7761 = vmatprep.subr.msk.bf16.mxu0 %vm695_vm0, %v9078_v25  ;;  %849 = vmax.xlane.f32.xlu1 %v9160_v50  ;;  %v9178_v20 = vpop.f32.mrb[41].mxu0  ;;  %v2001_v25 = vpop.permute.xlu0 %2000 }
 0x291   : > { %857 = vmax.xlane.f32.xlu0 %v9178_v20  ;;  %v9181_v7 = vpop.f32.mrb[42].mxu0 }
 0x292   : > { %v9183_v23 = vpop.f32.mrb[43].mxu0 }
 0x294   : > { %855 = vmax.xlane.f32.xlu1 %v9162_v43  ;;  %v2652_v52 = vpop.permute.xlu0 %2651 }
 0x296   : > { %6984 = vmatmul.mubr.msk.bf16.gmra.mrb[72].mxu0 %vm695_vm0, %v9086_v39  ;;  %v1090_v39 = vld [vmem:[#allocation8] sm:$0xff] }
 0x297   : > { %v9190_v40 = vpop.f32.mrb[44].mxu0  ;;  %6987 = vmatprep.mubr.msk.bf16.mxu0 %vm695_vm0, %v9102_v24  ;;  %7056 = vmatpush3.bf16.xpose.msra.mxu0 %v2710_v14  ;;  %v2713_v24 = vsel %vm695_vm0, %v9084_v34, 0  ;;  %v9213_v16 = vpack.c.bf16 %v1091_v15, %v1090_v39 }
 0x298   : > { %7762 = vmatprep.subr.msk.bf16.mxu0 %vm695_vm0, %v9084_v34  ;;  %851 = vmax.xlane.f32.xlu1 %v9164_v11  ;;  %v9197_v17 = vpop.f32.mrb[45].mxu0  ;;  %v2722_v34 = vsel %vm695_vm0, %v9120_v56, 0 }
 0x299   : > { %v9199_v63 = vpop.f32.mrb[46].mxu0  ;;  %7576 = vmatprep.subr.bf16.mxu1 %v9213_v16 }
 0x29a   : > { %v9201_v3 = vpop.f32.mrb[47].mxu0 }
 0x29c   : > { %861 = vmax.xlane.f32.xlu1 %v9171_v61 }
 0x29e   : > { %6988 = vmatmul.mubr.msk.bf16.gmra.mrb[76].mxu0 %vm695_vm0, %v2001_v25 }
 0x29f   : > { %7058 = vmatpush3.bf16.xpose.msra.mxu0 %v2713_v24  ;;  %7067 = vmatprep.mubr.msk.bf16.mxu0 %vm695_vm0, %v9048_v54  ;;  %v2719_v54 = vsel %vm695_vm0, %v9093_v4, 0 }
 0x2a0   : > { %7763 = vmatprep.subr.msk.bf16.mxu0 %vm695_vm0, %v9095_v6  ;;  %863 = vmax.xlane.f32.xlu1 %v9181_v7  ;;  %v2678_v6 = vpop.permute.xlu1 %2677 }
 0x2a1   : > { %v2725_v37 = vsel %vm695_vm0, %v2678_v6, 0 }
 0x2a4   : > { %859 = vmax.xlane.f32.xlu1 %v9183_v23 }
 0x2a7   : > { %7060 = vmatpush3.bf16.xpose.msra.mxu0 %v2716_v21 }
 0x2a8   : > { %7764 = vmatprep.subr.msk.bf16.mxu0 %vm695_vm0, %v9093_v4  ;;  %869 = vmax.xlane.f32.xlu1 %v9190_v40  ;;  %v2656_v4 = vpop.permute.xlu0 %2655 }
 0x2ac   : > { %865 = vmax.xlane.f32.xlu1 %v9197_v17 }
 0x2af   : > { %7062 = vmatpush3.bf16.xpose.msra.mxu0 %v2719_v54 }
 0x2b0   : > { %7765 = vmatprep.subr.msk.bf16.mxu0 %vm695_vm0, %v9120_v56  ;;  %871 = vmax.xlane.f32.xlu1 %v9199_v63 }
 0x2b4   : > { %867 = vmax.xlane.f32.xlu1 %v9201_v3 }
 0x2b7   : > { %7064 = vmatpush3.bf16.xpose.msra.mxu0 %v2722_v34 }
 0x2b8   : > { %7766 = vmatprep.subr.msk.bf16.mxu0 %vm695_vm0, %v2678_v6 }
 0x2bf   : > { %7066 = vmatpush3.bf16.xpose.msra.mxu0 %v2725_v37 }
 0x2c6   : > { %7068 = vmatmul.mubr.msk.bf16.vlgmr.msra.gmra.mrb[80].mxu0 %vm695_vm0, %v9056_v1 }
 0x2c7   : > { %7071 = vmatprep.mubr.msk.bf16.mxu0 %vm695_vm0, %v2652_v52 }
 0x2ce   : > { %7072 = vmatmul.mubr.msk.bf16.gmra.mrb[84].mxu0 %vm695_vm0, %v9098_v13 }
 0x2cf   : > { %7075 = vmatprep.mubr.msk.bf16.mxu0 %vm695_vm0, %v2656_v4 }
 0x2d6   : > { %7076 = vmatmul.mubr.msk.bf16.gmra.mrb[88].mxu0 %vm695_vm0, %v9100_v28 }
 0x30d   : > { %v846_v56 = vpop.xlane.xlu1 %845 }
 0x30e   : > { %v875_v51 = vsub.f32 %v9136_v31, %v846_v56 }
 0x310   : > { %v844_v27 = vpop.xlane.xlu0 %843  ;;  %v893_v15 = vmul.f32 1.442695, %v875_v51 }
 0x311   : > { %v874_v14 = vsub.f32 %v9145_v59, %v844_v27  ;;  %v842_v25 = vpop.xlane.xlu1 %841 }
 0x312   : > { %v873_v1 = vsub.f32 %v9141_v38, %v842_v25 }
 0x313   : > { %v891_v24 = vmul.f32 1.442695, %v874_v14 }
 0x314   : > { %v889_v39 = vmul.f32 1.442695, %v873_v1 }
 0x315   : > { %7880 = vpow2.f32 %v891_v24  ;;  %v848_v21 = vpop.xlane.xlu1 %847 }
 0x316   : > { %7882 = vpow2.f32 %v889_v39  ;;  %v876_v13 = vsub.f32 %v9143_v58, %v848_v21 }
 0x317   : > { %7884 = vpow2.f32 %v893_v15 }
 0x318   : > { %v895_v54 = vmul.f32 1.442695, %v876_v13 }
 0x319   : > { %v854_v28 = vpop.xlane.xlu1 %853  ;;  %v9244_v34 = vpop.f32.mrb[48].mxu0 }
 0x31a   : > { %7886 = vpow2.f32 %v895_v54  ;;  %1498 = vmax.xlane.f32.xlu1 %v9244_v34  ;;  %v9247_v31 = vpop.f32.mrb[49].mxu0  ;;  %v879_v6 = vsub.f32 %v9153_v46, %v854_v28 }
 0x31b   : > { %v9249_v59 = vpop.f32.mrb[50].mxu0 }
 0x31c   : > { %1500 = vmax.xlane.f32.xlu0 %v9249_v59  ;;  %v9252_v38 = vpop.f32.mrb[51].mxu0  ;;  %v901_v4 = vmul.f32 1.442695, %v879_v6 }
 0x31d   : > { %v850_v37 = vpop.xlane.xlu1 %849 }
 0x31e   : > { %1494 = vmax.xlane.f32.xlu1 %v9247_v31  ;;  %v877_v56 = vsub.f32 %v9160_v50, %v850_v37  ;;  %7888 = vpow2.f32 %v901_v4  ;;  %v858_v4 = vpop.xlane.xlu0 %857 }
 0x31f   : > { %v9256_v58 = vpop.eup %7880 }
 0x320   : > { %v9258_v52 = vpop.eup %7882  ;;  %v897_v21 = vmul.f32 1.442695, %v877_v56 }
 0x321   : > { %v856_v27 = vpop.xlane.xlu1 %855  ;;  %v9261_v51 = vpop.f32.mrb[52].mxu0  ;;  %v953_v14 = vpack.c.bf16 %v9256_v58, %v9258_v52 }
 0x322   : > { %v880_v25 = vsub.f32 %v9162_v43, %v856_v27  ;;  %1496 = vmax.xlane.f32.xlu1 %v9252_v38  ;;  %1506 = vmax.xlane.f32.xlu0 %v9261_v51  ;;  %v9268_v46 = vpop.f32.mrb[53].mxu0  ;;  %v9270_v1 = vpop.eup %7884 }
 0x323   : > { %6823 = vmatprep.mubr.bf16.mxu1 %v953_v14  ;;  %v9272_v24 = vpop.f32.mrb[54].mxu0 }
 0x324   : > { %v9274_v50 = vpop.eup %7886  ;;  %v903_v39 = vmul.f32 1.442695, %v880_v25  ;;  %v9276_v15 = vpop.f32.mrb[55].mxu0 }
 0x325   : > { %v852_v13 = vpop.xlane.xlu1 %851  ;;  %v954_v43 = vpack.c.bf16 %v9274_v50, %v9270_v1 }
 0x326   : > { %7890 = vpow2.f32 %v903_v39  ;;  %v878_v54 = vsub.f32 %v9164_v11, %v852_v13  ;;  %1502 = vmax.xlane.f32.xlu1 %v9268_v46 }
 0x327   : > { %6824 = vmatmul.mubr.bf16.vlgmr.msra.gmra.mrb[16].mxu1 %v954_v43  ;;  %7892 = vpow2.f32 %v897_v21 }
 0x328   : > { %v899_v28 = vmul.f32 1.442695, %v878_v54  ;;  %7578 = vmatpush3.bf16.msra.mxu1 %v9213_v16  ;;  %v881_v16 = vsub.f32 %v9178_v20, %v858_v4  ;;  %v7889_v13 = vpop.eup %7888 }
 0x329   : > { %6899 = vmatprep.subr.bf16.mxu1 %v9037_v48  ;;  %v862_v6 = vpop.xlane.xlu1 %861  ;;  %v9284_v37 = vpop.f32.mrb[56].mxu0 }
 0x32a   : > { %7894 = vpow2.f32 %v899_v28  ;;  %v883_v56 = vsub.f32 %v9171_v61, %v862_v6  ;;  %1508 = vmax.xlane.f32.xlu1 %v9272_v24  ;;  %v9288_v27 = vpop.f32.mrb[57].mxu0  ;;  %v905_v54 = vmul.f32 1.442695, %v881_v16 }
 0x32b   : > { %v9290_v11 = vpop.f32.mrb[58].mxu0 }
 0x32c   : > { %1516 = vmax.xlane.f32.xlu0 %v9290_v11  ;;  %v9293_v14 = vpop.f32.mrb[59].mxu0  ;;  %v909_v25 = vmul.f32 1.442695, %v883_v56 }
 0x32d   : > { %v864_v39 = vpop.xlane.xlu1 %863 }
 0x32e   : > { %v884_v21 = vsub.f32 %v9181_v7, %v864_v39  ;;  %1504 = vmax.xlane.f32.xlu1 %v9276_v15  ;;  %7896 = vpow2.f32 %v909_v25 }
 0x330   : > { %v7891_v61 = vpop.eup %7890  ;;  %v911_v43 = vmul.f32 1.442695, %v884_v21  ;;  %1512 = vmax.xlane.f32.xlu0 %v9293_v14 }
 0x331   : > { %v860_v28 = vpop.xlane.xlu1 %859  ;;  %v9299_v6 = vpop.f32.mrb[60].mxu0  ;;  %v956_v57 = vpack.c.bf16 %v7891_v61, %v7889_v13 }
 0x332   : > { %7898 = vpow2.f32 %v911_v43  ;;  %v882_v20 = vsub.f32 %v9183_v23, %v860_v28  ;;  %1514 = vmax.xlane.f32.xlu1 %v9284_v37  ;;  %v9303_v4 = vpop.f32.mrb[61].mxu0  ;;  %v7893_v7 = vpop.eup %7892 }
 0x333   : > { %v9305_v56 = vpop.f32.mrb[62].mxu0  ;;  %7900 = vpow2.f32 %v905_v54 }
 0x334   : > { %v7895_v39 = vpop.eup %7894  ;;  %v907_v21 = vmul.f32 1.442695, %v882_v20  ;;  %1524 = vmax.xlane.f32.xlu0 %v9305_v56  ;;  %v9308_v16 = vpop.f32.mrb[63].mxu0 }
 0x335   : > { %v870_v25 = vpop.xlane.xlu1 %869  ;;  %v955_v44 = vpack.c.bf16 %v7895_v39, %v7893_v7 }
 0x336   : > { %7902 = vpow2.f32 %v907_v21  ;;  %1510 = vmax.xlane.f32.xlu1 %v9288_v27  ;;  %v887_v23 = vsub.f32 %v9190_v40, %v870_v25 }
 0x337   : > { %6827 = vmatprep.mubr.bf16.mxu1 %v955_v44 }
 0x338   : > { %6828 = vmatmul.mubr.bf16.gmra.mrb[20].mxu1 %v956_v57  ;;  %1520 = vmax.xlane.f32.xlu0 %v9308_v16  ;;  %v7897_v28 = vpop.eup %7896  ;;  %v917_v32 = vmul.f32 1.442695, %v887_v23 }
 0x339   : > { %v866_v43 = vpop.xlane.xlu1 %865 }
 0x33a   : > { %1522 = vmax.xlane.f32.xlu1 %v9299_v6  ;;  %v885_v54 = vsub.f32 %v9197_v17, %v866_v43  ;;  %7904 = vpow2.f32 %v917_v32 }
 0x33c   : > { %v7899_v20 = vpop.eup %7898  ;;  %921 = vadd.xlane.f32.xlu0 %v9258_v52  ;;  %v913_v40 = vmul.f32 1.442695, %v885_v54 }
 0x33d   : > { %v872_v35 = vpop.xlane.xlu1 %871  ;;  %v958_v21 = vpack.c.bf16 %v7899_v20, %v7897_v28  ;;  %v7901_v44 = vpop.eup %7900 }
 0x33e   : > { %v888_v45 = vsub.f32 %v9199_v63, %v872_v35  ;;  %1518 = vmax.xlane.f32.xlu1 %v9303_v4 }
 0x340   : > { %v7903_v57 = vpop.eup %7902  ;;  %v919_v19 = vmul.f32 1.442695, %v888_v45  ;;  %927 = vadd.xlane.f32.xlu0 %v9274_v50 }
 0x341   : > { %v868_v25 = vpop.xlane.xlu1 %867  ;;  %v957_v26 = vpack.c.bf16 %v7903_v57, %v7901_v44 }
 0x342   : > { %7906 = vpow2.f32 %v919_v19  ;;  %v886_v52 = vsub.f32 %v9201_v3, %v868_v25  ;;  %925 = vadd.xlane.f32.xlu1 %v9270_v1 }
 0x343   : > { %6831 = vmatprep.mubr.bf16.mxu1 %v957_v26  ;;  %7908 = vpow2.f32 %v913_v40 }
 0x344   : > { %v915_v17 = vmul.f32 1.442695, %v886_v52  ;;  %6832 = vmatmul.mubr.bf16.gmra.mrb[24].mxu1 %v958_v21  ;;  %935 = vadd.xlane.f32.xlu0 %v7891_v61  ;;  %v7905_v35 = vpop.eup %7904 }
 0x346   : > { %7910 = vpow2.f32 %v915_v17  ;;  %923 = vadd.xlane.f32.xlu1 %v9256_v58 }
 0x348   : > { %931 = vadd.xlane.f32.xlu0 %v7895_v39 }
 0x34a   : > { %933 = vadd.xlane.f32.xlu1 %v7889_v13 }
 0x34c   : > { %v7907_v32 = vpop.eup %7906  ;;  %943 = vadd.xlane.f32.xlu0 %v7899_v20 }
 0x34d   : > { %v960_v45 = vpack.c.bf16 %v7907_v32, %v7905_v35  ;;  %v7909_v19 = vpop.eup %7908 }
 0x34e   : > { %929 = vadd.xlane.f32.xlu1 %v7893_v7 }
 0x350   : > { %v7911_v63 = vpop.eup %7910  ;;  %939 = vadd.xlane.f32.xlu0 %v7903_v57 }
 0x351   : > { %v959_v3 = vpack.c.bf16 %v7911_v63, %v7909_v19 }
 0x352   : > { %941 = vadd.xlane.f32.xlu1 %v7897_v28 }
 0x353   : > { %6835 = vmatprep.mubr.bf16.mxu1 %v959_v3 }
 0x354   : > { %6836 = vmatmul.mubr.bf16.gmra.mrb[28].mxu1 %v960_v45  ;;  %951 = vadd.xlane.f32.xlu0 %v7907_v32 }
 0x356   : > { %937 = vadd.xlane.f32.xlu1 %v7901_v44 }
 0x358   : > { %947 = vadd.xlane.f32.xlu0 %v7911_v63 }
 0x359   : > { %v9322_v26 = vpop.f32.mrb[64].mxu0 }
 0x35a   : > { %949 = vadd.xlane.f32.xlu1 %v7905_v35  ;;  %v9324_v58 = vpop.f32.mrb[65].mxu0 }
 0x35b   : > { %v9326_v1 = vpop.f32.mrb[66].mxu0 }
 0x35c   : > { %v9328_v50 = vpop.f32.mrb[67].mxu0 }
 0x35e   : > { %945 = vadd.xlane.f32.xlu1 %v7909_v19 }
 0x361   : > { %v9330_v13 = vpop.f32.mrb[68].mxu0 }
 0x362   : > { %v9332_v61 = vpop.f32.mrb[69].mxu0 }
 0x363   : > { %v9334_v7 = vpop.f32.mrb[70].mxu0 }
 0x364   : > { %v9336_v39 = vpop.f32.mrb[71].mxu0 }
 0x369   : > { %v9338_v23 = vpop.f32.mrb[72].mxu0 }
 0x36a   : > { %v9340_v43 = vpop.f32.mrb[73].mxu0 }
 0x36b   : > { %v9342_v28 = vpop.f32.mrb[74].mxu0 }
 0x36c   : > { %v9344_v20 = vpop.f32.mrb[75].mxu0 }
 0x371   : > { %v9346_v54 = vpop.f32.mrb[76].mxu0 }
 0x372   : > { %v9348_v21 = vpop.f32.mrb[77].mxu0 }
 0x373   : > { %v9350_v44 = vpop.f32.mrb[78].mxu0 }
 0x374   : > { %v9352_v57 = vpop.f32.mrb[79].mxu0 }
 0x399   : > { %v9354_v40 = vpop.f32.mrb[80].mxu0 }
 0x39a   : > { %10775 = vst [vmem:[#allocation29_spill] sm:$0xff] %v9354_v40  ;;  %v9356_v25 = vpop.f32.mrb[81].mxu0 }
 0x39b   : > { %10776 = vst [vmem:[#allocation30_spill] sm:$0xff] %v9356_v25  ;;  %v9358_v52 = vpop.f32.mrb[82].mxu0 }
 0x39c   : > { %10777 = vst [vmem:[#allocation31_spill] sm:$0xff] %v9358_v52  ;;  %v9360_v17 = vpop.f32.mrb[83].mxu0 }
 0x39d   : > { %10778 = vst [vmem:[#allocation32_spill] sm:$0xff] %v9360_v17 }
 0x3a1   : > { %v9362_v35 = vpop.f32.mrb[84].mxu0 }
 0x3a2   : > { %10779 = vst [vmem:[#allocation33_spill] sm:$0xff] %v9362_v35  ;;  %v9364_v32 = vpop.f32.mrb[85].mxu0 }
 0x3a3   : > { %10780 = vst [vmem:[#allocation34_spill] sm:$0xff] %v9364_v32  ;;  %v9366_v45 = vpop.f32.mrb[86].mxu0 }
 0x3a4   : > { %10781 = vst [vmem:[#allocation35_spill] sm:$0xff] %v9366_v45  ;;  %v9368_v19 = vpop.f32.mrb[87].mxu0 }
 0x3a5   : > { %10782 = vst [vmem:[#allocation36_spill] sm:$0xff] %v9368_v19 }
 0x3a7   : > { %v1499_v63 = vpop.xlane.xlu1 %1498 }
 0x3a8   : > { %v1528_v3 = vsub.f32 %v9244_v34, %v1499_v63 }
 0x3a9   : > { %v1501_v10 = vpop.xlane.xlu0 %1500  ;;  %v9371_v0 = vpop.f32.mrb[88].mxu0 }
 0x3aa   : > { %10783 = vst [vmem:[#allocation37_spill] sm:$0xff] %v9371_v0  ;;  %v1546_v40 = vmul.f32 1.442695, %v1528_v3  ;;  %v1529_v25 = vsub.f32 %v9249_v59, %v1501_v10  ;;  %v9374_v52 = vpop.f32.mrb[89].mxu0 }
 0x3ab   : > { %10784 = vst [vmem:[#allocation38_spill] sm:$0xff] %v9374_v52  ;;  %v1495_v17 = vpop.xlane.xlu1 %1494  ;;  %v9376_v60 = vpop.f32.mrb[90].mxu0 }
 0x3ac   : > { %10785 = vst [vmem:[#allocation39_spill] sm:$0xff] %v9376_v60  ;;  %7912 = vpow2.f32 %v1546_v40  ;;  %v1548_v35 = vmul.f32 1.442695, %v1529_v25  ;;  %v1526_v45 = vsub.f32 %v9247_v31, %v1495_v17  ;;  %v9379_v32 = vpop.f32.mrb[91].mxu0 }
 0x3ad   : > { %10786 = vst [vmem:[#allocation40_spill] sm:$0xff] %v9379_v32 }
 0x3ae   : > { %7914 = vpow2.f32 %v1548_v35  ;;  %v1542_v19 = vmul.f32 1.442695, %v1526_v45 }
 0x3af   : > { %v1497_v34 = vpop.xlane.xlu1 %1496  ;;  %v1507_v63 = vpop.xlane.xlu0 %1506 }
 0x3b0   : > { %7916 = vpow2.f32 %v1542_v19  ;;  %v1527_v3 = vsub.f32 %v9252_v38, %v1497_v34  ;;  %v1532_v10 = vsub.f32 %v9261_v51, %v1507_v63 }
 0x3b2   : > { %v1544_v59 = vmul.f32 1.442695, %v1527_v3  ;;  %v1554_v52 = vmul.f32 1.442695, %v1532_v10 }
 0x3b3   : > { %v1503_v0 = vpop.xlane.xlu1 %1502 }
 0x3b4   : > { %7918 = vpow2.f32 %v1544_v59  ;;  %v1530_v40 = vsub.f32 %v9268_v46, %v1503_v0 }
 0x3b5   : > { %7920 = vpow2.f32 %v1554_v52 }
 0x3b6   : > { %v9384_v25 = vpop.eup %7912  ;;  %v1550_v31 = vmul.f32 1.442695, %v1530_v40 }
 0x3b7   : > { %v1509_v17 = vpop.xlane.xlu1 %1508  ;;  %1578 = vadd.xlane.f32.xlu1 %v9384_v25 }
 0x3b8   : > { %v9387_v35 = vpop.eup %7914  ;;  %v1533_v45 = vsub.f32 %v9272_v24, %v1509_v17  ;;  %7922 = vpow2.f32 %v1550_v31 }
 0x3b9   : > { %v1517_v38 = vpop.xlane.xlu0 %1516 }
 0x3ba   : > { %v9392_v19 = vpop.eup %7916  ;;  %v1556_v34 = vmul.f32 1.442695, %v1533_v45  ;;  %v1537_v0 = vsub.f32 %v9290_v11, %v1517_v38 }
 0x3bb   : > { %v1505_v46 = vpop.xlane.xlu1 %1504  ;;  %1574 = vadd.xlane.f32.xlu0 %v9392_v19 }
 0x3bc   : > { %7924 = vpow2.f32 %v1556_v34  ;;  %v1531_v63 = vsub.f32 %v9276_v15, %v1505_v46  ;;  %v1564_v10 = vmul.f32 1.442695, %v1537_v0 }
 0x3bd   : > { %v1513_v3 = vpop.xlane.xlu0 %1512 }
 0x3be   : > { %v9397_v52 = vpop.eup %7918  ;;  %v1552_v24 = vmul.f32 1.442695, %v1531_v63  ;;  %v1535_v59 = vsub.f32 %v9293_v14, %v1513_v3 }
 0x3bf   : > { %v1515_v40 = vpop.xlane.xlu1 %1514  ;;  %1576 = vadd.xlane.f32.xlu1 %v9397_v52  ;;  %1580 = vadd.xlane.f32.xlu0 %v9387_v35  ;;  %v9405_v15 = vpop.eup %7920 }
 0x3c0   : > { %7926 = vpow2.f32 %v1552_v24  ;;  %v1536_v31 = vsub.f32 %v9284_v37, %v1515_v40  ;;  %v1560_v34 = vmul.f32 1.442695, %v1535_v59 }
 0x3c1   : > { %v1525_v17 = vpop.xlane.xlu0 %1524  ;;  %7928 = vpow2.f32 %v1564_v10 }
 0x3c2   : > { %v1562_v45 = vmul.f32 1.442695, %v1536_v31  ;;  %v1541_v38 = vsub.f32 %v9305_v56, %v1525_v17  ;;  %v9410_v46 = vpop.eup %7922 }
 0x3c3   : > { %v1511_v14 = vpop.xlane.xlu1 %1510  ;;  %1586 = vadd.xlane.f32.xlu1 %v9405_v15 }
 0x3c4   : > { %7930 = vpow2.f32 %v1562_v45  ;;  %v1534_v0 = vsub.f32 %v9288_v27, %v1511_v14  ;;  %v1572_v37 = vmul.f32 1.442695, %v1541_v38 }
 0x3c5   : > { %v1521_v63 = vpop.xlane.xlu0 %1520  ;;  %7932 = vpow2.f32 %v1560_v34 }
 0x3c6   : > { %v9412_v3 = vpop.eup %7924  ;;  %v1558_v24 = vmul.f32 1.442695, %v1534_v0  ;;  %v1539_v40 = vsub.f32 %v9308_v16, %v1521_v63 }
 0x3c7   : > { %v1523_v31 = vpop.xlane.xlu1 %1522  ;;  %1582 = vadd.xlane.f32.xlu1 %v9410_v46  ;;  %1588 = vadd.xlane.f32.xlu0 %v9412_v3 }
 0x3c8   : > { %7934 = vpow2.f32 %v1558_v24  ;;  %v1568_v27 = vmul.f32 1.442695, %v1539_v40  ;;  %v1540_v10 = vsub.f32 %v9299_v6, %v1523_v31 }
 0x3c9   : > { %7936 = vpow2.f32 %v1572_v37 }
 0x3ca   : > { %v9420_v59 = vpop.eup %7926  ;;  %v1570_v17 = vmul.f32 1.442695, %v1540_v10  ;;  %7938 = vpow2.f32 %v1568_v27 }
 0x3cb   : > { %v1519_v45 = vpop.xlane.xlu1 %1518  ;;  %1584 = vadd.xlane.f32.xlu0 %v9420_v59  ;;  %v9426_v34 = vpop.eup %7928 }
 0x3cc   : > { %7940 = vpow2.f32 %v1570_v17  ;;  %v1538_v38 = vsub.f32 %v9303_v4, %v1519_v45 }
 0x3ce   : > { %v9428_v14 = vpop.eup %7930  ;;  %v1566_v0 = vmul.f32 1.442695, %v1538_v38  ;;  %v922_v38 = vpop.xlane.xlu0 %921 }
 0x3cf   : > { %1594 = vadd.xlane.f32.xlu1 %v9428_v14  ;;  %1596 = vadd.xlane.f32.xlu0 %v9426_v34  ;;  %v9434_v63 = vpop.eup %7932  ;;  %v926_v45 = vpop.xlane.xlu1 %925 }
 0x3d0   : > { %7942 = vpow2.f32 %v1566_v0 }
 0x3d1   : > { %7944 = vrcp.f32 %v922_v38 }
 0x3d2   : > { %v9436_v37 = vpop.eup %7934  ;;  %v928_v27 = vpop.xlane.xlu0 %927 }
 0x3d3   : > { %1590 = vadd.xlane.f32.xlu1 %v9436_v37  ;;  %1592 = vadd.xlane.f32.xlu0 %v9434_v63  ;;  %v9442_v24 = vpop.eup %7936  ;;  %v924_v0 = vpop.xlane.xlu1 %923 }
 0x3d4   : > { %v9444_v40 = vpop.eup %7938  ;;  %7946 = vrcp.f32 %v924_v0 }
 0x3d5   : > { %7948 = vrcp.f32 %v926_v45 }
 0x3d6   : > { %v9446_v31 = vpop.eup %7940  ;;  %7950 = vrcp.f32 %v928_v27  ;;  %v936_v56 = vpop.xlane.xlu0 %935 }
 0x3d7   : > { %1600 = vadd.xlane.f32.xlu0 %v9444_v40  ;;  %v934_v17 = vpop.xlane.xlu1 %933 }
 0x3da   : > { %v9451_v10 = vpop.eup %7942  ;;  %v932_v45 = vpop.xlane.xlu0 %931 }
 0x3db   : > { %1598 = vadd.xlane.f32.xlu1 %v9451_v10  ;;  %v7945_v4 = vpop.eup %7944  ;;  %v930_v0 = vpop.xlane.xlu1 %929 }
 0x3dc   : > { %7952 = vrcp.f32 %v930_v0 }
 0x3dd   : > { %7954 = vrcp.f32 %v932_v45  ;;  %v1776_v45 = vld [vmem:[#allocation8 + $0x18] sm:$0xff] }
 0x3de   : > { %v7947_v60 = vpop.eup %7946  ;;  %7956 = vrcp.f32 %v934_v17 }
 0x3df   : > { %1602 = vadd.xlane.f32.xlu1 %v9446_v31  ;;  %v7949_v38 = vpop.eup %7948  ;;  %7958 = vrcp.f32 %v936_v56 }
 0x3e0   : > { %v7951_v27 = vpop.eup %7950 }
 0x3e3   : > { %2163 = vmax.xlane.f32.xlu1 %v9324_v58 }
 0x3e7   : > { %2165 = vmax.xlane.f32.xlu1 %v9328_v50 }
 0x3ed   : > { %2659 = vrot.lane.b32.xlu0 %v8951_v33, %s8559_s23 }
 0x3f1   : > { %2661 = vrot.lane.b32.xlu0 %v8967_v41, %s8559_s23 }
 0x3f8   : > { %2283 = vrot.lane.b32.xlu1 %v8819_v30, %s8560_s7 }
 0x3fa   : > { %v6825_v6 = vpop.f32.mrb[16].mxu1 }
 0x3fb   : > { %v995_v16 = vpop.f32.mrb[17].mxu1  ;;  %v1076_v41 = vmul.f32 %v7949_v38, %v6825_v6 }
 0x3fc   : > { %v1074_v51 = vmul.f32 %v7945_v4, %v995_v16  ;;  %v6826_v11 = vpop.f32.mrb[18].mxu1 }
 0x3fd   : > { %v998_v32 = vpop.f32.mrb[19].mxu1  ;;  %v1077_v30 = vmul.f32 %v7951_v27, %v6826_v11  ;;  %v1775_v27 = vld [vmem:[#allocation8 + $0x10] sm:$0xff] }
 0x3fe   : > { %v1075_v33 = vmul.f32 %v7947_v60, %v998_v32  ;;  %6843 = vmatprep.mubr.msk.f32.mxu1 %vm695_vm0, %v1074_v51  ;;  %v942_v60 = vpop.xlane.xlu1 %941  ;;  %v7953_v32 = vpop.eup %7952 }
 0x3ff   : > { %v7955_v6 = vpop.eup %7954 }
 0x400   : > { %6844 = vmatmul.mubr.msk.f32.vlgmr.msra.gmra.mrb[32].mxu1 %vm695_vm0, %v1075_v33  ;;  %v944_v33 = vpop.xlane.xlu0 %943 }
 0x401   : > { %6900 = vmatpush3.bf16.msra.mxu1 %v9037_v48  ;;  %6846 = vmatprep.mubr.msk.f32.mxu1 %vm695_vm0, %v1076_v41 }
 0x402   : > { %6901 = vmatprep.subr.bf16.mxu1 %v9058_v2  ;;  %v938_v41 = vpop.xlane.xlu1 %937 }
 0x403   : > { %7960 = vrcp.f32 %v938_v41 }
 0x404   : > { %6847 = vmatmul.mubr.msk.f32.gmra.mrb[34].mxu1 %vm695_vm0, %v1077_v30  ;;  %v940_v11 = vpop.xlane.xlu0 %939 }
 0x405   : > { %6902 = vmatpush3.bf16.msra.mxu1 %v9058_v2  ;;  %7962 = vrcp.f32 %v940_v11  ;;  %v7579_v11 = vpack.c.bf16 %v1776_v45, %v1775_v27 }
 0x406   : > { %6903 = vmatprep.subr.bf16.mxu1 %v9046_v53  ;;  %7964 = vrcp.f32 %v942_v60  ;;  %v950_v38 = vpop.xlane.xlu1 %949 }
 0x407   : > { %7966 = vrcp.f32 %v944_v33 }
 0x409   : > { %6904 = vmatpush3.bf16.msra.mxu1 %v9046_v53  ;;  %v7957_v53 = vpop.eup %7956 }
 0x40a   : > { %6905 = vmatprep.subr.bf16.mxu1 %v9064_v9 }
 0x40b   : > { %v6829_v48 = vpop.f32.mrb[20].mxu1 }
 0x40c   : > { %v1011_v51 = vpop.f32.mrb[21].mxu1  ;;  %v1080_v56 = vmul.f32 %v7957_v53, %v6829_v48 }
 0x40d   : > { %v1078_v16 = vmul.f32 %v7953_v32, %v1011_v51  ;;  %6906 = vmatpush3.bf16.msra.mxu1 %v9064_v9  ;;  %v6830_v30 = vpop.f32.mrb[22].mxu1  ;;  %v7959_v9 = vpop.eup %7958 }
 0x40e   : > { %6907 = vmatprep.subr.bf16.mxu1 %v9062_v8  ;;  %v1014_v2 = vpop.f32.mrb[23].mxu1  ;;  %v1081_v17 = vmul.f32 %v7959_v9, %v6830_v30  ;;  %v7961_v60 = vpop.eup %7960 }
 0x40f   : > { %v1079_v4 = vmul.f32 %v7955_v6, %v1014_v2  ;;  %6849 = vmatprep.mubr.msk.f32.mxu1 %vm695_vm0, %v1078_v16  ;;  %v7963_v51 = vpop.eup %7962 }
 0x410   : > { %1604 = vadd.xlane.f32.xlu0 %v9442_v24  ;;  %v7965_v30 = vpop.eup %7964 }
 0x411   : > { %6908 = vmatpush3.bf16.msra.mxu1 %v9062_v8  ;;  %v952_v8 = vpop.xlane.xlu0 %951 }
 0x412   : > { %6850 = vmatmul.mubr.msk.f32.gmra.mrb[36].mxu1 %vm695_vm0, %v1079_v4  ;;  %6909 = vmatprep.subr.bf16.mxu1 %v9074_v22 }
 0x413   : > { %6852 = vmatprep.mubr.msk.f32.mxu1 %vm695_vm0, %v1080_v56 }
 0x414   : > { %2169 = vmax.xlane.f32.xlu0 %v9326_v1 }
 0x415   : > { %6910 = vmatpush3.bf16.msra.mxu1 %v9074_v22  ;;  %v946_v22 = vpop.xlane.xlu1 %945  ;;  %v948_v6 = vpop.xlane.xlu0 %947 }
 0x416   : > { %6853 = vmatmul.mubr.msk.f32.gmra.mrb[38].mxu1 %vm695_vm0, %v1081_v17  ;;  %6911 = vmatprep.subr.bf16.mxu1 %v9070_v18  ;;  %7968 = vrcp.f32 %v946_v22 }
 0x417   : > { %v6833_v0 = vpop.f32.mrb[24].mxu1  ;;  %7970 = vrcp.f32 %v948_v6 }
 0x418   : > { %v1027_v41 = vpop.f32.mrb[25].mxu1  ;;  %v1084_v2 = vmul.f32 %v7965_v30, %v6833_v0  ;;  %7972 = vrcp.f32 %v950_v38 }
 0x419   : > { %v1082_v48 = vmul.f32 %v7961_v60, %v1027_v41  ;;  %6912 = vmatpush3.bf16.msra.mxu1 %v9070_v18  ;;  %v6834_v32 = vpop.f32.mrb[26].mxu1  ;;  %v7967_v18 = vpop.eup %7966  ;;  %7974 = vrcp.f32 %v952_v8 }
 0x41a   : > { %6913 = vmatprep.subr.bf16.mxu1 %v9082_v29  ;;  %v1030_v33 = vpop.f32.mrb[27].mxu1  ;;  %v1085_v4 = vmul.f32 %v7967_v18, %v6834_v32  ;;  %v10788_v32 = vpack.c.bf16 %v9387_v35, %v9384_v25  ;;  %v10792_v25 = vpack.c.bf16 %v9426_v34, %v9428_v14  ;;  %v10793_v35 = vpack.c.bf16 %v9444_v40, %v9451_v10 }
 0x41b   : > { %v1083_v16 = vmul.f32 %v7963_v51, %v1030_v33  ;;  %6855 = vmatprep.mubr.msk.f32.mxu1 %vm695_vm0, %v1082_v48  ;;  %v10787_v48 = vpack.c.bf16 %v9397_v52, %v9392_v19  ;;  %v10789_v51 = vpack.c.bf16 %v9420_v59, %v9410_v46  ;;  %v10790_v33 = vpack.c.bf16 %v9412_v3, %v9405_v15 }
 0x41c   : > { %2167 = vmax.xlane.f32.xlu1 %v9322_v26  ;;  %v10791_v19 = vpack.c.bf16 %v9434_v63, %v9436_v37  ;;  %v10794_v15 = vpack.c.bf16 %v9442_v24, %v9446_v31 }
 0x41d   : > { %6914 = vmatpush3.bf16.msra.mxu1 %v9082_v29 }
 0x41e   : > { %6856 = vmatmul.mubr.msk.f32.gmra.mrb[40].mxu1 %vm695_vm0, %v1083_v16  ;;  %7580 = vmatprep.subr.bf16.mxu1 %v7579_v11 }
 0x41f   : > { %6858 = vmatprep.mubr.msk.f32.mxu1 %vm695_vm0, %v1084_v2 }
 0x420   : > { %2171 = vmax.xlane.f32.xlu1 %v9332_v61  ;;  %v7969_v56 = vpop.eup %7968 }
 0x421   : > { %v7971_v0 = vpop.eup %7970 }
 0x422   : > { %6859 = vmatmul.mubr.msk.f32.gmra.mrb[42].mxu1 %vm695_vm0, %v1085_v4  ;;  %v7973_v45 = vpop.eup %7972 }
 0x423   : > { %v7975_v8 = vpop.eup %7974 }
 0x424   : > { %2173 = vmax.xlane.f32.xlu1 %v9336_v39 }
 0x427   : > { %v6837_v53 = vpop.f32.mrb[28].mxu1 }
 0x428   : > { %v1043_v29 = vpop.f32.mrb[29].mxu1  ;;  %v1088_v38 = vmul.f32 %v7973_v45, %v6837_v53 }
 0x429   : > { %v1086_v9 = vmul.f32 %v7969_v56, %v1043_v29  ;;  %v6838_v17 = vpop.f32.mrb[30].mxu1 }
 0x42a   : > { %v1046_v27 = vpop.f32.mrb[31].mxu1  ;;  %2285 = vrot.lane.b32.xlu0 %v8829_v36, %s8560_s7  ;;  %v1089_v41 = vmul.f32 %v7975_v8, %v6838_v17 }
 0x42b   : > { %v1087_v60 = vmul.f32 %v7971_v0, %v1046_v27  ;;  %6861 = vmatprep.mubr.msk.f32.mxu1 %vm695_vm0, %v1086_v9 }
 0x42d   : > { %6862 = vmatmul.mubr.msk.f32.gmra.mrb[44].mxu1 %vm695_vm0, %v1087_v60 }
 0x42e   : > { %6864 = vmatprep.mubr.msk.f32.mxu1 %vm695_vm0, %v1088_v38 }
 0x431   : > { %6865 = vmatmul.mubr.msk.f32.gmra.mrb[46].mxu1 %vm695_vm0, %v1089_v41 }
 0x432   : > { %6915 = vmatprep.mubr.bf16.mxu1 %v10787_v48 }
 0x435   : > { %6916 = vmatmul.mubr.bf16.vlgmr.msra.gmra.mrb[48].mxu1 %v10788_v32  ;;  %2287 = vrot.lane.b32.xlu1 %v8842_v42, %s8560_s7 }
 0x436   : > { %6919 = vmatprep.mubr.bf16.mxu1 %v10789_v51  ;;  %7582 = vmatpush3.bf16.msra.mxu1 %v7579_v11 }
 0x43d   : > { %6920 = vmatmul.mubr.bf16.gmra.mrb[52].mxu1 %v10790_v33  ;;  %v10795_v33 = vld [vmem:[#allocation18_spill] sm:$0xff] }
 0x43e   : > { %6923 = vmatprep.mubr.bf16.mxu1 %v10791_v19 }
 0x444   : > { %v9527_v52 = vpop.xlane.xlu1 %1578 }
 0x445   : > { %6924 = vmatmul.mubr.bf16.gmra.mrb[56].mxu1 %v10792_v25  ;;  %v10796_v25 = vld [vmem:[#allocation15_spill] sm:$0xff] }
 0x446   : > { %6927 = vmatprep.mubr.bf16.mxu1 %v10793_v35  ;;  %v10797_v35 = vld [vmem:[#allocation20_spill] sm:$0xff] }
 0x448   : > { %v9529_v46 = vpop.xlane.xlu0 %1574 }
 0x449   : > { %2175 = vmax.xlane.f32.xlu0 %v9330_v13 }
 0x44c   : > { %v9534_v3 = vpop.xlane.xlu1 %1576  ;;  %v9536_v59 = vpop.xlane.xlu0 %1580 }
 0x44d   : > { %6928 = vmatmul.mubr.bf16.gmra.mrb[60].mxu1 %v10794_v15 }
 0x450   : > { %v9538_v34 = vpop.xlane.xlu1 %1586 }
 0x454   : > { %v9540_v14 = vpop.xlane.xlu0 %1588  ;;  %v9545_v37 = vpop.xlane.xlu1 %1582 }
 0x458   : > { %v9542_v63 = vpop.xlane.xlu0 %1584 }
 0x459   : > { %2177 = vmax.xlane.f32.xlu1 %v9334_v7 }
 0x45c   : > { %v9547_v40 = vpop.xlane.xlu0 %1596  ;;  %v9550_v24 = vpop.xlane.xlu1 %1594 }
 0x45d   : > { %2179 = vmax.xlane.f32.xlu1 %v9340_v43 }
 0x45f   : > { %2289 = vrot.lane.b32.xlu0 %v8857_v49, %s8560_s7 }
 0x460   : > { %v9554_v31 = vpop.xlane.xlu0 %1592  ;;  %v9556_v10 = vpop.xlane.xlu1 %1590 }
 0x464   : > { %v9558_v11 = vpop.xlane.xlu0 %1600 }
 0x468   : > { %v9560_v22 = vpop.xlane.xlu1 %1598  ;;  %v2660_v16 = vpop.permute.xlu0 %2659 }
 0x469   : > { %7079 = vmatprep.mubr.msk.bf16.mxu0 %vm695_vm0, %v2660_v16  ;;  %v10798_v16 = vld [vmem:[#allocation24_spill] sm:$0xff] }
 0x46c   : > { %v9563_v30 = vpop.xlane.xlu1 %1602  ;;  %v2662_v6 = vpop.permute.xlu0 %2661 }
 0x46d   : > { %7080 = vmatmul.mubr.msk.bf16.gmra.mrb[92].mxu0 %vm695_vm0, %v2662_v6  ;;  %v10799_v6 = vld [vmem:[#allocation22_spill] sm:$0xff] }
 0x46e   : > { %2291 = vrot.lane.b32.xlu1 %v8868_v55, %s8560_s7 }
 0x470   : > { %v2164_v2 = vpop.xlane.xlu1 %2163 }
 0x471   : > { %v2195_v18 = vsub.f32 %v9324_v58, %v2164_v2 }
 0x473   : > { %v2211_v4 = vmul.f32 1.442695, %v2195_v18 }
 0x474   : > { %v2166_v53 = vpop.xlane.xlu1 %2165 }
 0x475   : > { %v2196_v56 = vsub.f32 %v9328_v50, %v2166_v53  ;;  %7976 = vpow2.f32 %v2211_v4  ;;  %v10800_v4 = vld [vmem:[#allocation28_spill] sm:$0xff]  ;;  %v10801_v53 = vld [vmem:[#allocation26_spill] sm:$0xff] }
 0x477   : > { %v2213_v29 = vmul.f32 1.442695, %v2196_v56 }
 0x478   : > { %v9570_v9 = vpop.permute.xlu1 %2283 }
 0x479   : > { %7978 = vpow2.f32 %v2213_v29  ;;  %6991 = vmatprep.subr.bf16.mxu1 %v9570_v9 }
 0x47e   : > { %2181 = vmax.xlane.f32.xlu0 %v9344_v20 }
 0x47f   : > { %v9574_v17 = vpop.eup %7976 }
 0x482   : > { %2185 = vmax.xlane.f32.xlu0 %v9342_v28 }
 0x483   : > { %v9577_v0 = vpop.eup %7978 }
 0x484   : > { %v2275_v58 = vpack.c.bf16 %v9577_v0, %v9574_v17 }
 0x492   : > { %2183 = vmax.xlane.f32.xlu1 %v9338_v23 }
 0x496   : > { %2187 = vmax.xlane.f32.xlu1 %v9348_v21 }
 0x498   : > { %2293 = vrot.lane.b32.xlu0 %v8880_v62, %s8560_s7 }
 0x4a7   : > { %2295 = vrot.lane.b32.xlu1 %v8892_v5, %s8560_s7 }
 0x4a9   : > { %v2168_v50 = vpop.xlane.xlu1 %2167 }
 0x4ad   : > { %v2172_v27 = vpop.xlane.xlu1 %2171 }
 0x4ae   : > { %v2199_v45 = vsub.f32 %v9332_v61, %v2172_v27  ;;  %v9598_v61 = vpop.xlane.xlu0 %1604 }
 0x4b0   : > { %v2219_v60 = vmul.f32 1.442695, %v2199_v45 }
 0x4b1   : > { %v2174_v38 = vpop.xlane.xlu1 %2173 }
 0x4b2   : > { %v2200_v8 = vsub.f32 %v9336_v39, %v2174_v38  ;;  %7980 = vpow2.f32 %v2219_v60  ;;  %v9602_v39 = vpop.xlane.xlu0 %2169 }
 0x4b4   : > { %v2221_v41 = vmul.f32 1.442695, %v2200_v8  ;;  %v2197_v8 = vsub.f32 %v9322_v26, %v2168_v50 }
 0x4b5   : > { %v9618_v2 = vpop.permute.xlu1 %2287 }
 0x4b6   : > { %7982 = vpow2.f32 %v2221_v41  ;;  %v9608_v19 = vpop.permute.xlu0 %2285  ;;  %v2215_v41 = vmul.f32 1.442695, %v2197_v8 }
 0x4b7   : > { %2189 = vmax.xlane.f32.xlu0 %v9352_v57 }
 0x4bb   : > { %2193 = vmax.xlane.f32.xlu0 %v9350_v44 }
 0x4bc   : > { %v9591_v48 = vpop.eup %7980 }
 0x4c0   : > { %v9593_v32 = vpop.eup %7982 }
 0x4c1   : > { %v2277_v51 = vpack.c.bf16 %v9593_v32, %v9591_v48 }
 0x4cb   : > { %2191 = vmax.xlane.f32.xlu1 %v9346_v54 }
 0x4d1   : > { %2297 = vrot.lane.b32.xlu0 %v8904_v12, %s8560_s7 }
 0x4d5   : > { %3326 = vrot.lane.b32.xlu0 %v8852_v47, %s8561_s8 }
 0x4d6   : > { %v2176_v15 = vpop.xlane.xlu0 %2175 }
 0x4d7   : > { %v2201_v18 = vsub.f32 %v9330_v13, %v2176_v15 }
 0x4d9   : > { %3328 = vrot.lane.b32.xlu0 %v10795_v33, %s8561_s8  ;;  %v2223_v56 = vmul.f32 1.442695, %v2201_v18 }
 0x4da   : > { %v9639_v15 = vpop.permute.xlu0 %2289 }
 0x4db   : > { %7984 = vpow2.f32 %v2223_v56 }
 0x4dc   : > { %3324 = vrot.lane.b32.xlu1 %v10796_v25, %s8561_s8 }
 0x4dd   : > { %3330 = vrot.lane.b32.xlu0 %v10797_v35, %s8561_s8 }
 0x4e0   : > { %3334 = vrot.lane.b32.xlu1 %v10798_v16, %s8561_s8 }
 0x4e1   : > { %3332 = vrot.lane.b32.xlu0 %v10799_v6, %s8561_s8 }
 0x4e4   : > { %3338 = vrot.lane.b32.xlu1 %v10800_v4, %s8561_s8 }
 0x4e5   : > { %3336 = vrot.lane.b32.xlu0 %v10801_v53, %s8561_s8  ;;  %v9626_v60 = vpop.eup %7984 }
 0x4e6   : > { %v2178_v29 = vpop.xlane.xlu1 %2177 }
 0x4e7   : > { %v2202_v27 = vsub.f32 %v9334_v7, %v2178_v29 }
 0x4e9   : > { %v2225_v45 = vmul.f32 1.442695, %v2202_v27 }
 0x4ea   : > { %v2180_v7 = vpop.xlane.xlu1 %2179 }
 0x4eb   : > { %7986 = vpow2.f32 %v2225_v45  ;;  %v2203_v18 = vsub.f32 %v9340_v43, %v2180_v7 }
 0x4ec   : > { %7988 = vrcp.f32 %v9529_v46 }
 0x4ed   : > { %7990 = vrcp.f32 %v9534_v3 }
 0x4ee   : > { %7992 = vpow2.f32 %v2215_v41 }
 0x4ef   : > { %7994 = vrcp.f32 %v9527_v52 }
 0x4f0   : > { %7996 = vrcp.f32 %v9536_v59  ;;  %v2227_v59 = vmul.f32 1.442695, %v2203_v18 }
 0x4f1   : > { %7998 = vrcp.f32 %v9545_v37 }
 0x4f2   : > { %8000 = vrcp.f32 %v9542_v63 }
 0x4f3   : > { %8002 = vrcp.f32 %v9538_v34 }
 0x4f4   : > { %8004 = vrcp.f32 %v9540_v14 }
 0x4f5   : > { %v9628_v38 = vpop.eup %7986  ;;  %8006 = vrcp.f32 %v9556_v10 }
 0x4f6   : > { %v2278_v13 = vpack.c.bf16 %v9628_v38, %v9626_v60  ;;  %v7989_v46 = vpop.eup %7988  ;;  %8008 = vpow2.f32 %v2227_v59 }
 0x4f7   : > { %v7991_v50 = vpop.eup %7990 }
 0x4f8   : > { %v9645_v29 = vpop.eup %7992 }
 0x4f9   : > { %v7995_v45 = vpop.eup %7994 }
 0x4fa   : > { %v7997_v41 = vpop.eup %7996 }
 0x4fb   : > { %v7999_v18 = vpop.eup %7998 }
 0x504   : > { %2243 = vadd.xlane.f32.xlu0 %v9574_v17 }
 0x508   : > { %v6917_v26 = vpop.f32.mrb[48].mxu1  ;;  %2245 = vadd.xlane.f32.xlu1 %v9577_v0 }
 0x509   : > { %v1680_v3 = vpop.f32.mrb[49].mxu1  ;;  %v1761_v63 = vmul.f32 %v7995_v45, %v6917_v26  ;;  %v10802_v45 = vld [vmem:[#allocation14_spill] sm:$0xff] }
 0x50a   : > { %v1759_v52 = vmul.f32 %v7989_v46, %v1680_v3  ;;  %v6918_v56 = vpop.f32.mrb[50].mxu1  ;;  %v8001_v46 = vpop.eup %8000 }
 0x50b   : > { %v1683_v37 = vpop.f32.mrb[51].mxu1  ;;  %v2182_v27 = vpop.xlane.xlu0 %2181  ;;  %v1762_v7 = vmul.f32 %v7997_v41, %v6918_v56 }
 0x50c   : > { %v1760_v8 = vmul.f32 %v7991_v50, %v1683_v37  ;;  %v2204_v43 = vsub.f32 %v9344_v20, %v2182_v27  ;;  %6935 = vmatprep.mubr.msk.f32.mxu1 %vm695_vm0, %v1759_v52  ;;  %2247 = vadd.xlane.f32.xlu1 %v9645_v29  ;;  %v8003_v3 = vpop.eup %8002 }
 0x50e   : > { %v2229_v34 = vmul.f32 1.442695, %v2204_v43  ;;  %6936 = vmatmul.mubr.msk.f32.vlgmr.msra.gmra.mrb[32].mxu1 %vm695_vm0, %v1760_v8  ;;  %v2292_v43 = vpop.permute.xlu1 %2291 }
 0x50f   : > { %6992 = vmatpush3.bf16.msra.mxu1 %v9570_v9  ;;  %6938 = vmatprep.mubr.msk.f32.mxu1 %vm695_vm0, %v1761_v63 }
 0x510   : > { %8010 = vpow2.f32 %v2229_v34  ;;  %6993 = vmatprep.subr.bf16.mxu1 %v9608_v19  ;;  %v6921_v20 = vpop.f32.mrb[52].mxu1 }
 0x511   : > { %8012 = vrcp.f32 %v9554_v31  ;;  %v1696_v14 = vpop.f32.mrb[53].mxu1  ;;  %v1765_v31 = vmul.f32 %v8003_v3, %v6921_v20 }
 0x512   : > { %8014 = vrcp.f32 %v9550_v24  ;;  %v1763_v10 = vmul.f32 %v7999_v18, %v1696_v14  ;;  %v6922_v26 = vpop.f32.mrb[54].mxu1  ;;  %6939 = vmatmul.mubr.msk.f32.gmra.mrb[34].mxu1 %vm695_vm0, %v1762_v7  ;;  %v8005_v24 = vpop.eup %8004  ;;  %v10803_v7 = vld [vmem:[#allocation16_spill] sm:$0xff] }
 0x513   : > { %6994 = vmatpush3.bf16.msra.mxu1 %v9608_v19  ;;  %v1699_v9 = vpop.f32.mrb[55].mxu1  ;;  %8016 = vrcp.f32 %v9547_v40  ;;  %v8007_v19 = vpop.eup %8006  ;;  %v1766_v52 = vmul.f32 %v8005_v24, %v6922_v26 }
 0x514   : > { %v1764_v50 = vmul.f32 %v8001_v46, %v1699_v9  ;;  %6995 = vmatprep.subr.bf16.mxu1 %v9618_v2  ;;  %6941 = vmatprep.mubr.msk.f32.mxu1 %vm695_vm0, %v1763_v10  ;;  %8018 = vrcp.f32 %v9560_v22  ;;  %v9668_v59 = vpop.eup %8008  ;;  %v9671_v40 = vpop.xlane.xlu0 %2185 }
 0x515   : > { %8020 = vrcp.f32 %v9558_v11 }
 0x516   : > { %6942 = vmatmul.mubr.msk.f32.gmra.mrb[36].mxu1 %vm695_vm0, %v1764_v50  ;;  %8022 = vrcp.f32 %v9563_v30 }
 0x517   : > { %6996 = vmatpush3.bf16.msra.mxu1 %v9618_v2  ;;  %6944 = vmatprep.mubr.msk.f32.mxu1 %vm695_vm0, %v1765_v31  ;;  %8024 = vrcp.f32 %v9598_v61 }
 0x518   : > { %6997 = vmatprep.subr.bf16.mxu1 %v9639_v15  ;;  %v6925_v56 = vpop.f32.mrb[56].mxu1  ;;  %v2294_v18 = vpop.permute.xlu0 %2293 }
 0x519   : > { %v1712_v37 = vpop.f32.mrb[57].mxu1 }
 0x51a   : > { %v9673_v27 = vpop.eup %8010  ;;  %v1767_v22 = vmul.f32 %v8007_v19, %v1712_v37  ;;  %v6926_v2 = vpop.f32.mrb[58].mxu1  ;;  %6945 = vmatmul.mubr.msk.f32.gmra.mrb[38].mxu1 %vm695_vm0, %v1766_v52  ;;  %3308 = vrot.lane.b32.xlu0 %v10802_v45, %s8561_s8 }
 0x51b   : > { %v8013_v8 = vpop.eup %8012  ;;  %6998 = vmatpush3.bf16.msra.mxu1 %v9639_v15  ;;  %v1715_v63 = vpop.f32.mrb[59].mxu1  ;;  %v2279_v11 = vpack.c.bf16 %v9673_v27, %v9668_v59 }
 0x51c   : > { %v8015_v34 = vpop.eup %8014  ;;  %v1768_v41 = vmul.f32 %v8013_v8, %v1715_v63  ;;  %6999 = vmatprep.subr.bf16.mxu1 %v2292_v43  ;;  %6947 = vmatprep.mubr.msk.f32.mxu1 %vm695_vm0, %v1767_v22 }
 0x51d   : > { %v1769_v30 = vmul.f32 %v8015_v34, %v6925_v56  ;;  %3310 = vrot.lane.b32.xlu1 %v10803_v7, %s8561_s8  ;;  %v8017_v20 = vpop.eup %8016  ;;  %v2198_v56 = vsub.f32 %v9326_v1, %v9602_v39 }
 0x51e   : > { %6948 = vmatmul.mubr.msk.f32.gmra.mrb[40].mxu1 %vm695_vm0, %v1768_v41  ;;  %v1770_v14 = vmul.f32 %v8017_v20, %v6926_v2  ;;  %v8019_v26 = vpop.eup %8018 }
 0x51f   : > { %7000 = vmatpush3.bf16.msra.mxu1 %v2292_v43  ;;  %6950 = vmatprep.mubr.msk.f32.mxu1 %vm695_vm0, %v1769_v30  ;;  %v2184_v15 = vpop.xlane.xlu1 %2183  ;;  %v8021_v61 = vpop.eup %8020  ;;  %v2217_v8 = vmul.f32 1.442695, %v2198_v56  ;;  %v2206_v30 = vsub.f32 %v9342_v28, %v9671_v40 }
 0x520   : > { %7001 = vmatprep.subr.bf16.mxu1 %v2294_v18  ;;  %v6929_v10 = vpop.f32.mrb[60].mxu1  ;;  %v8023_v24 = vpop.eup %8022  ;;  %v2205_v0 = vsub.f32 %v9338_v23, %v2184_v15  ;;  %v10804_v23 = vld [vmem:[#allocation17_spill] sm:$0xff] }
 0x521   : > { %v1728_v46 = vpop.f32.mrb[61].mxu1  ;;  %v1773_v52 = vmul.f32 %v8023_v24, %v6929_v10  ;;  %v8025_v37 = vpop.eup %8024  ;;  %8026 = vpow2.f32 %v2217_v8 }
 0x522   : > { %v1771_v9 = vmul.f32 %v8019_v26, %v1728_v46  ;;  %v6930_v3 = vpop.f32.mrb[62].mxu1  ;;  %6951 = vmatmul.mubr.msk.f32.gmra.mrb[42].mxu1 %vm695_vm0, %v1770_v14  ;;  %v2231_v14 = vmul.f32 1.442695, %v2205_v0  ;;  %v2233_v46 = vmul.f32 1.442695, %v2206_v30 }
 0x523   : > { %7002 = vmatpush3.bf16.msra.mxu1 %v2294_v18  ;;  %v1731_v50 = vpop.f32.mrb[63].mxu1  ;;  %v2188_v31 = vpop.xlane.xlu1 %2187  ;;  %v1774_v2 = vmul.f32 %v8025_v37, %v6930_v3 }
 0x524   : > { %v1772_v19 = vmul.f32 %v8021_v61, %v1731_v50  ;;  %6953 = vmatprep.mubr.msk.f32.mxu1 %vm695_vm0, %v1771_v9  ;;  %v2207_v18 = vsub.f32 %v9348_v21, %v2188_v31  ;;  %8028 = vpow2.f32 %v2231_v14  ;;  %v10805_v21 = vld [vmem:[#allocation19_spill] sm:$0xff] }
 0x526   : > { %6954 = vmatmul.mubr.msk.f32.gmra.mrb[44].mxu1 %vm695_vm0, %v1772_v19  ;;  %v2235_v9 = vmul.f32 1.442695, %v2207_v18 }
 0x527   : > { %6956 = vmatprep.mubr.msk.f32.mxu1 %vm695_vm0, %v1773_v52  ;;  %v2296_v22 = vpop.permute.xlu1 %2295 }
 0x528   : > { %7003 = vmatprep.subr.bf16.mxu1 %v2296_v22 }
 0x529   : > { %7004 = vmatpush3.bf16.msra.mxu1 %v2296_v22 }
 0x52a   : > { %6957 = vmatmul.mubr.msk.f32.gmra.mrb[46].mxu1 %vm695_vm0, %v1774_v2 }
 0x52b   : > { %7007 = vmatprep.mubr.bf16.mxu1 %v2275_v58  ;;  %v8027_v43 = vpop.eup %8026 }
 0x52c   : > { %v2276_v26 = vpack.c.bf16 %v8027_v43, %v9645_v29 }
 0x539   : > { %2249 = vadd.xlane.f32.xlu0 %v8027_v43 }
 0x53d   : > { %2253 = vadd.xlane.f32.xlu0 %v9593_v32  ;;  %v8029_v32 = vpop.eup %8028 }
 0x540   : > { %v9699_v1 = vpop.f32.mrb[92].mxu0 }
 0x541   : > { %2251 = vadd.xlane.f32.xlu1 %v9591_v48  ;;  %v9702_v39 = vpop.f32.mrb[93].mxu0 }
 0x542   : > { %v9704_v63 = vpop.f32.mrb[94].mxu0 }
 0x543   : > { %v9706_v34 = vpop.f32.mrb[95].mxu0 }
 0x544   : > { %v2190_v41 = vpop.xlane.xlu0 %2189 }
 0x545   : > { %2255 = vadd.xlane.f32.xlu1 %v9626_v60  ;;  %v2208_v58 = vsub.f32 %v9352_v57, %v2190_v41 }
 0x547   : > { %v2237_v10 = vmul.f32 1.442695, %v2208_v58 }
 0x548   : > { %v2194_v17 = vpop.xlane.xlu0 %2193 }
 0x549   : > { %8030 = vpow2.f32 %v2237_v10  ;;  %v2210_v28 = vsub.f32 %v9350_v44, %v2194_v17  ;;  %v2436_v10 = vld [vmem:[#allocation8 + $0x20] sm:$0xff] }
 0x54a   : > { %8032 = vpow2.f32 %v2233_v46 }
 0x54b   : > { %8034 = vpow2.f32 %v2235_v9  ;;  %v2241_v57 = vmul.f32 1.442695, %v2210_v28  ;;  %v10808_v9 = vld [vmem:[#allocation30_spill] sm:$0xff]  ;;  %v10809_v28 = vld [vmem:[#allocation32_spill] sm:$0xff] }
 0x54c   : > { %v2298_v20 = vpop.permute.xlu0 %2297 }
 0x54d   : > { %7005 = vmatprep.subr.bf16.mxu1 %v2298_v20  ;;  %8036 = vpow2.f32 %v2241_v57  ;;  %v10810_v57 = vld [vmem:[#allocation25_spill] sm:$0xff] }
 0x54e   : > { %7006 = vmatpush3.bf16.msra.mxu1 %v2298_v20 }
 0x551   : > { %7008 = vmatmul.mubr.bf16.vlgmr.msra.gmra.mrb[64].mxu1 %v2276_v26  ;;  %v2437_v26 = vld [vmem:[#allocation8 + $0x28] sm:$0xff] }
 0x552   : > { %7011 = vmatprep.mubr.bf16.mxu1 %v2277_v51  ;;  %v7583_v46 = vpack.c.bf16 %v2437_v26, %v2436_v10 }
 0x553   : > { %3312 = vrot.lane.b32.xlu0 %v10804_v23, %s8561_s8  ;;  %v8031_v51 = vpop.eup %8030 }
 0x554   : > { %v8033_v3 = vpop.eup %8032  ;;  %7584 = vmatprep.subr.bf16.mxu1 %v7583_v46 }
 0x555   : > { %v8035_v61 = vpop.eup %8034  ;;  %v2280_v60 = vpack.c.bf16 %v8033_v3, %v8029_v32  ;;  %7586 = vmatpush3.bf16.msra.mxu1 %v7583_v46 }
 0x556   : > { %3314 = vrot.lane.b32.xlu1 %v10805_v21, %s8561_s8 }
 0x557   : > { %v9734_v50 = vpop.eup %8036 }
 0x558   : > { %v2192_v29 = vpop.xlane.xlu1 %2191 }
 0x559   : > { %v2209_v40 = vsub.f32 %v9346_v54, %v2192_v29  ;;  %7012 = vmatmul.mubr.bf16.gmra.mrb[68].mxu1 %v2278_v13  ;;  %v3327_v54 = vpop.permute.xlu0 %3326  ;;  %v2281_v13 = vpack.c.bf16 %v8031_v51, %v8035_v61 }
 0x55a   : > { %7015 = vmatprep.mubr.bf16.mxu1 %v2279_v11  ;;  %v3368_v11 = vsel %vm695_vm0, %v3327_v54, 0 }
 0x55b   : > { %v2239_v48 = vmul.f32 1.442695, %v2209_v40  ;;  %v10811_v40 = vld [vmem:[#allocation27_spill] sm:$0xff] }
 0x55c   : > { %v3325_v44 = vpop.permute.xlu1 %3324 }
 0x55d   : > { %8038 = vpow2.f32 %v2239_v48  ;;  %7767 = vmatprep.subr.msk.bf16.mxu0 %vm695_vm0, %v3325_v44  ;;  %v3365_v15 = vsel %vm695_vm0, %v3325_v44, 0  ;;  %v3329_v31 = vpop.permute.xlu0 %3328 }
 0x55e   : > { %7144 = vmatpush3.bf16.xpose.msra.mxu0 %v3365_v15  ;;  %v3371_v52 = vsel %vm695_vm0, %v3329_v31, 0 }
 0x55f   : > { %7768 = vmatprep.subr.msk.bf16.mxu0 %vm695_vm0, %v3327_v54  ;;  %v10813_v54 = vld [vmem:[#allocation31_spill] sm:$0xff] }
 0x560   : > { %v3335_v8 = vpop.permute.xlu1 %3334 }
 0x561   : > { %7016 = vmatmul.mubr.bf16.gmra.mrb[72].mxu1 %v2280_v60  ;;  %v3331_v56 = vpop.permute.xlu0 %3330  ;;  %v3380_v43 = vsel %vm695_vm0, %v3335_v8, 0  ;;  %v10815_v60 = vld [vmem:[#allocation34_spill] sm:$0xff] }
 0x562   : > { %7019 = vmatprep.mubr.bf16.mxu1 %v2281_v13  ;;  %v3374_v37 = vsel %vm695_vm0, %v3331_v56, 0  ;;  %v10816_v13 = vld [vmem:[#allocation36_spill] sm:$0xff] }
 0x564   : > { %v3339_v17 = vpop.permute.xlu1 %3338 }
 0x565   : > { %v3333_v22 = vpop.permute.xlu0 %3332  ;;  %v3386_v20 = vsel %vm695_vm0, %v3339_v17, 0 }
 0x566   : > { %7146 = vmatpush3.bf16.xpose.msra.mxu0 %v3368_v11  ;;  %v3377_v2 = vsel %vm695_vm0, %v3333_v22, 0 }
 0x567   : > { %v8039_v24 = vpop.eup %8038  ;;  %7769 = vmatprep.subr.msk.bf16.mxu0 %vm695_vm0, %v3329_v31 }
 0x568   : > { %v2282_v19 = vpack.c.bf16 %v9734_v50, %v8039_v24 }
 0x56a   : > { %7020 = vmatmul.mubr.bf16.gmra.mrb[76].mxu1 %v2282_v19 }
 0x56e   : > { %7148 = vmatpush3.bf16.xpose.msra.mxu0 %v3371_v52 }
 0x56f   : > { %7770 = vmatprep.subr.msk.bf16.mxu0 %vm695_vm0, %v3331_v56  ;;  %v10817_v56 = vld [vmem:[#allocation33_spill] sm:$0xff] }
 0x572   : > { %2257 = vadd.xlane.f32.xlu0 %v9628_v38  ;;  %v3337_v38 = vpop.permute.xlu0 %3336 }
 0x573   : > { %v3383_v41 = vsel %vm695_vm0, %v3337_v38, 0 }
 0x576   : > { %2261 = vadd.xlane.f32.xlu0 %v9673_v27  ;;  %7150 = vmatpush3.bf16.xpose.msra.mxu0 %v3374_v37  ;;  %v10806_v27 = vld [vmem:[#allocation21_spill] sm:$0xff] }
 0x577   : > { %7771 = vmatprep.subr.msk.bf16.mxu0 %vm695_vm0, %v3333_v22 }
 0x57a   : > { %2259 = vadd.xlane.f32.xlu1 %v9668_v59  ;;  %v10807_v59 = vld [vmem:[#allocation23_spill] sm:$0xff] }
 0x57e   : > { %2263 = vadd.xlane.f32.xlu1 %v8029_v32  ;;  %7152 = vmatpush3.bf16.xpose.msra.mxu0 %v3377_v2 }
 0x57f   : > { %7772 = vmatprep.subr.msk.bf16.mxu0 %vm695_vm0, %v3335_v8 }
 0x586   : > { %7154 = vmatpush3.bf16.xpose.msra.mxu0 %v3380_v43 }
 0x587   : > { %7773 = vmatprep.subr.msk.bf16.mxu0 %vm695_vm0, %v3337_v38 }
 0x58c   : > { %3316 = vrot.lane.b32.xlu0 %v10806_v27, %s8561_s8 }
 0x58e   : > { %7156 = vmatpush3.bf16.xpose.msra.mxu0 %v3383_v41 }
 0x58f   : > { %3318 = vrot.lane.b32.xlu1 %v10807_v59, %s8561_s8  ;;  %7774 = vmatprep.subr.msk.bf16.mxu0 %vm695_vm0, %v3339_v17 }
 0x591   : > { %v2244_v0 = vpop.xlane.xlu0 %2243 }
 0x592   : > { %8040 = vrcp.f32 %v2244_v0 }
 0x595   : > { %v2246_v58 = vpop.xlane.xlu1 %2245  ;;  %v3309_v30 = vpop.permute.xlu0 %3308 }
 0x596   : > { %7158 = vmatpush3.bf16.xpose.msra.mxu0 %v3386_v20  ;;  %7159 = vmatprep.mubr.msk.bf16.mxu0 %vm695_vm0, %v3309_v30  ;;  %8042 = vrcp.f32 %v2246_v58 }
 0x599   : > { %v2248_v18 = vpop.xlane.xlu1 %2247 }
 0x59a   : > { %8044 = vrcp.f32 %v2248_v18 }
 0x59c   : > { %v8041_v22 = vpop.eup %8040 }
 0x59d   : > { %v3311_v14 = vpop.permute.xlu1 %3310 }
 0x59e   : > { %7160 = vmatmul.mubr.msk.bf16.vlgmr.msra.gmra.mrb[96].mxu0 %vm695_vm0, %v3311_v14 }
 0x5a0   : > { %v8043_v38 = vpop.eup %8042 }
 0x5a4   : > { %v8045_v17 = vpop.eup %8044 }
 0x5ab   : > { %2265 = vadd.xlane.f32.xlu0 %v8033_v3 }
 0x5af   : > { %2269 = vadd.xlane.f32.xlu0 %v8031_v51  ;;  %v10812_v51 = vld [vmem:[#allocation13_spill] sm:$0xff] }
 0x5b3   : > { %2267 = vadd.xlane.f32.xlu1 %v8035_v61  ;;  %v10814_v61 = vld [vmem:[#allocation29_spill] sm:$0xff] }
 0x5b7   : > { %2271 = vadd.xlane.f32.xlu1 %v8039_v24 }
 0x5bb   : > { %2824 = vmax.xlane.f32.xlu1 %v10808_v9 }
 0x5bf   : > { %2826 = vmax.xlane.f32.xlu1 %v10809_v28 }
 0x5c5   : > { %3320 = vrot.lane.b32.xlu0 %v10810_v57, %s8561_s8 }
 0x5c6   : > { %v2250_v29 = vpop.xlane.xlu0 %2249 }
 0x5c7   : > { %8046 = vrcp.f32 %v2250_v29 }
 0x5c9   : > { %3322 = vrot.lane.b32.xlu0 %v10811_v40, %s8561_s8 }
 0x5ca   : > { %v2254_v48 = vpop.xlane.xlu0 %2253 }
 0x5ce   : > { %v2252_v32 = vpop.xlane.xlu1 %2251  ;;  %v3313_v44 = vpop.permute.xlu0 %3312 }
 0x5cf   : > { %7163 = vmatprep.mubr.msk.bf16.mxu0 %vm695_vm0, %v3313_v44  ;;  %8048 = vrcp.f32 %v2252_v32 }
 0x5d0   : > { %2944 = vrot.lane.b32.xlu1 %v10812_v51, %s8559_s23  ;;  %8050 = vrcp.f32 %v2254_v48 }
 0x5d1   : > { %v8047_v58 = vpop.eup %8046 }
 0x5d2   : > { %v2256_v15 = vpop.xlane.xlu1 %2255 }
 0x5d3   : > { %8052 = vrcp.f32 %v2256_v15 }
 0x5d6   : > { %v3315_v3 = vpop.permute.xlu1 %3314 }
 0x5d7   : > { %7164 = vmatmul.mubr.msk.bf16.gmra.mrb[100].mxu0 %vm695_vm0, %v3315_v3  ;;  %v10818_v3 = vld [vmem:[#allocation35_spill] sm:$0xff] }
 0x5d9   : > { %v8049_v14 = vpop.eup %8048 }
 0x5da   : > { %v8051_v29 = vpop.eup %8050 }
 0x5dd   : > { %v8053_v32 = vpop.eup %8052 }
 0x5e8   : > { %2273 = vadd.xlane.f32.xlu0 %v9734_v50 }
 0x5ec   : > { %2830 = vmax.xlane.f32.xlu0 %v10813_v54 }
 0x5f4   : > { %2828 = vmax.xlane.f32.xlu1 %v10814_v61 }
 0x5f8   : > { %2832 = vmax.xlane.f32.xlu1 %v10815_v60 }
 0x5fc   : > { %2834 = vmax.xlane.f32.xlu1 %v10816_v13 }
 0x5ff   : > { %v2258_v11 = vpop.xlane.xlu0 %2257 }
 0x600   : > { %8054 = vrcp.f32 %v2258_v11 }
 0x602   : > { %2946 = vrot.lane.b32.xlu0 %v8829_v36, %s8559_s23 }
 0x603   : > { %v2262_v31 = vpop.xlane.xlu0 %2261 }
 0x607   : > { %v2260_v24 = vpop.xlane.xlu1 %2259  ;;  %v3317_v19 = vpop.permute.xlu0 %3316 }
 0x608   : > { %7167 = vmatprep.mubr.msk.bf16.mxu0 %vm695_vm0, %v3317_v19  ;;  %8056 = vrcp.f32 %v2260_v24 }
 0x609   : > { %8058 = vrcp.f32 %v2262_v31 }
 0x60a   : > { %v8055_v11 = vpop.eup %8054 }
 0x60b   : > { %v2264_v52 = vpop.xlane.xlu1 %2263 }
 0x60c   : > { %8060 = vrcp.f32 %v2264_v52 }
 0x60d   : > { %2948 = vrot.lane.b32.xlu1 %v8842_v42, %s8559_s23 }
 0x60f   : > { %v3319_v50 = vpop.permute.xlu1 %3318 }
 0x610   : > { %7168 = vmatmul.mubr.msk.bf16.gmra.mrb[104].mxu0 %vm695_vm0, %v3319_v50  ;;  %v10819_v50 = vld [vmem:[#allocation38_spill] sm:$0xff] }
 0x612   : > { %v8057_v19 = vpop.eup %8056 }
 0x621   : > { %2836 = vmax.xlane.f32.xlu0 %v10817_v56 }
 0x624   : > { %v7009_v37 = vpop.f32.mrb[64].mxu1 }
 0x625   : > { %v2341_v2 = vpop.f32.mrb[65].mxu1  ;;  %v2422_v0 = vmul.f32 %v8045_v17, %v7009_v37 }
 0x626   : > { %v2420_v8 = vmul.f32 %v8041_v22, %v2341_v2  ;;  %v7010_v43 = vpop.f32.mrb[66].mxu1  ;;  %v8059_v2 = vpop.eup %8058 }
 0x627   : > { %v2344_v41 = vpop.f32.mrb[67].mxu1  ;;  %v2423_v20 = vmul.f32 %v8047_v58, %v7010_v43  ;;  %v8061_v43 = vpop.eup %8060 }
 0x628   : > { %v2421_v30 = vmul.f32 %v8043_v38, %v2344_v41  ;;  %7027 = vmatprep.mubr.msk.f32.mxu1 %vm695_vm0, %v2420_v8 }
 0x62a   : > { %7028 = vmatmul.mubr.msk.f32.vlgmr.msra.gmra.mrb[32].mxu1 %vm695_vm0, %v2421_v30 }
 0x62b   : > { %7030 = vmatprep.mubr.msk.f32.mxu1 %vm695_vm0, %v2422_v0 }
 0x62c   : > { %v7013_v18 = vpop.f32.mrb[68].mxu1 }
 0x62d   : > { %v2357_v10 = vpop.f32.mrb[69].mxu1  ;;  %v2426_v15 = vmul.f32 %v8053_v32, %v7013_v18 }
 0x62e   : > { %v2424_v26 = vmul.f32 %v8049_v14, %v2357_v10  ;;  %v7014_v46 = vpop.f32.mrb[70].mxu1  ;;  %7031 = vmatmul.mubr.msk.f32.gmra.mrb[34].mxu1 %vm695_vm0, %v2423_v20 }
 0x62f   : > { %v2360_v48 = vpop.f32.mrb[71].mxu1  ;;  %v2427_v31 = vmul.f32 %v8055_v11, %v7014_v46 }
 0x630   : > { %v2425_v44 = vmul.f32 %v8051_v29, %v2360_v48  ;;  %7033 = vmatprep.mubr.msk.f32.mxu1 %vm695_vm0, %v2424_v26 }
 0x631   : > { %2838 = vmax.xlane.f32.xlu1 %v10818_v3 }
 0x632   : > { %7034 = vmatmul.mubr.msk.f32.gmra.mrb[36].mxu1 %vm695_vm0, %v2425_v44 }
 0x633   : > { %7036 = vmatprep.mubr.msk.f32.mxu1 %vm695_vm0, %v2426_v15 }
 0x634   : > { %v7017_v24 = vpop.f32.mrb[72].mxu1 }
 0x635   : > { %v2373_v52 = vpop.f32.mrb[73].mxu1  ;;  %2840 = vmax.xlane.f32.xlu1 %v10819_v50  ;;  %v2430_v17 = vmul.f32 %v8061_v43, %v7017_v24 }
 0x636   : > { %v2428_v37 = vmul.f32 %v8057_v19, %v2373_v52  ;;  %v7018_v22 = vpop.f32.mrb[74].mxu1  ;;  %7037 = vmatmul.mubr.msk.f32.gmra.mrb[38].mxu1 %vm695_vm0, %v2427_v31 }
 0x637   : > { %v2376_v8 = vpop.f32.mrb[75].mxu1  ;;  %2950 = vrot.lane.b32.xlu0 %v8857_v49, %s8559_s23 }
 0x638   : > { %v2429_v38 = vmul.f32 %v8059_v2, %v2376_v8  ;;  %7039 = vmatprep.mubr.msk.f32.mxu1 %vm695_vm0, %v2428_v37  ;;  %v2266_v41 = vpop.xlane.xlu0 %2265  ;;  %v10821_v2 = vld [vmem:[#allocation39_spill] sm:$0xff]  ;;  %v10822_v8 = vld [vmem:[#allocation37_spill] sm:$0xff] }
 0x639   : > { %8062 = vrcp.f32 %v2266_v41 }
 0x63a   : > { %7040 = vmatmul.mubr.msk.f32.gmra.mrb[40].mxu1 %vm695_vm0, %v2429_v38 }
 0x63b   : > { %7042 = vmatprep.mubr.msk.f32.mxu1 %vm695_vm0, %v2430_v17 }
 0x63c   : > { %v2270_v30 = vpop.xlane.xlu0 %2269 }
 0x63d   : > { %v7021_v0 = vpop.f32.mrb[76].mxu1  ;;  %8064 = vrcp.f32 %v2270_v30 }
 0x63e   : > { %v2389_v58 = vpop.f32.mrb[77].mxu1 }
 0x63f   : > { %v7022_v20 = vpop.f32.mrb[78].mxu1 }
 0x640   : > { %v2268_v18 = vpop.xlane.xlu1 %2267  ;;  %v2392_v14 = vpop.f32.mrb[79].mxu1 }
 0x641   : > { %8066 = vrcp.f32 %v2268_v18  ;;  %v3321_v10 = vpop.permute.xlu0 %3320 }
 0x642   : > { %7171 = vmatprep.mubr.msk.bf16.mxu0 %vm695_vm0, %v3321_v10 }
 0x643   : > { %v8063_v26 = vpop.eup %8062 }
 0x644   : > { %v2272_v46 = vpop.xlane.xlu1 %2271  ;;  %v2431_v29 = vmul.f32 %v8063_v26, %v7018_v22  ;;  %v10820_v22 = vld [vmem:[#allocation40_spill] sm:$0xff] }
 0x645   : > { %8068 = vrcp.f32 %v2272_v46  ;;  %v3323_v48 = vpop.permute.xlu0 %3322 }
 0x646   : > { %7172 = vmatmul.mubr.msk.bf16.gmra.mrb[108].mxu0 %vm695_vm0, %v3323_v48  ;;  %7043 = vmatmul.mubr.msk.f32.gmra.mrb[42].mxu1 %vm695_vm0, %v2431_v29 }
 0x647   : > { %2952 = vrot.lane.b32.xlu1 %v8868_v55, %s8559_s23  ;;  %v8065_v44 = vpop.eup %8064 }
 0x648   : > { %v2825_v32 = vpop.xlane.xlu1 %2824  ;;  %v2433_v24 = vmul.f32 %v8065_v44, %v2392_v14 }
 0x649   : > { %v2856_v38 = vsub.f32 %v10808_v9, %v2825_v32 }
 0x64b   : > { %v8067_v15 = vpop.eup %8066 }
 0x64c   : > { %v2827_v11 = vpop.xlane.xlu1 %2826  ;;  %v2432_v31 = vmul.f32 %v8067_v15, %v2389_v58 }
 0x64d   : > { %v2857_v43 = vsub.f32 %v10809_v28, %v2827_v11 }
 0x64e   : > { %7045 = vmatprep.mubr.msk.f32.mxu1 %vm695_vm0, %v2432_v31 }
 0x64f   : > { %v8069_v19 = vpop.eup %8068  ;;  %7046 = vmatmul.mubr.msk.f32.gmra.mrb[44].mxu1 %vm695_vm0, %v2433_v24  ;;  %v2874_v41 = vmul.f32 1.442695, %v2857_v43 }
 0x650   : > { %v2945_v52 = vpop.permute.xlu1 %2944  ;;  %v2434_v37 = vmul.f32 %v8069_v19, %v7021_v0  ;;  %v2872_v0 = vmul.f32 1.442695, %v2856_v38 }
 0x651   : > { %7083 = vmatprep.subr.bf16.mxu1 %v2945_v52  ;;  %8070 = vpow2.f32 %v2874_v41 }
 0x652   : > { %7048 = vmatprep.mubr.msk.f32.mxu1 %vm695_vm0, %v2434_v37  ;;  %7084 = vmatpush3.bf16.msra.mxu1 %v2945_v52 }
 0x656   : > { %2842 = vmax.xlane.f32.xlu0 %v10820_v22 }
 0x65a   : > { %2846 = vmax.xlane.f32.xlu0 %v10821_v2 }
 0x65b   : > { %v9821_v10 = vpop.eup %8070 }
 0x66b   : > { %2844 = vmax.xlane.f32.xlu1 %v10822_v8 }
 0x66f   : > { %2848 = vmax.xlane.f32.xlu1 %v9702_v39 }
 0x670   : > { %2954 = vrot.lane.b32.xlu0 %v8880_v62, %s8559_s23 }
 0x671   : > { %v9811_v17 = vpop.f32.mrb[96].mxu0 }
 0x672   : > { %v9813_v30 = vpop.f32.mrb[97].mxu0 }
 0x673   : > { %v9815_v58 = vpop.f32.mrb[98].mxu0 }
 0x674   : > { %v9817_v18 = vpop.f32.mrb[99].mxu0 }
 0x675   : > { %v2274_v14 = vpop.xlane.xlu0 %2273 }
 0x676   : > { %8072 = vrcp.f32 %v2274_v14 }
 0x677   : > { %8074 = vpow2.f32 %v2872_v0 }
 0x679   : > { %v9819_v9 = vpop.xlane.xlu0 %2830 }
 0x67d   : > { %v2947_v28 = vpop.permute.xlu0 %2946 }
 0x67e   : > { %7085 = vmatprep.subr.bf16.mxu1 %v2947_v28 }
 0x67f   : > { %7086 = vmatpush3.bf16.msra.mxu1 %v2947_v28 }
 0x680   : > { %v8073_v26 = vpop.eup %8072  ;;  %2956 = vrot.lane.b32.xlu1 %v8892_v5, %s8559_s23 }
 0x681   : > { %v8075_v46 = vpop.eup %8074  ;;  %v2829_v29 = vpop.xlane.xlu1 %2828  ;;  %v2435_v48 = vmul.f32 %v8073_v26, %v7022_v20 }
 0x682   : > { %v2936_v32 = vpack.c.bf16 %v9821_v10, %v8075_v46 }
 0x683   : > { %7049 = vmatmul.mubr.msk.f32.gmra.mrb[46].mxu1 %vm695_vm0, %v2435_v48 }
 0x684   : > { %7099 = vmatprep.mubr.bf16.mxu1 %v2936_v32 }
 0x685   : > { %v2833_v44 = vpop.xlane.xlu1 %2832 }
 0x686   : > { %v2860_v15 = vsub.f32 %v10815_v60, %v2833_v44 }
 0x688   : > { %v2880_v11 = vmul.f32 1.442695, %v2860_v15 }
 0x689   : > { %v2835_v31 = vpop.xlane.xlu1 %2834 }
 0x68a   : > { %v2861_v24 = vsub.f32 %v10816_v13, %v2835_v31  ;;  %8076 = vpow2.f32 %v2880_v11 }
 0x68c   : > { %v2882_v19 = vmul.f32 1.442695, %v2861_v24 }
 0x68d   : > { %v2949_v52 = vpop.permute.xlu1 %2948 }
 0x68e   : > { %8078 = vpow2.f32 %v2882_v19  ;;  %7087 = vmatprep.subr.bf16.mxu1 %v2949_v52  ;;  %v2858_v19 = vsub.f32 %v10814_v61, %v2829_v29 }
 0x68f   : > { %7088 = vmatpush3.bf16.msra.mxu1 %v2949_v52  ;;  %2850 = vmax.xlane.f32.xlu0 %v9706_v34 }
 0x690   : > { %v2876_v52 = vmul.f32 1.442695, %v2858_v19 }
 0x693   : > { %2854 = vmax.xlane.f32.xlu0 %v9704_v63 }
 0x694   : > { %v9831_v20 = vpop.eup %8076 }
 0x698   : > { %v9833_v37 = vpop.eup %8078 }
 0x6a4   : > { %2852 = vmax.xlane.f32.xlu1 %v9699_v1 }
 0x6a9   : > { %2958 = vrot.lane.b32.xlu0 %v8904_v12, %s8559_s23  ;;  %s8482_s23 = sshll.u32 %s8565_s21, 4  ;;  %s8483_s23 = int_to_ptr.vmem [resolvable:$false] %s8482_s23 }
 0x6aa   : > { %v9840_v13 = vpop.f32.mrb[100].mxu0  ;;  %s8484_s7 = scalar_lea.vmem %s8483_s23, 4096  ;;  %p8485_p5 = scmp.lt.s32.totalorder %s10644_s5, %s8483_s23 }
 0x6ab   : > { %v9842_v43 = vpop.f32.mrb[101].mxu0  ;;  %p8486_p9 = scmp.lt.s32.totalorder %s8484_s7, %s8478_s25 }
 0x6ac   : > { %v9844_v38 = vpop.f32.mrb[102].mxu0 }
 0x6ad   : > { %3987 = vrot.lane.b32.xlu0 %v8852_v47, %s8562_s30  ;;  %v9848_v41 = vpop.f32.mrb[103].mxu0  ;;  %p8487_p12 = por %p8486_p9, %p8485_p5 }
 0x6ae   : > { %v2837_v0 = vpop.xlane.xlu0 %2836 }
 0x6af   : > { %v2862_v28 = vsub.f32 %v10817_v56, %v2837_v0  ;;  %p8488_p2 = pnand %p8487_p12, %p8481_p3 }
 0x6b1   : > { %3989 = vrot.lane.b32.xlu0 %v10795_v33, %s8562_s30  ;;  %v2884_v26 = vmul.f32 1.442695, %v2862_v28 }
 0x6b2   : > { %v2951_v14 = vpop.permute.xlu0 %2950 }
 0x6b3   : > { %7089 = vmatprep.subr.bf16.mxu1 %v2951_v14  ;;  %8080 = vpow2.f32 %v2884_v26 }
 0x6b4   : > { %7090 = vmatpush3.bf16.msra.mxu1 %v2951_v14 }
 0x6b5   : > { %3985 = vrot.lane.b32.xlu1 %v10796_v25, %s8562_s30  ;;  %3991 = vrot.lane.b32.xlu0 %v10797_v35, %s8562_s30  ;;  %v10823_v35 = vpack.c.bf16 %v9833_v37, %v9831_v20 }
 0x6b9   : > { %3995 = vrot.lane.b32.xlu1 %v10798_v16, %s8562_s30  ;;  %3993 = vrot.lane.b32.xlu0 %v10799_v6, %s8562_s30 }
 0x6bd   : > { %3999 = vrot.lane.b32.xlu1 %v10800_v4, %s8562_s30  ;;  %3997 = vrot.lane.b32.xlu0 %v10801_v53, %s8562_s30  ;;  %v9866_v31 = vpop.eup %8080 }
 0x6be   : > { %v2839_v48 = vpop.xlane.xlu1 %2838 }
 0x6bf   : > { %v2863_v32 = vsub.f32 %v10818_v3, %v2839_v48 }
 0x6c1   : > { %v2886_v44 = vmul.f32 1.442695, %v2863_v32 }
 0x6c2   : > { %v2841_v15 = vpop.xlane.xlu1 %2840 }
 0x6c3   : > { %8082 = vpow2.f32 %v2886_v44  ;;  %v2864_v3 = vsub.f32 %v10819_v50, %v2841_v15 }
 0x6c4   : > { %8084 = vpow2.f32 %v2876_v52  ;;  %v2859_v52 = vsub.f32 %v10813_v54, %v9819_v9 }
 0x6c5   : > { %v2888_v0 = vmul.f32 1.442695, %v2864_v3 }
 0x6c6   : > { %v2953_v11 = vpop.permute.xlu1 %2952 }
 0x6c7   : > { %7091 = vmatprep.subr.bf16.mxu1 %v2953_v11  ;;  %8086 = vpow2.f32 %v2888_v0  ;;  %v2878_v0 = vmul.f32 1.442695, %v2859_v52 }
 0x6c8   : > { %7092 = vmatpush3.bf16.msra.mxu1 %v2953_v11 }
 0x6cd   : > { %v9868_v56 = vpop.eup %8082 }
 0x6ce   : > { %v8085_v26 = vpop.eup %8084 }
 0x6dc   : > { %2904 = vadd.xlane.f32.xlu0 %v8075_v46 }
 0x6e1   : > { %2906 = vadd.xlane.f32.xlu1 %v9821_v10  ;;  %v9884_v10 = vpop.eup %8086 }
 0x6e3   : > { %v2843_v14 = vpop.xlane.xlu0 %2842  ;;  %v9875_v28 = vpop.f32.mrb[104].mxu0 }
 0x6e4   : > { %v2865_v48 = vsub.f32 %v10820_v22, %v2843_v14  ;;  %v9878_v32 = vpop.f32.mrb[105].mxu0 }
 0x6e5   : > { %2908 = vadd.xlane.f32.xlu1 %v8085_v26  ;;  %v9880_v44 = vpop.f32.mrb[106].mxu0 }
 0x6e6   : > { %v2890_v61 = vmul.f32 1.442695, %v2865_v48  ;;  %v9882_v29 = vpop.f32.mrb[107].mxu0 }
 0x6e7   : > { %v2847_v46 = vpop.xlane.xlu0 %2846 }
 0x6e8   : > { %8088 = vpow2.f32 %v2890_v61 }
 0x6e9   : > { %8090 = vpow2.f32 %v2878_v0  ;;  %v2867_v0 = vsub.f32 %v10821_v2, %v2847_v46 }
 0x6eb   : > { %v2955_v50 = vpop.permute.xlu0 %2954  ;;  %v2894_v6 = vmul.f32 1.442695, %v2867_v0 }
 0x6ec   : > { %7093 = vmatprep.subr.bf16.mxu1 %v2955_v50 }
 0x6ed   : > { %7094 = vmatpush3.bf16.msra.mxu1 %v2955_v50 }
 0x6f2   : > { %v9886_v15 = vpop.eup %8088  ;;  %3969 = vrot.lane.b32.xlu0 %v10802_v45, %s8562_s30 }
 0x6f3   : > { %v2940_v22 = vpack.c.bf16 %v9886_v15, %v9884_v10  ;;  %v8091_v14 = vpop.eup %8090 }
 0x6f4   : > { %v2937_v4 = vpack.c.bf16 %v8091_v14, %v8085_v26 }
 0x6f6   : > { %3971 = vrot.lane.b32.xlu1 %v10803_v7, %s8562_s30 }
 0x6f8   : > { %v2845_v11 = vpop.xlane.xlu1 %2844 }
 0x6f9   : > { %v2866_v52 = vsub.f32 %v10822_v8, %v2845_v11 }
 0x6fb   : > { %v2892_v45 = vmul.f32 1.442695, %v2866_v52 }
 0x6fc   : > { %v2849_v19 = vpop.xlane.xlu1 %2848 }
 0x6fd   : > { %v2868_v7 = vsub.f32 %v9702_v39, %v2849_v19  ;;  %8092 = vpow2.f32 %v2892_v45 }
 0x6ff   : > { %v2896_v16 = vmul.f32 1.442695, %v2868_v7 }
 0x700   : > { %v2957_v3 = vpop.permute.xlu1 %2956 }
 0x701   : > { %7095 = vmatprep.subr.bf16.mxu1 %v2957_v3 }
 0x702   : > { %7096 = vmatpush3.bf16.msra.mxu1 %v2957_v3 }
 0x711   : > { %2910 = vadd.xlane.f32.xlu0 %v8091_v14 }
 0x715   : > { %2914 = vadd.xlane.f32.xlu0 %v9833_v37 }
 0x719   : > { %v9897_v48 = vpop.f32.mrb[108].mxu0 }
 0x71a   : > { %2912 = vadd.xlane.f32.xlu1 %v9831_v20  ;;  %v9900_v61 = vpop.f32.mrb[109].mxu0 }
 0x71b   : > { %v9902_v50 = vpop.f32.mrb[110].mxu0 }
 0x71c   : > { %v9904_v24 = vpop.f32.mrb[111].mxu0  ;;  %v2851_v54 = vpop.xlane.xlu0 %2850 }
 0x71d   : > { %v2869_v3 = vsub.f32 %v9706_v34, %v2851_v54 }
 0x71e   : > { %2916 = vadd.xlane.f32.xlu1 %v9866_v31 }
 0x71f   : > { %v2898_v53 = vmul.f32 1.442695, %v2869_v3 }
 0x720   : > { %v2855_v9 = vpop.xlane.xlu0 %2854 }
 0x721   : > { %8094 = vpow2.f32 %v2898_v53  ;;  %v2871_v39 = vsub.f32 %v9704_v63, %v2855_v9 }
 0x722   : > { %8096 = vpow2.f32 %v2894_v6 }
 0x723   : > { %8098 = vpow2.f32 %v2896_v16  ;;  %v2902_v34 = vmul.f32 1.442695, %v2871_v39 }
 0x724   : > { %v2959_v60 = vpop.permute.xlu0 %2958 }
 0x725   : > { %7097 = vmatprep.subr.bf16.mxu1 %v2959_v60  ;;  %8100 = vpow2.f32 %v2902_v34 }
 0x726   : > { %7098 = vmatpush3.bf16.msra.mxu1 %v2959_v60 }
 0x728   : > { %v3988_v20 = vpop.permute.xlu0 %3987 }
 0x729   : > { %7100 = vmatmul.mubr.bf16.vlgmr.msra.gmra.mrb[80].mxu1 %v2937_v4  ;;  %v10824_v4 = vpack.c.bf16 %v9868_v56, %v9866_v31  ;;  %v4029_v60 = vsel %vm695_vm0, %v3988_v20, 0 }
 0x72a   : > { %7103 = vmatprep.mubr.bf16.mxu1 %v10823_v35  ;;  %v8093_v35 = vpop.eup %8092 }
 0x72b   : > { %3973 = vrot.lane.b32.xlu0 %v10804_v23, %s8562_s30  ;;  %v9923_v7 = vpop.eup %8094 }
 0x72c   : > { %v8097_v6 = vpop.eup %8096  ;;  %v3990_v26 = vpop.permute.xlu0 %3989 }
 0x72d   : > { %v8099_v8 = vpop.eup %8098  ;;  %v2941_v37 = vpack.c.bf16 %v8097_v6, %v8093_v35  ;;  %v4032_v11 = vsel %vm695_vm0, %v3990_v26, 0 }
 0x72f   : > { %3975 = vrot.lane.b32.xlu1 %v10805_v21, %s8562_s30  ;;  %v9930_v31 = vpop.eup %8100 }
 0x730   : > { %v3992_v19 = vpop.permute.xlu0 %3991 }
 0x731   : > { %v2853_v2 = vpop.xlane.xlu1 %2852  ;;  %7104 = vmatmul.mubr.bf16.gmra.mrb[84].mxu1 %v10824_v4  ;;  %v4035_v14 = vsel %vm695_vm0, %v3992_v19, 0 }
 0x732   : > { %v2870_v45 = vsub.f32 %v9699_v1, %v2853_v2  ;;  %7107 = vmatprep.mubr.bf16.mxu1 %v2940_v22  ;;  %v2942_v1 = vpack.c.bf16 %v9923_v7, %v8099_v8 }
 0x734   : > { %v2900_v53 = vmul.f32 1.442695, %v2870_v45  ;;  %v3994_v54 = vpop.permute.xlu0 %3993 }
 0x735   : > { %v3986_v16 = vpop.permute.xlu1 %3985  ;;  %v4038_v9 = vsel %vm695_vm0, %v3994_v54, 0 }
 0x736   : > { %8102 = vpow2.f32 %v2900_v53  ;;  %7775 = vmatprep.subr.msk.bf16.mxu0 %vm695_vm0, %v3986_v16  ;;  %v4026_v63 = vsel %vm695_vm0, %v3986_v16, 0  ;;  %v3098_v53 = vld [vmem:[#allocation8 + $0x38] sm:$0xff] }
 0x737   : > { %7236 = vmatpush3.bf16.xpose.msra.mxu0 %v4026_v63 }
 0x738   : > { %7776 = vmatprep.subr.msk.bf16.mxu0 %vm695_vm0, %v3988_v20 }
 0x739   : > { %7108 = vmatmul.mubr.bf16.gmra.mrb[88].mxu1 %v2941_v37  ;;  %v3996_v52 = vpop.permute.xlu1 %3995 }
 0x73a   : > { %7111 = vmatprep.mubr.bf16.mxu1 %v2942_v1  ;;  %v4041_v3 = vsel %vm695_vm0, %v3996_v52, 0 }
 0x73d   : > { %v4000_v0 = vpop.permute.xlu1 %3999 }
 0x73e   : > { %v4047_v2 = vsel %vm695_vm0, %v4000_v0, 0 }
 0x73f   : > { %7238 = vmatpush3.bf16.xpose.msra.mxu0 %v4029_v60 }
 0x740   : > { %v8103_v46 = vpop.eup %8102  ;;  %7777 = vmatprep.subr.msk.bf16.mxu0 %vm695_vm0, %v3990_v26 }
 0x741   : > { %v2943_v22 = vpack.c.bf16 %v9930_v31, %v8103_v46 }
 0x743   : > { %7112 = vmatmul.mubr.bf16.gmra.mrb[92].mxu1 %v2943_v22 }
 0x747   : > { %7240 = vmatpush3.bf16.xpose.msra.mxu0 %v4032_v11 }
 0x748   : > { %7778 = vmatprep.subr.msk.bf16.mxu0 %vm695_vm0, %v3992_v19 }
 0x74a   : > { %2918 = vadd.xlane.f32.xlu0 %v9868_v56  ;;  %v3998_v56 = vpop.permute.xlu0 %3997 }
 0x74e   : > { %2922 = vadd.xlane.f32.xlu0 %v9886_v15  ;;  %v4044_v15 = vsel %vm695_vm0, %v3998_v56, 0 }
 0x74f   : > { %7242 = vmatpush3.bf16.xpose.msra.mxu0 %v4035_v14 }
 0x750   : > { %7779 = vmatprep.subr.msk.bf16.mxu0 %vm695_vm0, %v3994_v54 }
 0x753   : > { %2920 = vadd.xlane.f32.xlu1 %v9884_v10 }
 0x757   : > { %2924 = vadd.xlane.f32.xlu1 %v8093_v35  ;;  %7244 = vmatpush3.bf16.xpose.msra.mxu0 %v4038_v9  ;;  %v3097_v35 = vld [vmem:[#allocation8 + $0x30] sm:$0xff] }
 0x758   : > { %7780 = vmatprep.subr.msk.bf16.mxu0 %vm695_vm0, %v3996_v52  ;;  %v7587_v16 = vpack.c.bf16 %v3098_v53, %v3097_v35 }
 0x75a   : > { %7588 = vmatprep.subr.bf16.mxu1 %v7587_v16 }
 0x75b   : > { %7590 = vmatpush3.bf16.msra.mxu1 %v7587_v16 }
 0x75f   : > { %7246 = vmatpush3.bf16.xpose.msra.mxu0 %v4041_v3 }
 0x760   : > { %7781 = vmatprep.subr.msk.bf16.mxu0 %vm695_vm0, %v3998_v56 }
 0x764   : > { %3977 = vrot.lane.b32.xlu0 %v10806_v27, %s8562_s30 }
 0x767   : > { %7248 = vmatpush3.bf16.xpose.msra.mxu0 %v4044_v15 }
 0x768   : > { %3979 = vrot.lane.b32.xlu1 %v10807_v59, %s8562_s30  ;;  %7782 = vmatprep.subr.msk.bf16.mxu0 %vm695_vm0, %v4000_v0 }
 0x769   : > { %v2905_v10 = vpop.xlane.xlu0 %2904 }
 0x76a   : > { %8104 = vrcp.f32 %v2905_v10 }
 0x76d   : > { %v3970_v39 = vpop.permute.xlu0 %3969 }
 0x76e   : > { %v2907_v34 = vpop.xlane.xlu1 %2906  ;;  %7251 = vmatprep.mubr.msk.bf16.mxu0 %vm695_vm0, %v3970_v39 }
 0x76f   : > { %7250 = vmatpush3.bf16.xpose.msra.mxu0 %v4047_v2  ;;  %8106 = vrcp.f32 %v2907_v34 }
 0x772   : > { %v2909_v4 = vpop.xlane.xlu1 %2908 }
 0x773   : > { %8108 = vrcp.f32 %v2909_v4 }
 0x774   : > { %v8105_v19 = vpop.eup %8104 }
 0x776   : > { %v3972_v45 = vpop.permute.xlu1 %3971 }
 0x777   : > { %7252 = vmatmul.mubr.msk.bf16.vlgmr.msra.gmra.mrb[112].mxu0 %vm695_vm0, %v3972_v45 }
 0x779   : > { %v8107_v52 = vpop.eup %8106 }
 0x77d   : > { %v8109_v56 = vpop.eup %8108 }
 0x783   : > { %2926 = vadd.xlane.f32.xlu0 %v8097_v6 }
 0x787   : > { %2930 = vadd.xlane.f32.xlu0 %v9923_v7 }
 0x78c   : > { %2928 = vadd.xlane.f32.xlu1 %v8099_v8 }
 0x790   : > { %2932 = vadd.xlane.f32.xlu1 %v8103_v46 }
 0x794   : > { %3485 = vmax.xlane.f32.xlu1 %v9813_v30 }
 0x798   : > { %3487 = vmax.xlane.f32.xlu1 %v9817_v18 }
 0x79d   : > { %3981 = vrot.lane.b32.xlu0 %v10810_v57, %s8562_s30 }
 0x79e   : > { %v2911_v63 = vpop.xlane.xlu0 %2910 }
 0x79f   : > { %8110 = vrcp.f32 %v2911_v63 }
 0x7a1   : > { %3983 = vrot.lane.b32.xlu0 %v10811_v40, %s8562_s30 }
 0x7a2   : > { %v2915_v20 = vpop.xlane.xlu0 %2914 }
 0x7a6   : > { %v3974_v37 = vpop.permute.xlu0 %3973 }
 0x7a7   : > { %v2913_v1 = vpop.xlane.xlu1 %2912  ;;  %7255 = vmatprep.mubr.msk.bf16.mxu0 %vm695_vm0, %v3974_v37 }
 0x7a8   : > { %8112 = vrcp.f32 %v2913_v1 }
 0x7a9   : > { %3605 = vrot.lane.b32.xlu1 %v10812_v51, %s8561_s8  ;;  %8114 = vrcp.f32 %v2915_v20  ;;  %v8111_v10 = vpop.eup %8110 }
 0x7ab   : > { %v2917_v7 = vpop.xlane.xlu1 %2916 }
 0x7ac   : > { %8116 = vrcp.f32 %v2917_v7 }
 0x7af   : > { %v3976_v6 = vpop.permute.xlu1 %3975 }
 0x7b0   : > { %7256 = vmatmul.mubr.msk.bf16.gmra.mrb[116].mxu0 %vm695_vm0, %v3976_v6 }
 0x7b2   : > { %v8113_v2 = vpop.eup %8112 }
 0x7b3   : > { %v8115_v53 = vpop.eup %8114 }
 0x7b6   : > { %v8117_v63 = vpop.eup %8116 }
 0x7c0   : > { %2934 = vadd.xlane.f32.xlu0 %v9930_v31 }
 0x7c4   : > { %3491 = vmax.xlane.f32.xlu0 %v9815_v58 }
 0x7cd   : > { %3489 = vmax.xlane.f32.xlu1 %v9811_v17 }
 0x7d1   : > { %3493 = vmax.xlane.f32.xlu1 %v9842_v43 }
 0x7d5   : > { %3495 = vmax.xlane.f32.xlu1 %v9848_v41 }
 0x7d7   : > { %v2919_v8 = vpop.xlane.xlu0 %2918 }
 0x7d8   : > { %8118 = vrcp.f32 %v2919_v8 }
 0x7da   : > { %3607 = vrot.lane.b32.xlu0 %v8829_v36, %s8561_s8 }
 0x7db   : > { %v2923_v60 = vpop.xlane.xlu0 %2922 }
 0x7df   : > { %v3978_v26 = vpop.permute.xlu0 %3977 }
 0x7e0   : > { %v2921_v46 = vpop.xlane.xlu1 %2920  ;;  %7259 = vmatprep.mubr.msk.bf16.mxu0 %vm695_vm0, %v3978_v26 }
 0x7e1   : > { %8120 = vrcp.f32 %v2921_v46 }
 0x7e2   : > { %8122 = vrcp.f32 %v2923_v60  ;;  %v8119_v1 = vpop.eup %8118 }
 0x7e4   : > { %v2925_v22 = vpop.xlane.xlu1 %2924 }
 0x7e5   : > { %8124 = vrcp.f32 %v2925_v22 }
 0x7e6   : > { %3609 = vrot.lane.b32.xlu1 %v8842_v42, %s8561_s8 }
 0x7e8   : > { %v3980_v31 = vpop.permute.xlu1 %3979 }
 0x7e9   : > { %7260 = vmatmul.mubr.msk.bf16.gmra.mrb[120].mxu0 %vm695_vm0, %v3980_v31 }
 0x7eb   : > { %v8121_v8 = vpop.eup %8120 }
 0x7ec   : > { %v8123_v22 = vpop.eup %8122 }
 0x7f9   : > { %3497 = vmax.xlane.f32.xlu0 %v9840_v13 }
 0x7fc   : > { %v7101_v11 = vpop.f32.mrb[80].mxu1 }
 0x7fd   : > { %v3002_v14 = vpop.f32.mrb[81].mxu1  ;;  %v3083_v0 = vmul.f32 %v8109_v56, %v7101_v11  ;;  %v8125_v11 = vpop.eup %8124 }
 0x7fe   : > { %v3081_v54 = vmul.f32 %v8105_v19, %v3002_v14  ;;  %v7102_v9 = vpop.f32.mrb[82].mxu1 }
 0x7ff   : > { %v3005_v3 = vpop.f32.mrb[83].mxu1  ;;  %v3084_v39 = vmul.f32 %v8111_v10, %v7102_v9 }
 0x800   : > { %v3082_v15 = vmul.f32 %v8107_v52, %v3005_v3  ;;  %7119 = vmatprep.mubr.msk.f32.mxu1 %vm695_vm0, %v3081_v54 }
 0x802   : > { %7120 = vmatmul.mubr.msk.f32.vlgmr.msra.gmra.mrb[32].mxu1 %vm695_vm0, %v3082_v15 }
 0x803   : > { %7122 = vmatprep.mubr.msk.f32.mxu1 %vm695_vm0, %v3083_v0 }
 0x804   : > { %v7105_v34 = vpop.f32.mrb[84].mxu1 }
 0x805   : > { %v3018_v4 = vpop.f32.mrb[85].mxu1  ;;  %v3087_v37 = vmul.f32 %v8117_v63, %v7105_v34 }
 0x806   : > { %v3085_v45 = vmul.f32 %v8113_v2, %v3018_v4  ;;  %v7106_v35 = vpop.f32.mrb[86].mxu1  ;;  %7123 = vmatmul.mubr.msk.f32.gmra.mrb[34].mxu1 %vm695_vm0, %v3084_v39 }
 0x807   : > { %v3021_v16 = vpop.f32.mrb[87].mxu1  ;;  %v3088_v7 = vmul.f32 %v8119_v1, %v7106_v35 }
 0x808   : > { %v3086_v20 = vmul.f32 %v8115_v53, %v3021_v16  ;;  %7125 = vmatprep.mubr.msk.f32.mxu1 %vm695_vm0, %v3085_v45 }
 0x80a   : > { %3499 = vmax.xlane.f32.xlu1 %v9844_v38  ;;  %7126 = vmatmul.mubr.msk.f32.gmra.mrb[36].mxu1 %vm695_vm0, %v3086_v20 }
 0x80b   : > { %7128 = vmatprep.mubr.msk.f32.mxu1 %vm695_vm0, %v3087_v37 }
 0x80c   : > { %v7109_v6 = vpop.f32.mrb[88].mxu1 }
 0x80d   : > { %v3034_v60 = vpop.f32.mrb[89].mxu1  ;;  %v3091_v54 = vmul.f32 %v8125_v11, %v7109_v6 }
 0x80e   : > { %v3089_v26 = vmul.f32 %v8121_v8, %v3034_v60  ;;  %3501 = vmax.xlane.f32.xlu1 %v9878_v32  ;;  %v7110_v46 = vpop.f32.mrb[90].mxu1  ;;  %7129 = vmatmul.mubr.msk.f32.gmra.mrb[38].mxu1 %vm695_vm0, %v3088_v7 }
 0x80f   : > { %v3037_v31 = vpop.f32.mrb[91].mxu1  ;;  %3611 = vrot.lane.b32.xlu0 %v8857_v49, %s8561_s8 }
 0x810   : > { %v3090_v19 = vmul.f32 %v8123_v22, %v3037_v31  ;;  %7131 = vmatprep.mubr.msk.f32.mxu1 %vm695_vm0, %v3089_v26  ;;  %v2927_v14 = vpop.xlane.xlu0 %2926 }
 0x811   : > { %8126 = vrcp.f32 %v2927_v14 }
 0x812   : > { %7132 = vmatmul.mubr.msk.f32.gmra.mrb[40].mxu1 %vm695_vm0, %v3090_v19 }
 0x813   : > { %7134 = vmatprep.mubr.msk.f32.mxu1 %vm695_vm0, %v3091_v54 }
 0x814   : > { %v2931_v9 = vpop.xlane.xlu0 %2930 }
 0x815   : > { %8128 = vrcp.f32 %v2931_v9 }
 0x816   : > { %v7113_v52 = vpop.f32.mrb[92].mxu1 }
 0x817   : > { %v3050_v3 = vpop.f32.mrb[93].mxu1 }
 0x818   : > { %v7114_v56 = vpop.f32.mrb[94].mxu1  ;;  %v3982_v15 = vpop.permute.xlu0 %3981 }
 0x819   : > { %v2929_v0 = vpop.xlane.xlu1 %2928  ;;  %v3053_v10 = vpop.f32.mrb[95].mxu1  ;;  %7263 = vmatprep.mubr.msk.bf16.mxu0 %vm695_vm0, %v3982_v15 }
 0x81a   : > { %8130 = vrcp.f32 %v2929_v0 }
 0x81b   : > { %v8127_v39 = vpop.eup %8126 }
 0x81c   : > { %v3984_v34 = vpop.permute.xlu0 %3983  ;;  %v3092_v2 = vmul.f32 %v8127_v39, %v7110_v46 }
 0x81d   : > { %v2933_v4 = vpop.xlane.xlu1 %2932  ;;  %7264 = vmatmul.mubr.msk.bf16.gmra.mrb[124].mxu0 %vm695_vm0, %v3984_v34 }
 0x81e   : > { %8132 = vrcp.f32 %v2933_v4  ;;  %7135 = vmatmul.mubr.msk.f32.gmra.mrb[42].mxu1 %vm695_vm0, %v3092_v2 }
 0x81f   : > { %3613 = vrot.lane.b32.xlu1 %v8868_v55, %s8561_s8  ;;  %v8129_v35 = vpop.eup %8128 }
 0x820   : > { %v3094_v20 = vmul.f32 %v8129_v35, %v3053_v10 }
 0x821   : > { %v3486_v45 = vpop.xlane.xlu1 %3485 }
 0x822   : > { %v3517_v8 = vsub.f32 %v9813_v30, %v3486_v45 }
 0x824   : > { %v8131_v53 = vpop.eup %8130  ;;  %v3533_v46 = vmul.f32 1.442695, %v3517_v8 }
 0x825   : > { %v3488_v16 = vpop.xlane.xlu1 %3487  ;;  %v3093_v63 = vmul.f32 %v8131_v53, %v3050_v3 }
 0x826   : > { %v3518_v6 = vsub.f32 %v9817_v18, %v3488_v16 }
 0x827   : > { %7137 = vmatprep.mubr.msk.f32.mxu1 %vm695_vm0, %v3093_v63 }
 0x828   : > { %v8133_v37 = vpop.eup %8132  ;;  %7138 = vmatmul.mubr.msk.f32.gmra.mrb[44].mxu1 %vm695_vm0, %v3094_v20  ;;  %v3535_v60 = vmul.f32 1.442695, %v3518_v6  ;;  %v10827_v6 = vld [vmem:[#allocation22_spill] sm:$0xff] }
 0x829   : > { %v3606_v1 = vpop.permute.xlu1 %3605  ;;  %v3095_v7 = vmul.f32 %v8133_v37, %v7113_v52 }
 0x82a   : > { %7175 = vmatprep.subr.bf16.mxu1 %v3606_v1  ;;  %8134 = vpow2.f32 %v3535_v60  ;;  %v10828_v60 = vld [vmem:[#allocation28_spill] sm:$0xff] }
 0x82b   : > { %7140 = vmatprep.mubr.msk.f32.mxu1 %vm695_vm0, %v3095_v7  ;;  %7176 = vmatpush3.bf16.msra.mxu1 %v3606_v1  ;;  %v10825_v1 = vld [vmem:[#allocation20_spill] sm:$0xff] }
 0x82c   : > { %v10826_v7 = vld [vmem:[#allocation24_spill] sm:$0xff] }
 0x82e   : > { %3503 = vmax.xlane.f32.xlu0 %v9882_v29 }
 0x832   : > { %3507 = vmax.xlane.f32.xlu0 %v9880_v44 }
 0x834   : > { %v10018_v14 = vpop.eup %8134 }
 0x843   : > { %3505 = vmax.xlane.f32.xlu1 %v9875_v28 }
 0x847   : > { %3509 = vmax.xlane.f32.xlu1 %v9900_v61 }
 0x848   : > { %3615 = vrot.lane.b32.xlu0 %v8880_v62, %s8561_s8 }
 0x84a   : > { %v10008_v26 = vpop.f32.mrb[112].mxu0 }
 0x84b   : > { %v10010_v22 = vpop.f32.mrb[113].mxu0 }
 0x84c   : > { %v10012_v31 = vpop.f32.mrb[114].mxu0 }
 0x84d   : > { %v10014_v11 = vpop.f32.mrb[115].mxu0  ;;  %v2935_v19 = vpop.xlane.xlu0 %2934 }
 0x84e   : > { %8136 = vrcp.f32 %v2935_v19 }
 0x84f   : > { %8138 = vpow2.f32 %v3533_v46  ;;  %v10829_v46 = vld [vmem:[#allocation26_spill] sm:$0xff] }
 0x851   : > { %v10016_v30 = vpop.xlane.xlu0 %3491 }
 0x855   : > { %v3608_v18 = vpop.permute.xlu0 %3607 }
 0x856   : > { %7177 = vmatprep.subr.bf16.mxu1 %v3608_v18 }
 0x857   : > { %7178 = vmatpush3.bf16.msra.mxu1 %v3608_v18 }
 0x858   : > { %v8137_v54 = vpop.eup %8136  ;;  %3617 = vrot.lane.b32.xlu1 %v8892_v5, %s8561_s8 }
 0x859   : > { %v8139_v9 = vpop.eup %8138  ;;  %v3096_v52 = vmul.f32 %v8137_v54, %v7114_v56 }
 0x85a   : > { %v3490_v3 = vpop.xlane.xlu1 %3489  ;;  %v3597_v15 = vpack.c.bf16 %v10018_v14, %v8139_v9 }
 0x85b   : > { %7141 = vmatmul.mubr.msk.f32.gmra.mrb[46].mxu1 %vm695_vm0, %v3096_v52 }
 0x85c   : > { %7191 = vmatprep.mubr.bf16.mxu1 %v3597_v15 }
 0x85e   : > { %v3494_v0 = vpop.xlane.xlu1 %3493 }
 0x85f   : > { %v3521_v10 = vsub.f32 %v9842_v43, %v3494_v0 }
 0x861   : > { %v3541_v39 = vmul.f32 1.442695, %v3521_v10 }
 0x862   : > { %v3496_v34 = vpop.xlane.xlu1 %3495 }
 0x863   : > { %v3522_v2 = vsub.f32 %v9848_v41, %v3496_v34  ;;  %8140 = vpow2.f32 %v3541_v39  ;;  %v3519_v34 = vsub.f32 %v9811_v17, %v3490_v3 }
 0x865   : > { %v3543_v4 = vmul.f32 1.442695, %v3522_v2  ;;  %v3537_v2 = vmul.f32 1.442695, %v3519_v34 }
 0x866   : > { %v3610_v45 = vpop.permute.xlu1 %3609 }
 0x867   : > { %8142 = vpow2.f32 %v3543_v4  ;;  %7179 = vmatprep.subr.bf16.mxu1 %v3610_v45  ;;  %3511 = vmax.xlane.f32.xlu0 %v9904_v24 }
 0x868   : > { %7180 = vmatpush3.bf16.msra.mxu1 %v3610_v45 }
 0x86b   : > { %3515 = vmax.xlane.f32.xlu0 %v9902_v50 }
 0x86d   : > { %v10028_v56 = vpop.eup %8140 }
 0x871   : > { %v10030_v35 = vpop.eup %8142 }
 0x87c   : > { %3513 = vmax.xlane.f32.xlu1 %v9897_v48 }
 0x881   : > { %3619 = vrot.lane.b32.xlu0 %v8904_v12, %s8561_s8 }
 0x883   : > { %v10037_v41 = vpop.f32.mrb[116].mxu0 }
 0x884   : > { %v10039_v53 = vpop.f32.mrb[117].mxu0 }
 0x885   : > { %v10041_v16 = vpop.f32.mrb[118].mxu0  ;;  %4648 = vrot.lane.b32.xlu0 %v8852_v47, %s8563_s6 }
 0x886   : > { %v10045_v63 = vpop.f32.mrb[119].mxu0  ;;  %v3498_v20 = vpop.xlane.xlu0 %3497 }
 0x887   : > { %v3523_v8 = vsub.f32 %v9840_v13, %v3498_v20 }
 0x889   : > { %4650 = vrot.lane.b32.xlu0 %v10795_v33, %s8563_s6  ;;  %v3545_v19 = vmul.f32 1.442695, %v3523_v8 }
 0x88a   : > { %v3612_v37 = vpop.permute.xlu0 %3611 }
 0x88b   : > { %7181 = vmatprep.subr.bf16.mxu1 %v3612_v37  ;;  %8144 = vpow2.f32 %v3545_v19 }
 0x88c   : > { %7182 = vmatpush3.bf16.msra.mxu1 %v3612_v37 }
 0x88d   : > { %4646 = vrot.lane.b32.xlu1 %v10796_v25, %s8563_s6  ;;  %4652 = vrot.lane.b32.xlu0 %v10825_v1, %s8563_s6  ;;  %v10832_v1 = vpack.c.bf16 %v10030_v35, %v10028_v56 }
 0x891   : > { %4656 = vrot.lane.b32.xlu1 %v10826_v7, %s8563_s6  ;;  %4654 = vrot.lane.b32.xlu0 %v10827_v6, %s8563_s6 }
 0x895   : > { %4660 = vrot.lane.b32.xlu1 %v10828_v60, %s8563_s6  ;;  %4658 = vrot.lane.b32.xlu0 %v10829_v46, %s8563_s6  ;;  %v10063_v10 = vpop.eup %8144 }
 0x897   : > { %v3500_v18 = vpop.xlane.xlu1 %3499 }
 0x898   : > { %v3524_v54 = vsub.f32 %v9844_v38, %v3500_v18 }
 0x89a   : > { %v3547_v52 = vmul.f32 1.442695, %v3524_v54 }
 0x89b   : > { %v3502_v15 = vpop.xlane.xlu1 %3501 }
 0x89c   : > { %8146 = vpow2.f32 %v3547_v52  ;;  %v3525_v38 = vsub.f32 %v9878_v32, %v3502_v15  ;;  %v10831_v15 = vld [vmem:[#allocation16_spill] sm:$0xff] }
 0x89d   : > { %8148 = vpow2.f32 %v3537_v2  ;;  %v3520_v2 = vsub.f32 %v9815_v58, %v10016_v30 }
 0x89e   : > { %v3549_v4 = vmul.f32 1.442695, %v3525_v38 }
 0x89f   : > { %v3614_v0 = vpop.permute.xlu1 %3613 }
 0x8a0   : > { %7183 = vmatprep.subr.bf16.mxu1 %v3614_v0  ;;  %8150 = vpow2.f32 %v3549_v4  ;;  %v3539_v4 = vmul.f32 1.442695, %v3520_v2 }
 0x8a1   : > { %7184 = vmatpush3.bf16.msra.mxu1 %v3614_v0 }
 0x8a6   : > { %v10065_v13 = vpop.eup %8146 }
 0x8a7   : > { %v8149_v20 = vpop.eup %8148 }
 0x8b4   : > { %3565 = vadd.xlane.f32.xlu0 %v8139_v9 }
 0x8b9   : > { %3567 = vadd.xlane.f32.xlu1 %v10018_v14  ;;  %v10081_v14 = vpop.eup %8150 }
 0x8bb   : > { %v3504_v45 = vpop.xlane.xlu0 %3503 }
 0x8bc   : > { %v3526_v37 = vsub.f32 %v9882_v29, %v3504_v45  ;;  %v10073_v8 = vpop.f32.mrb[120].mxu0  ;;  %v10830_v29 = vld [vmem:[#allocation14_spill] sm:$0xff] }
 0x8bd   : > { %3569 = vadd.xlane.f32.xlu1 %v8149_v20  ;;  %v10075_v19 = vpop.f32.mrb[121].mxu0 }
 0x8be   : > { %v3551_v18 = vmul.f32 1.442695, %v3526_v37  ;;  %v10077_v54 = vpop.f32.mrb[122].mxu0 }
 0x8bf   : > { %v10079_v17 = vpop.f32.mrb[123].mxu0  ;;  %v3508_v9 = vpop.xlane.xlu0 %3507 }
 0x8c0   : > { %8152 = vpow2.f32 %v3551_v18 }
 0x8c1   : > { %8154 = vpow2.f32 %v3539_v4  ;;  %v3528_v4 = vsub.f32 %v9880_v44, %v3508_v9 }
 0x8c3   : > { %v3616_v32 = vpop.permute.xlu0 %3615  ;;  %v3555_v6 = vmul.f32 1.442695, %v3528_v4 }
 0x8c4   : > { %7185 = vmatprep.subr.bf16.mxu1 %v3616_v32 }
 0x8c5   : > { %7186 = vmatpush3.bf16.msra.mxu1 %v3616_v32 }
 0x8ca   : > { %v10083_v3 = vpop.eup %8152  ;;  %4630 = vrot.lane.b32.xlu0 %v10830_v29, %s8563_s6 }
 0x8cb   : > { %v3601_v52 = vpack.c.bf16 %v10083_v3, %v10081_v14  ;;  %v8155_v45 = vpop.eup %8154 }
 0x8cc   : > { %v3598_v60 = vpack.c.bf16 %v8155_v45, %v8149_v20 }
 0x8ce   : > { %4632 = vrot.lane.b32.xlu1 %v10831_v15, %s8563_s6 }
 0x8d0   : > { %v3506_v0 = vpop.xlane.xlu1 %3505 }
 0x8d1   : > { %v3527_v2 = vsub.f32 %v9875_v28, %v3506_v0 }
 0x8d3   : > { %v3553_v29 = vmul.f32 1.442695, %v3527_v2 }
 0x8d4   : > { %v3510_v34 = vpop.xlane.xlu1 %3509 }
 0x8d5   : > { %v3529_v15 = vsub.f32 %v9900_v61, %v3510_v34  ;;  %8156 = vpow2.f32 %v3553_v29  ;;  %v10833_v61 = vpack.c.bf16 %v10065_v13, %v10063_v10 }
 0x8d7   : > { %v3557_v7 = vmul.f32 1.442695, %v3529_v15 }
 0x8d8   : > { %v3618_v38 = vpop.permute.xlu1 %3617 }
 0x8d9   : > { %7187 = vmatprep.subr.bf16.mxu1 %v3618_v38 }
 0x8da   : > { %7188 = vmatpush3.bf16.msra.mxu1 %v3618_v38 }
 0x8e9   : > { %3571 = vadd.xlane.f32.xlu0 %v8155_v45 }
 0x8ed   : > { %3575 = vadd.xlane.f32.xlu0 %v10030_v35  ;;  %v8157_v35 = vpop.eup %8156 }
 0x8f0   : > { %v10094_v37 = vpop.f32.mrb[124].mxu0 }
 0x8f1   : > { %v10096_v18 = vpop.f32.mrb[125].mxu0 }
 0x8f2   : > { %3573 = vadd.xlane.f32.xlu1 %v10028_v56  ;;  %v10099_v32 = vpop.f32.mrb[126].mxu0 }
 0x8f3   : > { %v10101_v39 = vpop.f32.mrb[127].mxu0 }
 0x8f4   : > { %v3512_v58 = vpop.xlane.xlu0 %3511 }
 0x8f5   : > { %v3530_v38 = vsub.f32 %v9904_v24, %v3512_v58 }
 0x8f6   : > { %3577 = vadd.xlane.f32.xlu1 %v10063_v10 }
 0x8f7   : > { %v3559_v46 = vmul.f32 1.442695, %v3530_v38 }
 0x8f8   : > { %v3516_v30 = vpop.xlane.xlu0 %3515 }
 0x8f9   : > { %8158 = vpow2.f32 %v3559_v46  ;;  %v3532_v24 = vsub.f32 %v9902_v50, %v3516_v30 }
 0x8fa   : > { %8160 = vpow2.f32 %v3555_v6 }
 0x8fb   : > { %8162 = vpow2.f32 %v3557_v7  ;;  %v3563_v28 = vmul.f32 1.442695, %v3532_v24 }
 0x8fc   : > { %v3620_v43 = vpop.permute.xlu0 %3619 }
 0x8fd   : > { %7189 = vmatprep.subr.bf16.mxu1 %v3620_v43  ;;  %8164 = vpow2.f32 %v3563_v28 }
 0x8fe   : > { %7190 = vmatpush3.bf16.msra.mxu1 %v3620_v43 }
 0x900   : > { %v4649_v46 = vpop.permute.xlu0 %4648 }
 0x901   : > { %7192 = vmatmul.mubr.bf16.vlgmr.msra.gmra.mrb[96].mxu1 %v3598_v60  ;;  %v4690_v20 = vsel %vm695_vm0, %v4649_v46, 0 }
 0x902   : > { %7195 = vmatprep.mubr.bf16.mxu1 %v10832_v1 }
 0x903   : > { %4634 = vrot.lane.b32.xlu0 %v10804_v23, %s8563_s6  ;;  %v10120_v1 = vpop.eup %8158 }
 0x904   : > { %v8161_v6 = vpop.eup %8160  ;;  %v4651_v29 = vpop.permute.xlu0 %4650 }
 0x905   : > { %v8163_v60 = vpop.eup %8162  ;;  %v3602_v10 = vpack.c.bf16 %v8161_v6, %v8157_v35  ;;  %v4693_v0 = vsel %vm695_vm0, %v4651_v29, 0 }
 0x907   : > { %4636 = vrot.lane.b32.xlu1 %v10805_v21, %s8563_s6  ;;  %v10127_v9 = vpop.eup %8164 }
 0x908   : > { %v4653_v34 = vpop.permute.xlu0 %4652 }
 0x909   : > { %v3514_v44 = vpop.xlane.xlu1 %3513  ;;  %7196 = vmatmul.mubr.bf16.gmra.mrb[100].mxu1 %v10833_v61  ;;  %v4696_v45 = vsel %vm695_vm0, %v4653_v34, 0 }
 0x90a   : > { %v3531_v56 = vsub.f32 %v9897_v48, %v3514_v44  ;;  %7199 = vmatprep.mubr.bf16.mxu1 %v3601_v52  ;;  %v3603_v48 = vpack.c.bf16 %v10120_v1, %v8163_v60 }
 0x90c   : > { %v3561_v43 = vmul.f32 1.442695, %v3531_v56  ;;  %v4655_v58 = vpop.permute.xlu0 %4654 }
 0x90d   : > { %v4647_v7 = vpop.permute.xlu1 %4646  ;;  %v4699_v30 = vsel %vm695_vm0, %v4655_v58, 0 }
 0x90e   : > { %8166 = vpow2.f32 %v3561_v43  ;;  %7783 = vmatprep.subr.msk.bf16.mxu0 %vm695_vm0, %v4647_v7  ;;  %v4687_v50 = vsel %vm695_vm0, %v4647_v7, 0  ;;  %v3759_v43 = vld [vmem:[#allocation8 + $0x48] sm:$0xff] }
 0x90f   : > { %7328 = vmatpush3.bf16.xpose.msra.mxu0 %v4687_v50 }
 0x910   : > { %7784 = vmatprep.subr.msk.bf16.mxu0 %vm695_vm0, %v4649_v46 }
 0x911   : > { %7200 = vmatmul.mubr.bf16.gmra.mrb[104].mxu1 %v3602_v10  ;;  %v4657_v2 = vpop.permute.xlu1 %4656 }
 0x912   : > { %7203 = vmatprep.mubr.bf16.mxu1 %v3603_v48  ;;  %v4702_v38 = vsel %vm695_vm0, %v4657_v2, 0 }
 0x915   : > { %v4661_v4 = vpop.permute.xlu1 %4660 }
 0x916   : > { %v4708_v44 = vsel %vm695_vm0, %v4661_v4, 0 }
 0x917   : > { %7330 = vmatpush3.bf16.xpose.msra.mxu0 %v4690_v20 }
 0x918   : > { %v8167_v52 = vpop.eup %8166  ;;  %7785 = vmatprep.subr.msk.bf16.mxu0 %vm695_vm0, %v4651_v29 }
 0x919   : > { %v3604_v15 = vpack.c.bf16 %v10127_v9, %v8167_v52 }
 0x91b   : > { %7204 = vmatmul.mubr.bf16.gmra.mrb[108].mxu1 %v3604_v15 }
 0x91f   : > { %7332 = vmatpush3.bf16.xpose.msra.mxu0 %v4693_v0 }
 0x920   : > { %7786 = vmatprep.subr.msk.bf16.mxu0 %vm695_vm0, %v4653_v34 }
 0x922   : > { %3579 = vadd.xlane.f32.xlu0 %v10065_v13  ;;  %v4659_v13 = vpop.permute.xlu0 %4658 }
 0x926   : > { %3583 = vadd.xlane.f32.xlu0 %v10083_v3  ;;  %v4705_v3 = vsel %vm695_vm0, %v4659_v13, 0 }
 0x927   : > { %7334 = vmatpush3.bf16.xpose.msra.mxu0 %v4696_v45 }
 0x928   : > { %7787 = vmatprep.subr.msk.bf16.mxu0 %vm695_vm0, %v4655_v58 }
 0x92b   : > { %3581 = vadd.xlane.f32.xlu1 %v10081_v14 }
 0x92f   : > { %3585 = vadd.xlane.f32.xlu1 %v8157_v35  ;;  %7336 = vmatpush3.bf16.xpose.msra.mxu0 %v4699_v30  ;;  %v3758_v35 = vld [vmem:[#allocation8 + $0x40] sm:$0xff] }
 0x930   : > { %7788 = vmatprep.subr.msk.bf16.mxu0 %vm695_vm0, %v4657_v2  ;;  %v7591_v7 = vpack.c.bf16 %v3759_v43, %v3758_v35 }
 0x932   : > { %7592 = vmatprep.subr.bf16.mxu1 %v7591_v7 }
 0x933   : > { %7594 = vmatpush3.bf16.msra.mxu1 %v7591_v7 }
 0x937   : > { %7338 = vmatpush3.bf16.xpose.msra.mxu0 %v4702_v38 }
 0x938   : > { %7789 = vmatprep.subr.msk.bf16.mxu0 %vm695_vm0, %v4659_v13 }
 0x93c   : > { %4638 = vrot.lane.b32.xlu0 %v10806_v27, %s8563_s6 }
 0x93f   : > { %7340 = vmatpush3.bf16.xpose.msra.mxu0 %v4705_v3 }
 0x940   : > { %4640 = vrot.lane.b32.xlu1 %v10807_v59, %s8563_s6  ;;  %7790 = vmatprep.subr.msk.bf16.mxu0 %vm695_vm0, %v4661_v4 }
 0x941   : > { %v3566_v14 = vpop.xlane.xlu0 %3565 }
 0x942   : > { %8168 = vrcp.f32 %v3566_v14 }
 0x945   : > { %v4631_v24 = vpop.permute.xlu0 %4630 }
 0x946   : > { %v3568_v28 = vpop.xlane.xlu1 %3567  ;;  %7343 = vmatprep.mubr.msk.bf16.mxu0 %vm695_vm0, %v4631_v24 }
 0x947   : > { %7342 = vmatpush3.bf16.xpose.msra.mxu0 %v4708_v44  ;;  %8170 = vrcp.f32 %v3568_v28 }
 0x94a   : > { %v3570_v61 = vpop.xlane.xlu1 %3569 }
 0x94b   : > { %8172 = vrcp.f32 %v3570_v61 }
 0x94c   : > { %v8169_v34 = vpop.eup %8168 }
 0x94e   : > { %v4633_v56 = vpop.permute.xlu1 %4632 }
 0x94f   : > { %7344 = vmatmul.mubr.msk.bf16.vlgmr.msra.gmra.mrb[128].mxu0 %vm695_vm0, %v4633_v56 }
 0x951   : > { %v8171_v2 = vpop.eup %8170 }
 0x955   : > { %v8173_v13 = vpop.eup %8172 }
 0x95b   : > { %3587 = vadd.xlane.f32.xlu0 %v8161_v6 }
 0x95f   : > { %3591 = vadd.xlane.f32.xlu0 %v10120_v1 }
 0x964   : > { %3589 = vadd.xlane.f32.xlu1 %v8163_v60 }
 0x968   : > { %3593 = vadd.xlane.f32.xlu1 %v8167_v52 }
 0x96c   : > { %4146 = vmax.xlane.f32.xlu1 %v10010_v22 }
 0x970   : > { %4148 = vmax.xlane.f32.xlu1 %v10014_v11 }
 0x975   : > { %4642 = vrot.lane.b32.xlu0 %v10810_v57, %s8563_s6 }
 0x976   : > { %v3572_v50 = vpop.xlane.xlu0 %3571 }
 0x977   : > { %8174 = vrcp.f32 %v3572_v50 }
 0x979   : > { %4644 = vrot.lane.b32.xlu0 %v10811_v40, %s8563_s6 }
 0x97a   : > { %v3576_v46 = vpop.xlane.xlu0 %3575 }
 0x97e   : > { %v4635_v10 = vpop.permute.xlu0 %4634 }
 0x97f   : > { %v3574_v48 = vpop.xlane.xlu1 %3573  ;;  %7347 = vmatprep.mubr.msk.bf16.mxu0 %vm695_vm0, %v4635_v10 }
 0x980   : > { %8176 = vrcp.f32 %v3574_v48 }
 0x981   : > { %4266 = vrot.lane.b32.xlu1 %v10812_v51, %s8562_s30  ;;  %8178 = vrcp.f32 %v3576_v46  ;;  %v8175_v14 = vpop.eup %8174 }
 0x983   : > { %v3578_v1 = vpop.xlane.xlu1 %3577 }
 0x984   : > { %8180 = vrcp.f32 %v3578_v1 }
 0x987   : > { %v4637_v6 = vpop.permute.xlu1 %4636 }
 0x988   : > { %7348 = vmatmul.mubr.msk.bf16.gmra.mrb[132].mxu0 %vm695_vm0, %v4637_v6 }
 0x98a   : > { %v8177_v44 = vpop.eup %8176 }
 0x98b   : > { %v8179_v43 = vpop.eup %8178 }
 0x98e   : > { %v8181_v50 = vpop.eup %8180 }
 0x998   : > { %3595 = vadd.xlane.f32.xlu0 %v10127_v9 }
 0x99c   : > { %4152 = vmax.xlane.f32.xlu0 %v10012_v31 }
 0x9a5   : > { %4150 = vmax.xlane.f32.xlu1 %v10008_v26 }
 0x9a9   : > { %4154 = vmax.xlane.f32.xlu1 %v10039_v53 }
 0x9ad   : > { %4156 = vmax.xlane.f32.xlu1 %v10045_v63 }
 0x9af   : > { %v3580_v60 = vpop.xlane.xlu0 %3579 }
 0x9b0   : > { %8182 = vrcp.f32 %v3580_v60 }
 0x9b2   : > { %4268 = vrot.lane.b32.xlu0 %v8829_v36, %s8562_s30 }
 0x9b3   : > { %v3584_v20 = vpop.xlane.xlu0 %3583 }
 0x9b7   : > { %v4639_v29 = vpop.permute.xlu0 %4638 }
 0x9b8   : > { %v3582_v52 = vpop.xlane.xlu1 %3581  ;;  %7351 = vmatprep.mubr.msk.bf16.mxu0 %vm695_vm0, %v4639_v29 }
 0x9b9   : > { %8184 = vrcp.f32 %v3582_v52 }
 0x9ba   : > { %8186 = vrcp.f32 %v3584_v20  ;;  %v8183_v48 = vpop.eup %8182 }
 0x9bc   : > { %v3586_v15 = vpop.xlane.xlu1 %3585 }
 0x9bd   : > { %8188 = vrcp.f32 %v3586_v15 }
 0x9be   : > { %4270 = vrot.lane.b32.xlu1 %v8842_v42, %s8562_s30 }
 0x9c0   : > { %v4641_v9 = vpop.permute.xlu1 %4640 }
 0x9c1   : > { %7352 = vmatmul.mubr.msk.bf16.gmra.mrb[136].mxu0 %vm695_vm0, %v4641_v9 }
 0x9c3   : > { %v8185_v60 = vpop.eup %8184 }
 0x9c4   : > { %v8187_v15 = vpop.eup %8186 }
 0x9d1   : > { %4158 = vmax.xlane.f32.xlu0 %v10037_v41 }
 0x9d4   : > { %v7193_v0 = vpop.f32.mrb[96].mxu1 }
 0x9d5   : > { %v3663_v45 = vpop.f32.mrb[97].mxu1  ;;  %v3744_v4 = vmul.f32 %v8173_v13, %v7193_v0  ;;  %v8189_v0 = vpop.eup %8188 }
 0x9d6   : > { %v3742_v58 = vmul.f32 %v8169_v34, %v3663_v45  ;;  %v7194_v30 = vpop.f32.mrb[98].mxu1 }
 0x9d7   : > { %v3666_v38 = vpop.f32.mrb[99].mxu1  ;;  %v3745_v24 = vmul.f32 %v8175_v14, %v7194_v30 }
 0x9d8   : > { %v3743_v3 = vmul.f32 %v8171_v2, %v3666_v38  ;;  %7211 = vmatprep.mubr.msk.f32.mxu1 %vm695_vm0, %v3742_v58 }
 0x9da   : > { %7212 = vmatmul.mubr.msk.f32.vlgmr.msra.gmra.mrb[32].mxu1 %vm695_vm0, %v3743_v3 }
 0x9db   : > { %7214 = vmatprep.mubr.msk.f32.mxu1 %vm695_vm0, %v3744_v4 }
 0x9dc   : > { %v7197_v28 = vpop.f32.mrb[100].mxu1 }
 0x9dd   : > { %v3679_v61 = vpop.f32.mrb[101].mxu1  ;;  %v3748_v10 = vmul.f32 %v8181_v50, %v7197_v28 }
 0x9de   : > { %v3746_v56 = vmul.f32 %v8177_v44, %v3679_v61  ;;  %v7198_v35 = vpop.f32.mrb[102].mxu1  ;;  %7215 = vmatmul.mubr.msk.f32.gmra.mrb[34].mxu1 %vm695_vm0, %v3745_v24 }
 0x9df   : > { %v3682_v7 = vpop.f32.mrb[103].mxu1  ;;  %v3749_v1 = vmul.f32 %v8183_v48, %v7198_v35 }
 0x9e0   : > { %v3747_v46 = vmul.f32 %v8179_v43, %v3682_v7  ;;  %7217 = vmatprep.mubr.msk.f32.mxu1 %vm695_vm0, %v3746_v56 }
 0x9e2   : > { %4160 = vmax.xlane.f32.xlu1 %v10041_v16  ;;  %7218 = vmatmul.mubr.msk.f32.gmra.mrb[36].mxu1 %vm695_vm0, %v3747_v46 }
 0x9e3   : > { %7220 = vmatprep.mubr.msk.f32.mxu1 %vm695_vm0, %v3748_v10 }
 0x9e4   : > { %v7201_v6 = vpop.f32.mrb[104].mxu1 }
 0x9e5   : > { %v3695_v20 = vpop.f32.mrb[105].mxu1  ;;  %v3752_v58 = vmul.f32 %v8189_v0, %v7201_v6 }
 0x9e6   : > { %v3750_v29 = vmul.f32 %v8185_v60, %v3695_v20  ;;  %4162 = vmax.xlane.f32.xlu1 %v10075_v19  ;;  %v7202_v52 = vpop.f32.mrb[106].mxu1  ;;  %7221 = vmatmul.mubr.msk.f32.gmra.mrb[38].mxu1 %vm695_vm0, %v3749_v1 }
 0x9e7   : > { %v3698_v9 = vpop.f32.mrb[107].mxu1  ;;  %4272 = vrot.lane.b32.xlu0 %v8857_v49, %s8562_s30 }
 0x9e8   : > { %v3751_v34 = vmul.f32 %v8187_v15, %v3698_v9  ;;  %7223 = vmatprep.mubr.msk.f32.mxu1 %vm695_vm0, %v3750_v29  ;;  %v3588_v45 = vpop.xlane.xlu0 %3587 }
 0x9e9   : > { %8190 = vrcp.f32 %v3588_v45 }
 0x9ea   : > { %7224 = vmatmul.mubr.msk.f32.gmra.mrb[40].mxu1 %vm695_vm0, %v3751_v34 }
 0x9eb   : > { %7226 = vmatprep.mubr.msk.f32.mxu1 %vm695_vm0, %v3752_v58 }
 0x9ec   : > { %v3592_v30 = vpop.xlane.xlu0 %3591 }
 0x9ed   : > { %8192 = vrcp.f32 %v3592_v30 }
 0x9ee   : > { %v7205_v2 = vpop.f32.mrb[108].mxu1 }
 0x9ef   : > { %v3711_v38 = vpop.f32.mrb[109].mxu1 }
 0x9f0   : > { %v7206_v13 = vpop.f32.mrb[110].mxu1  ;;  %v4643_v3 = vpop.permute.xlu0 %4642 }
 0x9f1   : > { %v3590_v4 = vpop.xlane.xlu1 %3589  ;;  %v3714_v14 = vpop.f32.mrb[111].mxu1  ;;  %7355 = vmatprep.mubr.msk.bf16.mxu0 %vm695_vm0, %v4643_v3 }
 0x9f2   : > { %8194 = vrcp.f32 %v3590_v4 }
 0x9f3   : > { %v8191_v24 = vpop.eup %8190 }
 0x9f4   : > { %v4645_v28 = vpop.permute.xlu0 %4644  ;;  %v3753_v44 = vmul.f32 %v8191_v24, %v7202_v52 }
 0x9f5   : > { %v3594_v61 = vpop.xlane.xlu1 %3593  ;;  %7356 = vmatmul.mubr.msk.bf16.gmra.mrb[140].mxu0 %vm695_vm0, %v4645_v28 }
 0x9f6   : > { %8196 = vrcp.f32 %v3594_v61  ;;  %7227 = vmatmul.mubr.msk.f32.gmra.mrb[42].mxu1 %vm695_vm0, %v3753_v44 }
 0x9f7   : > { %4274 = vrot.lane.b32.xlu1 %v8868_v55, %s8562_s30  ;;  %v8193_v35 = vpop.eup %8192 }
 0x9f8   : > { %v3755_v46 = vmul.f32 %v8193_v35, %v3714_v14 }
 0x9f9   : > { %v4147_v56 = vpop.xlane.xlu1 %4146 }
 0x9fa   : > { %v4178_v60 = vsub.f32 %v10010_v22, %v4147_v56 }
 0x9fc   : > { %v8195_v43 = vpop.eup %8194  ;;  %v4194_v52 = vmul.f32 1.442695, %v4178_v60  ;;  %v10837_v60 = vld [vmem:[#allocation28_spill] sm:$0xff] }
 0x9fd   : > { %v4149_v7 = vpop.xlane.xlu1 %4148  ;;  %v3754_v50 = vmul.f32 %v8195_v43, %v3711_v38 }
 0x9fe   : > { %v4179_v6 = vsub.f32 %v10014_v11, %v4149_v7 }
 0x9ff   : > { %7229 = vmatprep.mubr.msk.f32.mxu1 %vm695_vm0, %v3754_v50 }
 0xa00   : > { %v8197_v10 = vpop.eup %8196  ;;  %7230 = vmatmul.mubr.msk.f32.gmra.mrb[44].mxu1 %vm695_vm0, %v3755_v46  ;;  %v4196_v20 = vmul.f32 1.442695, %v4179_v6 }
 0xa01   : > { %v4267_v48 = vpop.permute.xlu1 %4266  ;;  %v3756_v1 = vmul.f32 %v8197_v10, %v7205_v2 }
 0xa02   : > { %7267 = vmatprep.subr.bf16.mxu1 %v4267_v48  ;;  %8198 = vpow2.f32 %v4196_v20 }
 0xa03   : > { %7232 = vmatprep.mubr.msk.f32.mxu1 %vm695_vm0, %v3756_v1  ;;  %7268 = vmatpush3.bf16.msra.mxu1 %v4267_v48  ;;  %v10834_v48 = vld [vmem:[#allocation20_spill] sm:$0xff] }
 0xa04   : > { %v10835_v1 = vld [vmem:[#allocation24_spill] sm:$0xff] }
 0xa06   : > { %4164 = vmax.xlane.f32.xlu0 %v10079_v17 }
 0xa0a   : > { %4168 = vmax.xlane.f32.xlu0 %v10077_v54 }
 0xa0c   : > { %v10215_v45 = vpop.eup %8198 }
 0xa1b   : > { %4166 = vmax.xlane.f32.xlu1 %v10073_v8 }
 0xa1f   : > { %4170 = vmax.xlane.f32.xlu1 %v10096_v18 }
 0xa20   : > { %4276 = vrot.lane.b32.xlu0 %v8880_v62, %s8562_s30 }
 0xa22   : > { %v10205_v29 = vpop.f32.mrb[128].mxu0 }
 0xa23   : > { %v10207_v15 = vpop.f32.mrb[129].mxu0 }
 0xa24   : > { %v10209_v9 = vpop.f32.mrb[130].mxu0 }
 0xa25   : > { %v10211_v0 = vpop.f32.mrb[131].mxu0  ;;  %v3596_v34 = vpop.xlane.xlu0 %3595 }
 0xa26   : > { %8200 = vrcp.f32 %v3596_v34 }
 0xa27   : > { %8202 = vpow2.f32 %v4194_v52 }
 0xa29   : > { %v10213_v22 = vpop.xlane.xlu0 %4152 }
 0xa2d   : > { %v4269_v11 = vpop.permute.xlu0 %4268 }
 0xa2e   : > { %7269 = vmatprep.subr.bf16.mxu1 %v4269_v11 }
 0xa2f   : > { %7270 = vmatpush3.bf16.msra.mxu1 %v4269_v11 }
 0xa30   : > { %v8201_v58 = vpop.eup %8200  ;;  %4278 = vrot.lane.b32.xlu1 %v8892_v5, %s8562_s30 }
 0xa31   : > { %v8203_v30 = vpop.eup %8202  ;;  %v3757_v2 = vmul.f32 %v8201_v58, %v7206_v13 }
 0xa32   : > { %v4151_v38 = vpop.xlane.xlu1 %4150  ;;  %v4258_v3 = vpack.c.bf16 %v10215_v45, %v8203_v30 }
 0xa33   : > { %7233 = vmatmul.mubr.msk.f32.gmra.mrb[46].mxu1 %vm695_vm0, %v3757_v2 }
 0xa34   : > { %7283 = vmatprep.mubr.bf16.mxu1 %v4258_v3 }
 0xa36   : > { %v4155_v4 = vpop.xlane.xlu1 %4154 }
 0xa37   : > { %v4182_v14 = vsub.f32 %v10039_v53, %v4155_v4  ;;  %v4180_v4 = vsub.f32 %v10008_v26, %v4151_v38 }
 0xa39   : > { %v4202_v24 = vmul.f32 1.442695, %v4182_v14  ;;  %v4198_v14 = vmul.f32 1.442695, %v4180_v4 }
 0xa3a   : > { %v4157_v28 = vpop.xlane.xlu1 %4156 }
 0xa3b   : > { %v4183_v44 = vsub.f32 %v10045_v63, %v4157_v28  ;;  %8204 = vpow2.f32 %v4202_v24 }
 0xa3d   : > { %v4204_v61 = vmul.f32 1.442695, %v4183_v44 }
 0xa3e   : > { %v4271_v56 = vpop.permute.xlu1 %4270 }
 0xa3f   : > { %8206 = vpow2.f32 %v4204_v61  ;;  %7271 = vmatprep.subr.bf16.mxu1 %v4271_v56  ;;  %4172 = vmax.xlane.f32.xlu0 %v10101_v39 }
 0xa40   : > { %7272 = vmatpush3.bf16.msra.mxu1 %v4271_v56 }
 0xa43   : > { %4176 = vmax.xlane.f32.xlu0 %v10099_v32 }
 0xa45   : > { %v10225_v13 = vpop.eup %8204 }
 0xa49   : > { %v10227_v35 = vpop.eup %8206 }
 0xa4a   : > { %v4260_v53 = vpack.c.bf16 %v10227_v35, %v10225_v13 }
 0xa54   : > { %4174 = vmax.xlane.f32.xlu1 %v10094_v37 }
 0xa59   : > { %4280 = vrot.lane.b32.xlu0 %v8904_v12, %s8562_s30 }
 0xa5b   : > { %v10234_v63 = vpop.f32.mrb[132].mxu0 }
 0xa5c   : > { %v10236_v43 = vpop.f32.mrb[133].mxu0 }
 0xa5d   : > { %v10238_v7 = vpop.f32.mrb[134].mxu0  ;;  %5309 = vrot.lane.b32.xlu0 %v8852_v47, %s8564_s9  ;;  %v10836_v47 = vld [vmem:[#allocation22_spill] sm:$0xff] }
 0xa5e   : > { %v10242_v50 = vpop.f32.mrb[135].mxu0  ;;  %v4159_v46 = vpop.xlane.xlu0 %4158 }
 0xa5f   : > { %v4184_v6 = vsub.f32 %v10037_v41, %v4159_v46 }
 0xa61   : > { %5311 = vrot.lane.b32.xlu0 %v10795_v33, %s8564_s9  ;;  %v10838_v33 = vld [vmem:[#allocation26_spill] sm:$0xff]  ;;  %v4206_v20 = vmul.f32 1.442695, %v4184_v6 }
 0xa62   : > { %v4273_v10 = vpop.permute.xlu0 %4272 }
 0xa63   : > { %7273 = vmatprep.subr.bf16.mxu1 %v4273_v10  ;;  %8208 = vpow2.f32 %v4206_v20 }
 0xa64   : > { %7274 = vmatpush3.bf16.msra.mxu1 %v4273_v10 }
 0xa65   : > { %5307 = vrot.lane.b32.xlu1 %v10796_v25, %s8564_s9  ;;  %5313 = vrot.lane.b32.xlu0 %v10834_v48, %s8564_s9 }
 0xa69   : > { %5317 = vrot.lane.b32.xlu1 %v10835_v1, %s8564_s9  ;;  %5315 = vrot.lane.b32.xlu0 %v10836_v47, %s8564_s9  ;;  %v10840_v47 = vld [vmem:[#allocation16_spill] sm:$0xff] }
 0xa6d   : > { %5321 = vrot.lane.b32.xlu1 %v10837_v60, %s8564_s9  ;;  %5319 = vrot.lane.b32.xlu0 %v10838_v33, %s8564_s9  ;;  %v10260_v2 = vpop.eup %8208  ;;  %v4181_v33 = vsub.f32 %v10012_v31, %v10213_v22 }
 0xa6f   : > { %v4161_v52 = vpop.xlane.xlu1 %4160 }
 0xa70   : > { %v4185_v25 = vsub.f32 %v10041_v16, %v4161_v52  ;;  %v4200_v52 = vmul.f32 1.442695, %v4181_v33 }
 0xa72   : > { %v4208_v34 = vmul.f32 1.442695, %v4185_v25 }
 0xa73   : > { %v4163_v11 = vpop.xlane.xlu1 %4162 }
 0xa74   : > { %8210 = vpow2.f32 %v4208_v34  ;;  %v4186_v16 = vsub.f32 %v10075_v19, %v4163_v11 }
 0xa75   : > { %8212 = vpow2.f32 %v4198_v14 }
 0xa76   : > { %v4210_v24 = vmul.f32 1.442695, %v4186_v16 }
 0xa77   : > { %v4275_v58 = vpop.permute.xlu1 %4274 }
 0xa78   : > { %7275 = vmatprep.subr.bf16.mxu1 %v4275_v58  ;;  %8214 = vpow2.f32 %v4210_v24 }
 0xa79   : > { %7276 = vmatpush3.bf16.msra.mxu1 %v4275_v58 }
 0xa7e   : > { %v10262_v41 = vpop.eup %8210 }
 0xa7f   : > { %v4261_v3 = vpack.c.bf16 %v10262_v41, %v10260_v2  ;;  %v8213_v44 = vpop.eup %8212 }
 0xa8c   : > { %4226 = vadd.xlane.f32.xlu0 %v8203_v30 }
 0xa91   : > { %4228 = vadd.xlane.f32.xlu1 %v10215_v45  ;;  %v10278_v45 = vpop.eup %8214 }
 0xa93   : > { %v4165_v28 = vpop.xlane.xlu0 %4164 }
 0xa94   : > { %v4187_v61 = vsub.f32 %v10079_v17, %v4165_v28  ;;  %v10270_v56 = vpop.f32.mrb[136].mxu0  ;;  %v10839_v17 = vld [vmem:[#allocation14_spill] sm:$0xff] }
 0xa95   : > { %4230 = vadd.xlane.f32.xlu1 %v8213_v44  ;;  %v10272_v46 = vpop.f32.mrb[137].mxu0 }
 0xa96   : > { %v4212_v10 = vmul.f32 1.442695, %v4187_v61  ;;  %v10274_v48 = vpop.f32.mrb[138].mxu0 }
 0xa97   : > { %v10276_v26 = vpop.f32.mrb[139].mxu0  ;;  %v4169_v30 = vpop.xlane.xlu0 %4168 }
 0xa98   : > { %8216 = vpow2.f32 %v4212_v10  ;;  %v4189_v24 = vsub.f32 %v10077_v54, %v4169_v30 }
 0xa99   : > { %8218 = vpow2.f32 %v4200_v52 }
 0xa9b   : > { %v4277_v19 = vpop.permute.xlu0 %4276 }
 0xa9c   : > { %7277 = vmatprep.subr.bf16.mxu1 %v4277_v19 }
 0xa9d   : > { %7278 = vmatpush3.bf16.msra.mxu1 %v4277_v19 }
 0xaa2   : > { %v10280_v38 = vpop.eup %8216  ;;  %5291 = vrot.lane.b32.xlu0 %v10839_v17, %s8564_s9 }
 0xaa3   : > { %v4262_v1 = vpack.c.bf16 %v10280_v38, %v10278_v45  ;;  %v8219_v25 = vpop.eup %8218 }
 0xaa4   : > { %v4259_v17 = vpack.c.bf16 %v8219_v25, %v8213_v44 }
 0xaa6   : > { %5293 = vrot.lane.b32.xlu1 %v10840_v47, %s8564_s9  ;;  %v4216_v47 = vmul.f32 1.442695, %v4189_v24 }
 0xaa8   : > { %v4167_v6 = vpop.xlane.xlu1 %4166 }
 0xaa9   : > { %v4188_v14 = vsub.f32 %v10073_v8, %v4167_v6 }
 0xaab   : > { %v4214_v10 = vmul.f32 1.442695, %v4188_v14 }
 0xaac   : > { %v4171_v60 = vpop.xlane.xlu1 %4170 }
 0xaad   : > { %v4190_v61 = vsub.f32 %v10096_v18, %v4171_v60  ;;  %8220 = vpow2.f32 %v4214_v10 }
 0xaaf   : > { %v4218_v33 = vmul.f32 1.442695, %v4190_v61 }
 0xab0   : > { %v4279_v20 = vpop.permute.xlu1 %4278 }
 0xab1   : > { %7279 = vmatprep.subr.bf16.mxu1 %v4279_v20 }
 0xab2   : > { %7280 = vmatpush3.bf16.msra.mxu1 %v4279_v20 }
 0xac1   : > { %4232 = vadd.xlane.f32.xlu0 %v8219_v25 }
 0xac5   : > { %4236 = vadd.xlane.f32.xlu0 %v10227_v35 }
 0xac8   : > { %v10291_v34 = vpop.f32.mrb[140].mxu0 }
 0xac9   : > { %v10293_v11 = vpop.f32.mrb[141].mxu0 }
 0xaca   : > { %4234 = vadd.xlane.f32.xlu1 %v10225_v13  ;;  %v10296_v58 = vpop.f32.mrb[142].mxu0  ;;  %v8221_v13 = vpop.eup %8220 }
 0xacb   : > { %v10298_v4 = vpop.f32.mrb[143].mxu0 }
 0xacc   : > { %v4173_v31 = vpop.xlane.xlu0 %4172 }
 0xacd   : > { %v4191_v16 = vsub.f32 %v10101_v39, %v4173_v31 }
 0xace   : > { %4238 = vadd.xlane.f32.xlu1 %v10260_v2 }
 0xacf   : > { %v4220_v19 = vmul.f32 1.442695, %v4191_v16 }
 0xad0   : > { %v4177_v22 = vpop.xlane.xlu0 %4176 }
 0xad1   : > { %8222 = vpow2.f32 %v4220_v19  ;;  %v4193_v39 = vsub.f32 %v10099_v32, %v4177_v22 }
 0xad2   : > { %8224 = vpow2.f32 %v4216_v47 }
 0xad3   : > { %8226 = vpow2.f32 %v4218_v33  ;;  %v4224_v8 = vmul.f32 1.442695, %v4193_v39  ;;  %v4420_v33 = vld [vmem:[#allocation8 + $0x58] sm:$0xff] }
 0xad4   : > { %v4281_v28 = vpop.permute.xlu0 %4280 }
 0xad5   : > { %7281 = vmatprep.subr.bf16.mxu1 %v4281_v28  ;;  %8228 = vpow2.f32 %v4224_v8 }
 0xad6   : > { %7282 = vmatpush3.bf16.msra.mxu1 %v4281_v28 }
 0xad8   : > { %v5310_v30 = vpop.permute.xlu0 %5309 }
 0xad9   : > { %7284 = vmatmul.mubr.bf16.vlgmr.msra.gmra.mrb[112].mxu1 %v4259_v17 }
 0xada   : > { %7287 = vmatprep.mubr.bf16.mxu1 %v4260_v53 }
 0xadb   : > { %5295 = vrot.lane.b32.xlu0 %v10804_v23, %s8564_s9  ;;  %v10317_v53 = vpop.eup %8222 }
 0xadc   : > { %v8225_v44 = vpop.eup %8224  ;;  %v5312_v6 = vpop.permute.xlu0 %5311 }
 0xadd   : > { %v8227_v32 = vpop.eup %8226  ;;  %v4263_v2 = vpack.c.bf16 %v8225_v44, %v8221_v13  ;;  %v5354_v52 = vsel %vm695_vm0, %v5312_v6, 0 }
 0xadf   : > { %5297 = vrot.lane.b32.xlu1 %v10805_v21, %s8564_s9 }
 0xae0   : > { %v5314_v25 = vpop.permute.xlu0 %5313 }
 0xae1   : > { %v4175_v54 = vpop.xlane.xlu1 %4174  ;;  %7288 = vmatmul.mubr.bf16.gmra.mrb[116].mxu1 %v4261_v3  ;;  %v5351_v3 = vsel %vm695_vm0, %v5310_v30, 0  ;;  %v5357_v31 = vsel %vm695_vm0, %v5314_v25, 0 }
 0xae2   : > { %v4192_v18 = vsub.f32 %v10094_v37, %v4175_v54  ;;  %7291 = vmatprep.mubr.bf16.mxu1 %v4262_v1  ;;  %v4264_v37 = vpack.c.bf16 %v10317_v53, %v8227_v32  ;;  %v10324_v1 = vpop.eup %8228 }
 0xae4   : > { %v4222_v35 = vmul.f32 1.442695, %v4192_v18  ;;  %v5316_v22 = vpop.permute.xlu0 %5315 }
 0xae5   : > { %v5308_v23 = vpop.permute.xlu1 %5307  ;;  %v5360_v14 = vsel %vm695_vm0, %v5316_v22, 0 }
 0xae6   : > { %8230 = vpow2.f32 %v4222_v35  ;;  %7791 = vmatprep.subr.msk.bf16.mxu0 %vm695_vm0, %v5308_v23  ;;  %v5348_v21 = vsel %vm695_vm0, %v5308_v23, 0 }
 0xae7   : > { %7420 = vmatpush3.bf16.xpose.msra.mxu0 %v5348_v21 }
 0xae8   : > { %7792 = vmatprep.subr.msk.bf16.mxu0 %vm695_vm0, %v5310_v30 }
 0xae9   : > { %7292 = vmatmul.mubr.bf16.gmra.mrb[120].mxu1 %v4263_v2  ;;  %v5318_v16 = vpop.permute.xlu1 %5317 }
 0xaea   : > { %7295 = vmatprep.mubr.bf16.mxu1 %v4264_v37  ;;  %v5363_v24 = vsel %vm695_vm0, %v5318_v16, 0 }
 0xaed   : > { %v5322_v28 = vpop.permute.xlu1 %5321 }
 0xaee   : > { %v5369_v19 = vsel %vm695_vm0, %v5322_v28, 0 }
 0xaef   : > { %7422 = vmatpush3.bf16.xpose.msra.mxu0 %v5351_v3 }
 0xaf0   : > { %v8231_v60 = vpop.eup %8230  ;;  %7793 = vmatprep.subr.msk.bf16.mxu0 %vm695_vm0, %v5312_v6 }
 0xaf1   : > { %v4265_v20 = vpack.c.bf16 %v10324_v1, %v8231_v60 }
 0xaf3   : > { %7296 = vmatmul.mubr.bf16.gmra.mrb[124].mxu1 %v4265_v20 }
 0xaf7   : > { %7424 = vmatpush3.bf16.xpose.msra.mxu0 %v5354_v52 }
 0xaf8   : > { %7794 = vmatprep.subr.msk.bf16.mxu0 %vm695_vm0, %v5314_v25 }
 0xafa   : > { %4240 = vadd.xlane.f32.xlu0 %v10262_v41  ;;  %v5320_v41 = vpop.permute.xlu0 %5319 }
 0xafe   : > { %4244 = vadd.xlane.f32.xlu0 %v10280_v38  ;;  %v5366_v38 = vsel %vm695_vm0, %v5320_v41, 0 }
 0xaff   : > { %7426 = vmatpush3.bf16.xpose.msra.mxu0 %v5357_v31 }
 0xb00   : > { %7795 = vmatprep.subr.msk.bf16.mxu0 %vm695_vm0, %v5316_v22 }
 0xb03   : > { %4242 = vadd.xlane.f32.xlu1 %v10278_v45 }
 0xb07   : > { %4246 = vadd.xlane.f32.xlu1 %v8221_v13  ;;  %7428 = vmatpush3.bf16.xpose.msra.mxu0 %v5360_v14 }
 0xb08   : > { %7796 = vmatprep.subr.msk.bf16.mxu0 %vm695_vm0, %v5318_v16 }
 0xb0f   : > { %7430 = vmatpush3.bf16.xpose.msra.mxu0 %v5363_v24 }
 0xb10   : > { %7797 = vmatprep.subr.msk.bf16.mxu0 %vm695_vm0, %v5320_v41 }
 0xb14   : > { %5299 = vrot.lane.b32.xlu0 %v10806_v27, %s8564_s9  ;;  %v4419_v27 = vld [vmem:[#allocation8 + $0x50] sm:$0xff] }
 0xb15   : > { %v7595_v39 = vpack.c.bf16 %v4420_v33, %v4419_v27 }
 0xb17   : > { %7432 = vmatpush3.bf16.xpose.msra.mxu0 %v5366_v38  ;;  %7596 = vmatprep.subr.bf16.mxu1 %v7595_v39 }
 0xb18   : > { %5301 = vrot.lane.b32.xlu1 %v10807_v59, %s8564_s9  ;;  %7798 = vmatprep.subr.msk.bf16.mxu0 %vm695_vm0, %v5322_v28 }
 0xb19   : > { %v4227_v45 = vpop.xlane.xlu0 %4226  ;;  %7598 = vmatpush3.bf16.msra.mxu1 %v7595_v39 }
 0xb1a   : > { %8232 = vrcp.f32 %v4227_v45 }
 0xb1d   : > { %v5292_v61 = vpop.permute.xlu0 %5291 }
 0xb1e   : > { %v4229_v10 = vpop.xlane.xlu1 %4228  ;;  %7435 = vmatprep.mubr.msk.bf16.mxu0 %vm695_vm0, %v5292_v61 }
 0xb1f   : > { %7434 = vmatpush3.bf16.xpose.msra.mxu0 %v5369_v19  ;;  %8234 = vrcp.f32 %v4229_v10 }
 0xb22   : > { %v4231_v17 = vpop.xlane.xlu1 %4230 }
 0xb23   : > { %8236 = vrcp.f32 %v4231_v17 }
 0xb24   : > { %v8233_v30 = vpop.eup %8232 }
 0xb26   : > { %v5294_v47 = vpop.permute.xlu1 %5293 }
 0xb27   : > { %7436 = vmatmul.mubr.msk.bf16.vlgmr.msra.gmra.mrb[144].mxu0 %vm695_vm0, %v5294_v47 }
 0xb33   : > { %4248 = vadd.xlane.f32.xlu0 %v8225_v44 }
 0xb37   : > { %4252 = vadd.xlane.f32.xlu0 %v10317_v53 }
 0xb3c   : > { %4250 = vadd.xlane.f32.xlu1 %v8227_v32 }
 0xb40   : > { %4254 = vadd.xlane.f32.xlu1 %v8231_v60 }
 0xb44   : > { %4807 = vmax.xlane.f32.xlu1 %v10207_v15 }
 0xb48   : > { %4809 = vmax.xlane.f32.xlu1 %v10211_v0 }
 0xb4d   : > { %5303 = vrot.lane.b32.xlu0 %v10810_v57, %s8564_s9 }
 0xb4e   : > { %v4233_v59 = vpop.xlane.xlu0 %4232 }
 0xb4f   : > { %8238 = vrcp.f32 %v4233_v59 }
 0xb51   : > { %5305 = vrot.lane.b32.xlu0 %v10811_v40, %s8564_s9 }
 0xb52   : > { %v4237_v8 = vpop.xlane.xlu0 %4236 }
 0xb56   : > { %v5296_v54 = vpop.permute.xlu0 %5295 }
 0xb57   : > { %v4235_v18 = vpop.xlane.xlu1 %4234  ;;  %7439 = vmatprep.mubr.msk.bf16.mxu0 %vm695_vm0, %v5296_v54 }
 0xb59   : > { %4927 = vrot.lane.b32.xlu1 %v10812_v51, %s8563_s6 }
 0xb5b   : > { %v4239_v13 = vpop.xlane.xlu1 %4238 }
 0xb5c   : > { %8240 = vrcp.f32 %v4239_v13 }
 0xb5d   : > { %8242 = vrcp.f32 %v4235_v18 }
 0xb5e   : > { %8244 = vrcp.f32 %v4237_v8 }
 0xb5f   : > { %v5298_v35 = vpop.permute.xlu1 %5297 }
 0xb60   : > { %7440 = vmatmul.mubr.msk.bf16.gmra.mrb[148].mxu0 %vm695_vm0, %v5298_v35 }
 0xb70   : > { %4256 = vadd.xlane.f32.xlu0 %v10324_v1  ;;  %v8235_v1 = vpop.eup %8234 }
 0xb71   : > { %v8237_v60 = vpop.eup %8236 }
 0xb72   : > { %v8239_v25 = vpop.eup %8238 }
 0xb73   : > { %v8241_v31 = vpop.eup %8240 }
 0xb74   : > { %4813 = vmax.xlane.f32.xlu0 %v10209_v9  ;;  %v8243_v16 = vpop.eup %8242 }
 0xb75   : > { %v8245_v45 = vpop.eup %8244 }
 0xb7d   : > { %4811 = vmax.xlane.f32.xlu1 %v10205_v29 }
 0xb81   : > { %4815 = vmax.xlane.f32.xlu1 %v10236_v43 }
 0xb85   : > { %4817 = vmax.xlane.f32.xlu1 %v10242_v50 }
 0xb87   : > { %v4241_v57 = vpop.xlane.xlu0 %4240 }
 0xb88   : > { %8246 = vrcp.f32 %v4241_v57 }
 0xb8a   : > { %4929 = vrot.lane.b32.xlu0 %v8829_v36, %s8563_s6 }
 0xb8b   : > { %v4245_v40 = vpop.xlane.xlu0 %4244 }
 0xb8f   : > { %v5300_v53 = vpop.permute.xlu0 %5299 }
 0xb90   : > { %v4243_v23 = vpop.xlane.xlu1 %4242  ;;  %7443 = vmatprep.mubr.msk.bf16.mxu0 %vm695_vm0, %v5300_v53 }
 0xb91   : > { %8248 = vrcp.f32 %v4243_v23 }
 0xb92   : > { %8250 = vrcp.f32 %v4245_v40  ;;  %v8247_v19 = vpop.eup %8246 }
 0xb94   : > { %v4247_v44 = vpop.xlane.xlu1 %4246 }
 0xb95   : > { %8252 = vrcp.f32 %v4247_v44 }
 0xb96   : > { %4931 = vrot.lane.b32.xlu1 %v8842_v42, %s8563_s6 }
 0xb98   : > { %v5302_v21 = vpop.permute.xlu1 %5301 }
 0xb99   : > { %7444 = vmatmul.mubr.msk.bf16.gmra.mrb[152].mxu0 %vm695_vm0, %v5302_v21 }
 0xb9b   : > { %v8249_v27 = vpop.eup %8248 }
 0xb9c   : > { %v8251_v8 = vpop.eup %8250 }
 0xb9f   : > { %v8253_v18 = vpop.eup %8252 }
 0xba9   : > { %4819 = vmax.xlane.f32.xlu0 %v10234_v63 }
 0xbac   : > { %v7285_v32 = vpop.f32.mrb[112].mxu1 }
 0xbad   : > { %v4324_v2 = vpop.f32.mrb[113].mxu1  ;;  %v4405_v52 = vmul.f32 %v8237_v60, %v7285_v32 }
 0xbae   : > { %v4403_v37 = vmul.f32 %v8233_v30, %v4324_v2  ;;  %v7286_v3 = vpop.f32.mrb[114].mxu1 }
 0xbaf   : > { %v4327_v6 = vpop.f32.mrb[115].mxu1  ;;  %v4406_v22 = vmul.f32 %v8239_v25, %v7286_v3 }
 0xbb0   : > { %v4404_v20 = vmul.f32 %v8235_v1, %v4327_v6  ;;  %7303 = vmatprep.mubr.msk.f32.mxu1 %vm695_vm0, %v4403_v37 }
 0xbb2   : > { %7304 = vmatmul.mubr.msk.f32.vlgmr.msra.gmra.mrb[32].mxu1 %vm695_vm0, %v4404_v20 }
 0xbb3   : > { %7306 = vmatprep.mubr.msk.f32.mxu1 %vm695_vm0, %v4405_v52 }
 0xbb4   : > { %v7289_v14 = vpop.f32.mrb[116].mxu1 }
 0xbb5   : > { %v4409_v24 = vmul.f32 %v8241_v31, %v7289_v14  ;;  %v4340_v41 = vpop.f32.mrb[117].mxu1 }
 0xbb6   : > { %v4407_v38 = vmul.f32 %v8243_v16, %v4340_v41  ;;  %v7290_v28 = vpop.f32.mrb[118].mxu1  ;;  %7307 = vmatmul.mubr.msk.f32.gmra.mrb[34].mxu1 %vm695_vm0, %v4406_v22 }
 0xbb7   : > { %v4343_v61 = vpop.f32.mrb[119].mxu1  ;;  %v4410_v17 = vmul.f32 %v8247_v19, %v7290_v28 }
 0xbb8   : > { %v4408_v10 = vmul.f32 %v8245_v45, %v4343_v61  ;;  %7309 = vmatprep.mubr.msk.f32.mxu1 %vm695_vm0, %v4407_v38 }
 0xbba   : > { %4821 = vmax.xlane.f32.xlu1 %v10238_v7  ;;  %7310 = vmatmul.mubr.msk.f32.gmra.mrb[36].mxu1 %vm695_vm0, %v4408_v10 }
 0xbbb   : > { %7312 = vmatprep.mubr.msk.f32.mxu1 %vm695_vm0, %v4409_v24 }
 0xbbc   : > { %v7293_v47 = vpop.f32.mrb[120].mxu1 }
 0xbbd   : > { %v4356_v33 = vpop.f32.mrb[121].mxu1  ;;  %v4413_v57 = vmul.f32 %v8253_v18, %v7293_v47 }
 0xbbe   : > { %v4411_v39 = vmul.f32 %v8249_v27, %v4356_v33  ;;  %4823 = vmax.xlane.f32.xlu1 %v10272_v46  ;;  %v7294_v59 = vpop.f32.mrb[122].mxu1  ;;  %7313 = vmatmul.mubr.msk.f32.gmra.mrb[38].mxu1 %vm695_vm0, %v4410_v17 }
 0xbbf   : > { %v4359_v54 = vpop.f32.mrb[123].mxu1  ;;  %4933 = vrot.lane.b32.xlu0 %v8857_v49, %s8563_s6 }
 0xbc0   : > { %v4412_v13 = vmul.f32 %v8251_v8, %v4359_v54  ;;  %7315 = vmatprep.mubr.msk.f32.mxu1 %vm695_vm0, %v4411_v39  ;;  %v4249_v35 = vpop.xlane.xlu0 %4248 }
 0xbc1   : > { %8254 = vrcp.f32 %v4249_v35 }
 0xbc2   : > { %7316 = vmatmul.mubr.msk.f32.gmra.mrb[40].mxu1 %vm695_vm0, %v4412_v13 }
 0xbc3   : > { %7318 = vmatprep.mubr.msk.f32.mxu1 %vm695_vm0, %v4413_v57 }
 0xbc4   : > { %v4253_v40 = vpop.xlane.xlu0 %4252 }
 0xbc5   : > { %8256 = vrcp.f32 %v4253_v40 }
 0xbc6   : > { %v7297_v53 = vpop.f32.mrb[124].mxu1 }
 0xbc7   : > { %v4372_v23 = vpop.f32.mrb[125].mxu1 }
 0xbc8   : > { %v7298_v44 = vpop.f32.mrb[126].mxu1  ;;  %v5304_v21 = vpop.permute.xlu0 %5303 }
 0xbc9   : > { %v4251_v32 = vpop.xlane.xlu1 %4250  ;;  %v4375_v30 = vpop.f32.mrb[127].mxu1  ;;  %7447 = vmatprep.mubr.msk.bf16.mxu0 %vm695_vm0, %v5304_v21 }
 0xbca   : > { %8258 = vrcp.f32 %v4251_v32 }
 0xbcb   : > { %v8255_v2 = vpop.eup %8254 }
 0xbcc   : > { %v5306_v37 = vpop.permute.xlu0 %5305  ;;  %v4414_v3 = vmul.f32 %v8255_v2, %v7294_v59 }
 0xbcd   : > { %v4255_v1 = vpop.xlane.xlu1 %4254  ;;  %7448 = vmatmul.mubr.msk.bf16.gmra.mrb[156].mxu0 %vm695_vm0, %v5306_v37 }
 0xbce   : > { %8260 = vrcp.f32 %v4255_v1  ;;  %7319 = vmatmul.mubr.msk.f32.gmra.mrb[42].mxu1 %vm695_vm0, %v4414_v3 }
 0xbcf   : > { %4935 = vrot.lane.b32.xlu1 %v8868_v55, %s8563_s6  ;;  %v8257_v60 = vpop.eup %8256 }
 0xbd0   : > { %v4416_v31 = vmul.f32 %v8257_v60, %v4375_v30 }
 0xbd1   : > { %v4808_v6 = vpop.xlane.xlu1 %4807 }
 0xbd2   : > { %v4839_v41 = vsub.f32 %v10207_v15, %v4808_v6 }
 0xbd4   : > { %v8259_v20 = vpop.eup %8258  ;;  %v4855_v45 = vmul.f32 1.442695, %v4839_v41 }
 0xbd5   : > { %v4810_v52 = vpop.xlane.xlu1 %4809  ;;  %v4415_v25 = vmul.f32 %v8259_v20, %v4372_v23 }
 0xbd6   : > { %v4840_v24 = vsub.f32 %v10211_v0, %v4810_v52 }
 0xbd7   : > { %7321 = vmatprep.mubr.msk.f32.mxu1 %vm695_vm0, %v4415_v25 }
 0xbd8   : > { %v8261_v22 = vpop.eup %8260  ;;  %7322 = vmatmul.mubr.msk.f32.gmra.mrb[44].mxu1 %vm695_vm0, %v4416_v31  ;;  %v4857_v38 = vmul.f32 1.442695, %v4840_v24 }
 0xbd9   : > { %v4928_v14 = vpop.permute.xlu1 %4927  ;;  %v4417_v16 = vmul.f32 %v8261_v22, %v7297_v53 }
 0xbda   : > { %7359 = vmatprep.subr.bf16.mxu1 %v4928_v14  ;;  %8262 = vpow2.f32 %v4857_v38 }
 0xbdb   : > { %7324 = vmatprep.mubr.msk.f32.mxu1 %vm695_vm0, %v4417_v16  ;;  %7360 = vmatpush3.bf16.msra.mxu1 %v4928_v14 }
 0xbde   : > { %4825 = vmax.xlane.f32.xlu0 %v10276_v26 }
 0xbe2   : > { %4829 = vmax.xlane.f32.xlu0 %v10274_v48 }
 0xbe4   : > { %v10411_v27 = vpop.eup %8262 }
 0xbf3   : > { %4827 = vmax.xlane.f32.xlu1 %v10270_v56 }
 0xbf7   : > { %4831 = vmax.xlane.f32.xlu1 %v10293_v11 }
 0xbf8   : > { %4937 = vrot.lane.b32.xlu0 %v8880_v62, %s8563_s6 }
 0xbfa   : > { %v10402_v28 = vpop.f32.mrb[144].mxu0 }
 0xbfb   : > { %v10404_v61 = vpop.f32.mrb[145].mxu0 }
 0xbfc   : > { %v10406_v10 = vpop.f32.mrb[146].mxu0 }
 0xbfd   : > { %v10408_v19 = vpop.f32.mrb[147].mxu0  ;;  %v4257_v17 = vpop.xlane.xlu0 %4256 }
 0xbfe   : > { %8264 = vrcp.f32 %v4257_v17 }
 0xbff   : > { %8266 = vpow2.f32 %v4855_v45 }
 0xc01   : > { %v4814_v15 = vpop.xlane.xlu0 %4813 }
 0xc02   : > { %v4842_v47 = vsub.f32 %v10209_v9, %v4814_v15 }
 0xc04   : > { %v4861_v8 = vmul.f32 1.442695, %v4842_v47 }
 0xc05   : > { %v4930_v0 = vpop.permute.xlu0 %4929 }
 0xc06   : > { %7361 = vmatprep.subr.bf16.mxu1 %v4930_v0  ;;  %8268 = vpow2.f32 %v4861_v8 }
 0xc07   : > { %7362 = vmatpush3.bf16.msra.mxu1 %v4930_v0 }
 0xc08   : > { %v8265_v33 = vpop.eup %8264  ;;  %4939 = vrot.lane.b32.xlu1 %v8892_v5, %s8563_s6 }
 0xc09   : > { %v8267_v39 = vpop.eup %8266  ;;  %v4418_v59 = vmul.f32 %v8265_v33, %v7298_v44 }
 0xc0a   : > { %v4812_v54 = vpop.xlane.xlu1 %4811  ;;  %v4919_v18 = vpack.c.bf16 %v10411_v27, %v8267_v39 }
 0xc0b   : > { %v4841_v13 = vsub.f32 %v10205_v29, %v4812_v54  ;;  %7325 = vmatmul.mubr.msk.f32.gmra.mrb[46].mxu1 %vm695_vm0, %v4418_v59 }
 0xc0c   : > { %7375 = vmatprep.mubr.bf16.mxu1 %v4919_v18 }
 0xc0d   : > { %v4859_v9 = vmul.f32 1.442695, %v4841_v13 }
 0xc0e   : > { %v4816_v35 = vpop.xlane.xlu1 %4815 }
 0xc0f   : > { %8270 = vpow2.f32 %v4859_v9  ;;  %v4843_v57 = vsub.f32 %v10236_v43, %v4816_v35 }
 0xc10   : > { %v10421_v29 = vpop.eup %8268 }
 0xc11   : > { %v4863_v40 = vmul.f32 1.442695, %v4843_v57 }
 0xc12   : > { %v4818_v53 = vpop.xlane.xlu1 %4817 }
 0xc13   : > { %v4844_v23 = vsub.f32 %v10242_v50, %v4818_v53  ;;  %8272 = vpow2.f32 %v4863_v40 }
 0xc15   : > { %v4865_v44 = vmul.f32 1.442695, %v4844_v23 }
 0xc16   : > { %v4932_v21 = vpop.permute.xlu1 %4931 }
 0xc17   : > { %8274 = vpow2.f32 %v4865_v44  ;;  %7363 = vmatprep.subr.bf16.mxu1 %v4932_v21  ;;  %4833 = vmax.xlane.f32.xlu0 %v10298_v4 }
 0xc18   : > { %7364 = vmatpush3.bf16.msra.mxu1 %v4932_v21 }
 0xc19   : > { %v10423_v32 = vpop.eup %8270 }
 0xc1a   : > { %v4920_v30 = vpack.c.bf16 %v10421_v29, %v10423_v32 }
 0xc1b   : > { %4837 = vmax.xlane.f32.xlu0 %v10296_v58 }
 0xc1d   : > { %v10428_v43 = vpop.eup %8272 }
 0xc21   : > { %v10430_v50 = vpop.eup %8274 }
 0xc22   : > { %v4921_v2 = vpack.c.bf16 %v10430_v50, %v10428_v43 }
 0xc2c   : > { %4835 = vmax.xlane.f32.xlu1 %v10291_v34 }
 0xc30   : > { %4887 = vadd.xlane.f32.xlu1 %v8267_v39 }
 0xc31   : > { %4941 = vrot.lane.b32.xlu0 %v8904_v12, %s8563_s6 }
 0xc33   : > { %v10437_v37 = vpop.f32.mrb[148].mxu0 }
 0xc34   : > { %4891 = vadd.xlane.f32.xlu1 %v10423_v32  ;;  %v10440_v3 = vpop.f32.mrb[149].mxu0  ;;  %v5080_v32 = vld [vmem:[#allocation8 + $0x60] sm:$0xff] }
 0xc35   : > { %v10442_v1 = vpop.f32.mrb[150].mxu0 }
 0xc36   : > { %v10444_v6 = vpop.f32.mrb[151].mxu0  ;;  %v4820_v60 = vpop.xlane.xlu0 %4819 }
 0xc37   : > { %v4845_v20 = vsub.f32 %v10234_v63, %v4820_v60 }
 0xc38   : > { %4893 = vadd.xlane.f32.xlu1 %v10421_v29 }
 0xc39   : > { %v4867_v52 = vmul.f32 1.442695, %v4845_v20 }
 0xc3a   : > { %v4934_v25 = vpop.permute.xlu0 %4933 }
 0xc3b   : > { %8276 = vpow2.f32 %v4867_v52  ;;  %7365 = vmatprep.subr.bf16.mxu1 %v4934_v25 }
 0xc3c   : > { %4895 = vadd.xlane.f32.xlu1 %v10428_v43  ;;  %7366 = vmatpush3.bf16.msra.mxu1 %v4934_v25 }
 0xc40   : > { %4897 = vadd.xlane.f32.xlu1 %v10430_v50 }
 0xc45   : > { %v10450_v31 = vpop.eup %8276 }
 0xc46   : > { %4899 = vadd.xlane.f32.xlu1 %v10450_v31 }
 0xc47   : > { %v4822_v22 = vpop.xlane.xlu1 %4821 }
 0xc48   : > { %v4846_v14 = vsub.f32 %v10238_v7, %v4822_v22 }
 0xc4a   : > { %v4869_v16 = vmul.f32 1.442695, %v4846_v14 }
 0xc4b   : > { %v4824_v63 = vpop.xlane.xlu1 %4823 }
 0xc4c   : > { %8278 = vpow2.f32 %v4869_v16  ;;  %v4847_v24 = vsub.f32 %v10272_v46, %v4824_v63 }
 0xc4e   : > { %v4871_v41 = vmul.f32 1.442695, %v4847_v24 }
 0xc4f   : > { %v4936_v38 = vpop.permute.xlu1 %4935 }
 0xc50   : > { %8280 = vpow2.f32 %v4871_v41  ;;  %7367 = vmatprep.subr.bf16.mxu1 %v4936_v38  ;;  %4889 = vadd.xlane.f32.xlu0 %v10411_v27 }
 0xc51   : > { %7368 = vmatpush3.bf16.msra.mxu1 %v4936_v38 }
 0xc56   : > { %v8279_v45 = vpop.eup %8278 }
 0xc57   : > { %4901 = vadd.xlane.f32.xlu1 %v8279_v45  ;;  %v4922_v17 = vpack.c.bf16 %v8279_v45, %v10450_v31 }
 0xc5a   : > { %v8281_v15 = vpop.eup %8280 }
 0xc5b   : > { %4903 = vadd.xlane.f32.xlu1 %v8281_v15 }
 0xc6b   : > { %v4826_v0 = vpop.xlane.xlu0 %4825 }
 0xc6c   : > { %v4848_v7 = vsub.f32 %v10276_v26, %v4826_v0  ;;  %v10458_v47 = vpop.f32.mrb[152].mxu0 }
 0xc6d   : > { %v10460_v33 = vpop.f32.mrb[153].mxu0 }
 0xc6e   : > { %v4873_v46 = vmul.f32 1.442695, %v4848_v7  ;;  %v10462_v39 = vpop.f32.mrb[154].mxu0 }
 0xc6f   : > { %v10464_v59 = vpop.f32.mrb[155].mxu0  ;;  %v4830_v27 = vpop.xlane.xlu0 %4829 }
 0xc70   : > { %8282 = vpow2.f32 %v4873_v46  ;;  %v4850_v8 = vsub.f32 %v10274_v48, %v4830_v27 }
 0xc72   : > { %v4877_v54 = vmul.f32 1.442695, %v4850_v8 }
 0xc73   : > { %v4938_v18 = vpop.permute.xlu0 %4937 }
 0xc74   : > { %8284 = vpow2.f32 %v4877_v54  ;;  %7369 = vmatprep.subr.bf16.mxu1 %v4938_v18 }
 0xc75   : > { %7370 = vmatpush3.bf16.msra.mxu1 %v4938_v18 }
 0xc7a   : > { %v8283_v13 = vpop.eup %8282 }
 0xc7b   : > { %4905 = vadd.xlane.f32.xlu1 %v8283_v13  ;;  %v4923_v26 = vpack.c.bf16 %v8283_v13, %v8281_v15 }
 0xc7e   : > { %v8285_v9 = vpop.eup %8284 }
 0xc7f   : > { %4909 = vadd.xlane.f32.xlu1 %v8285_v9 }
 0xc80   : > { %v4828_v35 = vpop.xlane.xlu1 %4827 }
 0xc81   : > { %v4849_v57 = vsub.f32 %v10270_v56, %v4828_v35 }
 0xc83   : > { %v4875_v40 = vmul.f32 1.442695, %v4849_v57 }
 0xc84   : > { %v4832_v53 = vpop.xlane.xlu1 %4831 }
 0xc85   : > { %8286 = vpow2.f32 %v4875_v40  ;;  %v4851_v23 = vsub.f32 %v10293_v11, %v4832_v53 }
 0xc87   : > { %v4879_v44 = vmul.f32 1.442695, %v4851_v23 }
 0xc88   : > { %v4940_v48 = vpop.permute.xlu1 %4939 }
 0xc89   : > { %8288 = vpow2.f32 %v4879_v44  ;;  %7371 = vmatprep.subr.bf16.mxu1 %v4940_v48 }
 0xc8a   : > { %7372 = vmatpush3.bf16.msra.mxu1 %v4940_v48 }
 0xc8f   : > { %v8287_v21 = vpop.eup %8286 }
 0xc90   : > { %4907 = vadd.xlane.f32.xlu0 %v8287_v21  ;;  %v4924_v60 = vpack.c.bf16 %v8285_v9, %v8287_v21 }
 0xc93   : > { %v8289_v20 = vpop.eup %8288 }
 0xc94   : > { %4911 = vadd.xlane.f32.xlu0 %v8289_v20 }
 0xca0   : > { %v10469_v52 = vpop.f32.mrb[156].mxu0 }
 0xca1   : > { %v10471_v25 = vpop.f32.mrb[157].mxu0 }
 0xca2   : > { %v10473_v56 = vpop.f32.mrb[158].mxu0 }
 0xca3   : > { %v10475_v31 = vpop.f32.mrb[159].mxu0 }
 0xca4   : > { %v4834_v22 = vpop.xlane.xlu0 %4833 }
 0xca5   : > { %v4852_v11 = vsub.f32 %v10298_v4, %v4834_v22 }
 0xca7   : > { %v4881_v14 = vmul.f32 1.442695, %v4852_v11 }
 0xca8   : > { %v4838_v16 = vpop.xlane.xlu0 %4837 }
 0xca9   : > { %8290 = vpow2.f32 %v4881_v14  ;;  %v4854_v38 = vsub.f32 %v10296_v58, %v4838_v16 }
 0xcab   : > { %v4885_v4 = vmul.f32 1.442695, %v4854_v38 }
 0xcac   : > { %v4942_v63 = vpop.permute.xlu0 %4941 }
 0xcad   : > { %7373 = vmatprep.subr.bf16.mxu1 %v4942_v63  ;;  %8292 = vpow2.f32 %v4885_v4 }
 0xcae   : > { %7374 = vmatpush3.bf16.msra.mxu1 %v4942_v63 }
 0xcb1   : > { %7376 = vmatmul.mubr.bf16.vlgmr.msra.gmra.mrb[128].mxu1 %v4920_v30  ;;  %v5081_v30 = vld [vmem:[#allocation8 + $0x68] sm:$0xff] }
 0xcb2   : > { %7379 = vmatprep.mubr.bf16.mxu1 %v4921_v2  ;;  %v7599_v50 = vpack.c.bf16 %v5081_v30, %v5080_v32 }
 0xcb3   : > { %v8291_v24 = vpop.eup %8290 }
 0xcb4   : > { %4913 = vadd.xlane.f32.xlu1 %v8291_v24  ;;  %v4925_v41 = vpack.c.bf16 %v8291_v24, %v8289_v20  ;;  %7600 = vmatprep.subr.bf16.mxu1 %v7599_v50 }
 0xcb5   : > { %7602 = vmatpush3.bf16.msra.mxu1 %v7599_v50 }
 0xcb7   : > { %v8293_v29 = vpop.eup %8292 }
 0xcb8   : > { %5468 = vmax.xlane.f32.xlu1 %v10404_v61 }
 0xcb9   : > { %v4836_v45 = vpop.xlane.xlu1 %4835  ;;  %7380 = vmatmul.mubr.bf16.gmra.mrb[132].mxu1 %v4922_v17 }
 0xcba   : > { %v4853_v15 = vsub.f32 %v10291_v34, %v4836_v45  ;;  %7383 = vmatprep.mubr.bf16.mxu1 %v4923_v26 }
 0xcbc   : > { %v4883_v0 = vmul.f32 1.442695, %v4853_v15 }
 0xcbe   : > { %8294 = vpow2.f32 %v4883_v0 }
 0xcc1   : > { %7384 = vmatmul.mubr.bf16.gmra.mrb[136].mxu1 %v4924_v60 }
 0xcc2   : > { %7387 = vmatprep.mubr.bf16.mxu1 %v4925_v41 }
 0xcc8   : > { %v8295_v43 = vpop.eup %8294 }
 0xcc9   : > { %4915 = vadd.xlane.f32.xlu0 %v8295_v43  ;;  %5588 = vrot.lane.b32.xlu1 %v10812_v51, %s8564_s9  ;;  %v4926_v58 = vpack.c.bf16 %v8293_v29, %v8295_v43  ;;  %v4888_v51 = vpop.xlane.xlu1 %4887 }
 0xccb   : > { %7388 = vmatmul.mubr.bf16.gmra.mrb[140].mxu1 %v4926_v58 }
 0xccd   : > { %5470 = vmax.xlane.f32.xlu0 %v10408_v19  ;;  %v4892_v34 = vpop.xlane.xlu1 %4891 }
 0xcd1   : > { %4917 = vadd.xlane.f32.xlu0 %v8293_v29  ;;  %v4894_v2 = vpop.xlane.xlu1 %4893 }
 0xcd5   : > { %5472 = vmax.xlane.f32.xlu0 %v10402_v28  ;;  %v4896_v17 = vpop.xlane.xlu1 %4895 }
 0xcd9   : > { %5474 = vmax.xlane.f32.xlu0 %v10406_v10  ;;  %v4898_v7 = vpop.xlane.xlu1 %4897 }
 0xcdd   : > { %v4890_v18 = vpop.xlane.xlu0 %4889 }
 0xced   : > { %5476 = vmax.xlane.f32.xlu1 %v10440_v3 }
 0xcef   : > { %5590 = vrot.lane.b32.xlu0 %v8829_v36, %s8564_s9  ;;  %v4900_v36 = vpop.xlane.xlu1 %4899 }
 0xcfe   : > { %5592 = vrot.lane.b32.xlu1 %v8842_v42, %s8564_s9  ;;  %v4902_v42 = vpop.xlane.xlu1 %4901 }
 0xd02   : > { %5594 = vrot.lane.b32.xlu1 %v8857_v49, %s8564_s9  ;;  %v10507_v49 = vpop.xlane.xlu1 %4903 }
 0xd08   : > { %v10509_v46 = vpop.xlane.xlu1 %4905 }
 0xd0c   : > { %v10513_v27 = vpop.xlane.xlu1 %4909 }
 0xd0e   : > { %5478 = vmax.xlane.f32.xlu0 %v10444_v6 }
 0xd12   : > { %5480 = vmax.xlane.f32.xlu0 %v10437_v37 }
 0xd16   : > { %5482 = vmax.xlane.f32.xlu0 %v10442_v1 }
 0xd1a   : > { %5484 = vmax.xlane.f32.xlu0 %v10460_v33 }
 0xd1d   : > { %v10517_v26 = vpop.xlane.xlu0 %4907 }
 0xd26   : > { %5486 = vmax.xlane.f32.xlu1 %v10464_v59 }
 0xd2a   : > { %5490 = vmax.xlane.f32.xlu1 %v10462_v39 }
 0xd30   : > { %5596 = vrot.lane.b32.xlu0 %v8868_v55, %s8564_s9  ;;  %v10520_v55 = vpop.xlane.xlu0 %4911 }
 0xd3b   : > { %5598 = vrot.lane.b32.xlu1 %v8880_v62, %s8564_s9 }
 0xd41   : > { %v10515_v8 = vpop.xlane.xlu1 %4913 }
 0xd45   : > { %v5469_v54 = vpop.xlane.xlu1 %5468 }
 0xd46   : > { %v5500_v9 = vsub.f32 %v10404_v61, %v5469_v54 }
 0xd48   : > { %v5516_v62 = vmul.f32 1.442695, %v5500_v9 }
 0xd49   : > { %v5589_v13 = vpop.permute.xlu1 %5588 }
 0xd4a   : > { %7451 = vmatprep.subr.bf16.mxu1 %v5589_v13  ;;  %8296 = vpow2.f32 %v5516_v62 }
 0xd4f   : > { %5488 = vmax.xlane.f32.xlu0 %v10458_v47 }
 0xd53   : > { %5492 = vmax.xlane.f32.xlu0 %v10471_v25 }
 0xd54   : > { %v10533_v20 = vpop.eup %8296 }
 0xd56   : > { %v10524_v35 = vpop.xlane.xlu0 %4915 }
 0xd5a   : > { %v5471_v57 = vpop.xlane.xlu0 %5470 }
 0xd5b   : > { %v5501_v40 = vsub.f32 %v10408_v19, %v5471_v57 }
 0xd5d   : > { %v5518_v53 = vmul.f32 1.442695, %v5501_v40 }
 0xd5e   : > { %v10527_v23 = vpop.xlane.xlu0 %4917 }
 0xd5f   : > { %8298 = vpow2.f32 %v5518_v53  ;;  %5494 = vmax.xlane.f32.xlu1 %v10475_v31 }
 0xd62   : > { %v5473_v44 = vpop.xlane.xlu0 %5472 }
 0xd63   : > { %v5502_v48 = vsub.f32 %v10402_v28, %v5473_v44  ;;  %5498 = vmax.xlane.f32.xlu1 %v10473_v56 }
 0xd65   : > { %v5520_v21 = vmul.f32 1.442695, %v5502_v48 }
 0xd66   : > { %v5475_v61 = vpop.xlane.xlu0 %5474 }
 0xd67   : > { %v5503_v60 = vsub.f32 %v10406_v10, %v5475_v61  ;;  %8300 = vpow2.f32 %v5520_v21 }
 0xd69   : > { %v10535_v22 = vpop.eup %8298  ;;  %v5522_v19 = vmul.f32 1.442695, %v5503_v60  ;;  %5600 = vrot.lane.b32.xlu0 %v8892_v5, %s8564_s9 }
 0xd6a   : > { %v5580_v11 = vpack.c.bf16 %v10535_v22, %v10533_v20 }
 0xd6b   : > { %8302 = vpow2.f32 %v5522_v19 }
 0xd6c   : > { %8304 = vrcp.f32 %v4892_v34 }
 0xd6d   : > { %8306 = vrcp.f32 %v4888_v51 }
 0xd6e   : > { %8308 = vrcp.f32 %v4894_v2 }
 0xd6f   : > { %8310 = vrcp.f32 %v4890_v18 }
 0xd70   : > { %8312 = vrcp.f32 %v4900_v36 }
 0xd71   : > { %v10541_v28 = vpop.eup %8300  ;;  %8314 = vrcp.f32 %v4896_v17 }
 0xd72   : > { %8316 = vrcp.f32 %v4902_v42 }
 0xd73   : > { %8318 = vrcp.f32 %v4898_v7 }
 0xd74   : > { %5602 = vrot.lane.b32.xlu1 %v8904_v12, %s8564_s9  ;;  %8320 = vrcp.f32 %v10507_v49 }
 0xd75   : > { %v10545_v14 = vpop.eup %8302  ;;  %8322 = vrcp.f32 %v10509_v46 }
 0xd76   : > { %v5581_v10 = vpack.c.bf16 %v10545_v14, %v10541_v28  ;;  %v8305_v16 = vpop.eup %8304  ;;  %8324 = vrcp.f32 %v10513_v27 }
 0xd77   : > { %v8307_v24 = vpop.eup %8306 }
 0xd78   : > { %v8309_v4 = vpop.eup %8308 }
 0xd79   : > { %v8311_v0 = vpop.eup %8310 }
 0xd7a   : > { %v5477_v5 = vpop.xlane.xlu1 %5476  ;;  %v8313_v50 = vpop.eup %8312 }
 0xd7b   : > { %v5504_v41 = vsub.f32 %v10440_v3, %v5477_v5  ;;  %v5591_v3 = vpop.permute.xlu0 %5590  ;;  %v8315_v51 = vpop.eup %8314 }
 0xd7c   : > { %v8317_v7 = vpop.eup %8316 }
 0xd7d   : > { %v5524_v43 = vmul.f32 1.442695, %v5504_v41  ;;  %v8319_v49 = vpop.eup %8318 }
 0xd7e   : > { %v5593_v34 = vpop.permute.xlu1 %5592 }
 0xd7f   : > { %8326 = vpow2.f32 %v5524_v43 }
 0xd80   : > { %8328 = vrcp.f32 %v10517_v26 }
 0xd81   : > { %8330 = vrcp.f32 %v10520_v55 }
 0xd82   : > { %v5595_v18 = vpop.permute.xlu1 %5594  ;;  %8332 = vrcp.f32 %v10515_v8 }
 0xd83   : > { %8334 = vrcp.f32 %v10524_v35 }
 0xd84   : > { %v7377_v63 = vpop.f32.mrb[128].mxu1  ;;  %8336 = vrcp.f32 %v10527_v23 }
 0xd85   : > { %v5066_v12 = vmul.f32 %v8305_v16, %v7377_v63  ;;  %v4985_v38 = vpop.f32.mrb[129].mxu1 }
 0xd86   : > { %v5064_v45 = vmul.f32 %v8307_v24, %v4985_v38  ;;  %v7378_v15 = vpop.f32.mrb[130].mxu1 }
 0xd87   : > { %v5067_v29 = vmul.f32 %v8309_v4, %v7378_v15  ;;  %v4988_v32 = vpop.f32.mrb[131].mxu1 }
 0xd88   : > { %v5065_v30 = vmul.f32 %v8311_v0, %v4988_v32  ;;  %5496 = vmax.xlane.f32.xlu0 %v10469_v52  ;;  %7395 = vmatprep.mubr.msk.f32.mxu1 %vm695_vm0, %v5064_v45 }
 0xd8a   : > { %7396 = vmatmul.mubr.msk.f32.vlgmr.msra.gmra.mrb[32].mxu1 %vm695_vm0, %v5065_v30 }
 0xd8b   : > { %7452 = vmatpush3.bf16.msra.mxu1 %v5589_v13  ;;  %7398 = vmatprep.mubr.msk.f32.mxu1 %vm695_vm0, %v5066_v12  ;;  %v8321_v13 = vpop.eup %8320 }
 0xd8c   : > { %7453 = vmatprep.subr.bf16.mxu1 %v5591_v3  ;;  %5548 = vadd.xlane.f32.xlu0 %v10533_v20  ;;  %v7381_v58 = vpop.f32.mrb[132].mxu1  ;;  %v8323_v9 = vpop.eup %8322 }
 0xd8d   : > { %v5070_v2 = vmul.f32 %v8313_v50, %v7381_v58  ;;  %v5001_v17 = vpop.f32.mrb[133].mxu1  ;;  %v8325_v57 = vpop.eup %8324 }
 0xd8e   : > { %v5068_v36 = vmul.f32 %v8315_v51, %v5001_v17  ;;  %v7382_v42 = vpop.f32.mrb[134].mxu1  ;;  %7399 = vmatmul.mubr.msk.f32.gmra.mrb[34].mxu1 %vm695_vm0, %v5067_v29  ;;  %v10567_v44 = vpop.eup %8326 }
 0xd8f   : > { %v5071_v46 = vmul.f32 %v8317_v7, %v7382_v42  ;;  %7454 = vmatpush3.bf16.msra.mxu1 %v5591_v3  ;;  %v5004_v27 = vpop.f32.mrb[135].mxu1  ;;  %v8329_v61 = vpop.eup %8328 }
 0xd90   : > { %v5069_v54 = vmul.f32 %v8319_v49, %v5004_v27  ;;  %7455 = vmatprep.subr.bf16.mxu1 %v5593_v34  ;;  %5552 = vadd.xlane.f32.xlu0 %v10541_v28  ;;  %v8331_v35 = vpop.eup %8330  ;;  %v5741_v28 = vld [vmem:[#allocation8 + $0x70] sm:$0xff] }
 0xd91   : > { %7401 = vmatprep.mubr.msk.f32.mxu1 %vm695_vm0, %v5068_v36  ;;  %v8333_v4 = vpop.eup %8332 }
 0xd92   : > { %7402 = vmatmul.mubr.msk.f32.gmra.mrb[36].mxu1 %vm695_vm0, %v5069_v54  ;;  %v8335_v23 = vpop.eup %8334 }
 0xd93   : > { %7456 = vmatpush3.bf16.msra.mxu1 %v5593_v34  ;;  %7404 = vmatprep.mubr.msk.f32.mxu1 %vm695_vm0, %v5070_v2  ;;  %v8337_v30 = vpop.eup %8336 }
 0xd94   : > { %7457 = vmatprep.subr.bf16.mxu1 %v5595_v18  ;;  %5554 = vadd.xlane.f32.xlu0 %v10545_v14  ;;  %v7385_v26 = vpop.f32.mrb[136].mxu1  ;;  %v5742_v14 = vld [vmem:[#allocation8 + $0x78] sm:$0xff] }
 0xd95   : > { %v5017_v62 = vpop.f32.mrb[137].mxu1  ;;  %v5074_v55 = vmul.f32 %v8329_v61, %v7385_v26 }
 0xd96   : > { %v5072_v40 = vmul.f32 %v8321_v13, %v5017_v62  ;;  %v7386_v53 = vpop.f32.mrb[138].mxu1  ;;  %7405 = vmatmul.mubr.msk.f32.gmra.mrb[38].mxu1 %vm695_vm0, %v5071_v46 }
 0xd97   : > { %v5075_v48 = vmul.f32 %v8325_v57, %v7386_v53  ;;  %7458 = vmatpush3.bf16.msra.mxu1 %v5595_v18  ;;  %v5020_v21 = vpop.f32.mrb[139].mxu1 }
 0xd98   : > { %v5073_v60 = vmul.f32 %v8323_v9, %v5020_v21  ;;  %5556 = vadd.xlane.f32.xlu0 %v10567_v44  ;;  %7407 = vmatprep.mubr.msk.f32.mxu1 %vm695_vm0, %v5072_v40 }
 0xd99   : > { %5550 = vadd.xlane.f32.xlu1 %v10535_v22 }
 0xd9a   : > { %7408 = vmatmul.mubr.msk.f32.gmra.mrb[40].mxu1 %vm695_vm0, %v5073_v60 }
 0xd9b   : > { %v5479_v19 = vpop.xlane.xlu0 %5478  ;;  %7410 = vmatprep.mubr.msk.f32.mxu1 %vm695_vm0, %v5074_v55 }
 0xd9c   : > { %v5505_v8 = vsub.f32 %v10444_v6, %v5479_v19 }
 0xd9e   : > { %v5526_v5 = vmul.f32 1.442695, %v5505_v8  ;;  %v7389_v16 = vpop.f32.mrb[140].mxu1  ;;  %7411 = vmatmul.mubr.msk.f32.gmra.mrb[42].mxu1 %vm695_vm0, %v5075_v48 }
 0xd9f   : > { %v5033_v63 = vpop.f32.mrb[141].mxu1  ;;  %v5481_v24 = vpop.xlane.xlu0 %5480  ;;  %v5078_v6 = vmul.f32 %v8335_v23, %v7389_v16 }
 0xda0   : > { %8338 = vpow2.f32 %v5526_v5  ;;  %v5076_v41 = vmul.f32 %v8331_v35, %v5033_v63  ;;  %v5506_v12 = vsub.f32 %v10437_v37, %v5481_v24  ;;  %v7390_v38 = vpop.f32.mrb[142].mxu1 }
 0xda1   : > { %v5036_v45 = vpop.f32.mrb[143].mxu1  ;;  %v5079_v43 = vmul.f32 %v8337_v30, %v7390_v38 }
 0xda2   : > { %v5528_v15 = vmul.f32 1.442695, %v5506_v12  ;;  %v5077_v0 = vmul.f32 %v8333_v4, %v5036_v45  ;;  %7413 = vmatprep.mubr.msk.f32.mxu1 %vm695_vm0, %v5076_v41 }
 0xda3   : > { %v5483_v29 = vpop.xlane.xlu0 %5482 }
 0xda4   : > { %8340 = vpow2.f32 %v5528_v15  ;;  %v5507_v32 = vsub.f32 %v10442_v1, %v5483_v29  ;;  %7414 = vmatmul.mubr.msk.f32.gmra.mrb[44].mxu1 %vm695_vm0, %v5077_v0 }
 0xda5   : > { %7416 = vmatprep.mubr.msk.f32.mxu1 %vm695_vm0, %v5078_v6 }
 0xda6   : > { %v5530_v37 = vmul.f32 1.442695, %v5507_v32 }
 0xda7   : > { %v5485_v3 = vpop.xlane.xlu0 %5484 }
 0xda8   : > { %8342 = vpow2.f32 %v5530_v37  ;;  %v5508_v50 = vsub.f32 %v10460_v33, %v5485_v3  ;;  %7417 = vmatmul.mubr.msk.f32.gmra.mrb[46].mxu1 %vm695_vm0, %v5079_v43 }
 0xda9   : > { %7467 = vmatprep.mubr.bf16.mxu1 %v5580_v11 }
 0xdaa   : > { %v8339_v58 = vpop.eup %8338  ;;  %v5532_v51 = vmul.f32 1.442695, %v5508_v50 }
 0xdab   : > { %v5597_v1 = vpop.permute.xlu0 %5596  ;;  %5558 = vadd.xlane.f32.xlu0 %v8339_v58  ;;  %v5582_v34 = vpack.c.bf16 %v8339_v58, %v10567_v44 }
 0xdac   : > { %8344 = vpow2.f32 %v5532_v51  ;;  %7459 = vmatprep.subr.bf16.mxu1 %v5597_v1 }
 0xdad   : > { %7460 = vmatpush3.bf16.msra.mxu1 %v5597_v1 }
 0xdae   : > { %v8341_v2 = vpop.eup %8340 }
 0xdaf   : > { %5560 = vadd.xlane.f32.xlu0 %v8341_v2 }
 0xdb2   : > { %v8343_v17 = vpop.eup %8342 }
 0xdb3   : > { %5562 = vadd.xlane.f32.xlu0 %v8343_v17  ;;  %v5487_v33 = vpop.xlane.xlu1 %5486  ;;  %v5583_v7 = vpack.c.bf16 %v8343_v17, %v8341_v2 }
 0xdb4   : > { %v5509_v36 = vsub.f32 %v10464_v59, %v5487_v33 }
 0xdb6   : > { %v8345_v42 = vpop.eup %8344  ;;  %v5534_v20 = vmul.f32 1.442695, %v5509_v36 }
 0xdb7   : > { %5564 = vadd.xlane.f32.xlu0 %v8345_v42  ;;  %v5491_v22 = vpop.xlane.xlu1 %5490 }
 0xdb8   : > { %8346 = vpow2.f32 %v5534_v20  ;;  %v5511_v11 = vsub.f32 %v10462_v39, %v5491_v22 }
 0xdba   : > { %v5538_v49 = vmul.f32 1.442695, %v5511_v11 }
 0xdbb   : > { %v5599_v46 = vpop.permute.xlu1 %5598 }
 0xdbc   : > { %8348 = vpow2.f32 %v5538_v49  ;;  %7461 = vmatprep.subr.bf16.mxu1 %v5599_v46 }
 0xdbd   : > { %7462 = vmatpush3.bf16.msra.mxu1 %v5599_v46 }
 0xdc2   : > { %v8347_v27 = vpop.eup %8346 }
 0xdc3   : > { %5566 = vadd.xlane.f32.xlu0 %v8347_v27  ;;  %v5584_v54 = vpack.c.bf16 %v8347_v27, %v8345_v42 }
 0xdc6   : > { %v8349_v18 = vpop.eup %8348 }
 0xdc7   : > { %5570 = vadd.xlane.f32.xlu1 %v8349_v18 }
 0xddc   : > { %v5489_v13 = vpop.xlane.xlu0 %5488 }
 0xddd   : > { %v5510_v59 = vsub.f32 %v10458_v47, %v5489_v13 }
 0xddf   : > { %v5536_v26 = vmul.f32 1.442695, %v5510_v59 }
 0xde0   : > { %v5493_v9 = vpop.xlane.xlu0 %5492 }
 0xde1   : > { %8350 = vpow2.f32 %v5536_v26  ;;  %v5512_v62 = vsub.f32 %v10471_v25, %v5493_v9 }
 0xde3   : > { %v5540_v57 = vmul.f32 1.442695, %v5512_v62 }
 0xde4   : > { %v5601_v39 = vpop.permute.xlu0 %5600 }
 0xde5   : > { %8352 = vpow2.f32 %v5540_v57  ;;  %7463 = vmatprep.subr.bf16.mxu1 %v5601_v39 }
 0xde6   : > { %7464 = vmatpush3.bf16.msra.mxu1 %v5601_v39 }
 0xdeb   : > { %v8351_v40 = vpop.eup %8350 }
 0xdec   : > { %5568 = vadd.xlane.f32.xlu0 %v8351_v40  ;;  %v5495_v53 = vpop.xlane.xlu1 %5494  ;;  %v5585_v44 = vpack.c.bf16 %v8349_v18, %v8351_v40 }
 0xded   : > { %v5513_v48 = vsub.f32 %v10475_v31, %v5495_v53 }
 0xdef   : > { %v8353_v21 = vpop.eup %8352  ;;  %v5542_v61 = vmul.f32 1.442695, %v5513_v48 }
 0xdf0   : > { %5572 = vadd.xlane.f32.xlu0 %v8353_v21  ;;  %v5499_v47 = vpop.xlane.xlu1 %5498 }
 0xdf1   : > { %8354 = vpow2.f32 %v5542_v61  ;;  %v5515_v60 = vsub.f32 %v10473_v56, %v5499_v47 }
 0xdf3   : > { %v5546_v55 = vmul.f32 1.442695, %v5515_v60 }
 0xdf4   : > { %v5603_v25 = vpop.permute.xlu1 %5602 }
 0xdf5   : > { %8356 = vpow2.f32 %v5546_v55  ;;  %7465 = vmatprep.subr.bf16.mxu1 %v5603_v25 }
 0xdf6   : > { %7466 = vmatpush3.bf16.msra.mxu1 %v5603_v25 }
 0xdf9   : > { %7468 = vmatmul.mubr.bf16.vlgmr.msra.gmra.mrb[144].mxu1 %v5581_v10  ;;  %v7603_v10 = vpack.c.bf16 %v5742_v14, %v5741_v28 }
 0xdfa   : > { %7471 = vmatprep.mubr.bf16.mxu1 %v5582_v34 }
 0xdfb   : > { %v8355_v19 = vpop.eup %8354  ;;  %7604 = vmatprep.subr.bf16.mxu1 %v7603_v10 }
 0xdfc   : > { %5574 = vadd.xlane.f32.xlu1 %v8355_v19  ;;  %v5586_v31 = vpack.c.bf16 %v8355_v19, %v8353_v21  ;;  %7606 = vmatpush3.bf16.msra.mxu1 %v7603_v10 }
 0xdff   : > { %v8357_v8 = vpop.eup %8356 }
 0xe00   : > { %5578 = vadd.xlane.f32.xlu1 %v8357_v8 }
 0xe01   : > { %7472 = vmatmul.mubr.bf16.gmra.mrb[148].mxu1 %v5583_v7 }
 0xe02   : > { %7475 = vmatprep.mubr.bf16.mxu1 %v5584_v54 }
 0xe09   : > { %7476 = vmatmul.mubr.bf16.gmra.mrb[152].mxu1 %v5585_v44 }
 0xe0a   : > { %7479 = vmatprep.mubr.bf16.mxu1 %v5586_v31 }
 0xe15   : > { %v5497_v56 = vpop.xlane.xlu0 %5496 }
 0xe16   : > { %v5514_v5 = vsub.f32 %v10469_v52, %v5497_v56 }
 0xe18   : > { %v5544_v16 = vmul.f32 1.442695, %v5514_v5 }
 0xe19   : > { %v5549_v24 = vpop.xlane.xlu0 %5548 }
 0xe1a   : > { %8358 = vpow2.f32 %v5544_v16 }
 0xe1b   : > { %8360 = vrcp.f32 %v5549_v24  ;;  %v6087_v24 = vld [vmem:[%s10693_s3] ss:$0 sm:$0xff] }
 0xe1d   : > { %v5553_v41 = vpop.xlane.xlu0 %5552 }
 0xe21   : > { %v5555_v12 = vpop.xlane.xlu0 %5554 }
 0xe24   : > { %v8359_v35 = vpop.eup %8358 }
 0xe25   : > { %5576 = vadd.xlane.f32.xlu0 %v8359_v35  ;;  %v5587_v63 = vpack.c.bf16 %v8357_v8, %v8359_v35  ;;  %v5557_v38 = vpop.xlane.xlu0 %5556  ;;  %v8361_v6 = vpop.eup %8360 }
 0xe26   : > { %v5551_v23 = vpop.xlane.xlu1 %5550 }
 0xe27   : > { %7480 = vmatmul.mubr.bf16.gmra.mrb[156].mxu1 %v5587_v63  ;;  %8362 = vrcp.f32 %v5551_v23 }
 0xe28   : > { %8364 = vrcp.f32 %v5553_v41 }
 0xe29   : > { %8366 = vrcp.f32 %v5555_v12 }
 0xe2a   : > { %8368 = vrcp.f32 %v5557_v38 }
 0xe31   : > { %v8363_v43 = vpop.eup %8362 }
 0xe32   : > { %v8365_v50 = vpop.eup %8364 }
 0xe33   : > { %v8367_v1 = vpop.eup %8366 }
 0xe34   : > { %v8369_v33 = vpop.eup %8368 }
 0xe38   : > { %v5559_v4 = vpop.xlane.xlu0 %5558 }
 0xe39   : > { %8370 = vrcp.f32 %v5559_v4 }
 0xe3c   : > { %v5561_v45 = vpop.xlane.xlu0 %5560 }
 0xe3d   : > { %8372 = vrcp.f32 %v5561_v45 }
 0xe40   : > { %v5563_v52 = vpop.xlane.xlu0 %5562 }
 0xe41   : > { %8374 = vrcp.f32 %v5563_v52 }
 0xe43   : > { %v8371_v22 = vpop.eup %8370 }
 0xe44   : > { %v5565_v15 = vpop.xlane.xlu0 %5564 }
 0xe45   : > { %8376 = vrcp.f32 %v5565_v15 }
 0xe47   : > { %v8373_v49 = vpop.eup %8372 }
 0xe4b   : > { %v8375_v54 = vpop.eup %8374 }
 0xe4f   : > { %v8377_v59 = vpop.eup %8376 }
 0xe50   : > { %v5567_v37 = vpop.xlane.xlu0 %5566 }
 0xe51   : > { %8378 = vrcp.f32 %v5567_v37 }
 0xe54   : > { %v5571_v36 = vpop.xlane.xlu1 %5570 }
 0xe5b   : > { %v8379_v57 = vpop.eup %8378 }
 0xe79   : > { %v5569_v34 = vpop.xlane.xlu0 %5568 }
 0xe7a   : > { %8380 = vrcp.f32 %v5569_v34 }
 0xe7b   : > { %8382 = vrcp.f32 %v5571_v36 }
 0xe7d   : > { %v5573_v61 = vpop.xlane.xlu0 %5572 }
 0xe7e   : > { %8384 = vrcp.f32 %v5573_v61 }
 0xe84   : > { %v8381_v40 = vpop.eup %8380 }
 0xe85   : > { %v8383_v48 = vpop.eup %8382 }
 0xe88   : > { %v8385_v19 = vpop.eup %8384 }
 0xe89   : > { %v5575_v47 = vpop.xlane.xlu1 %5574 }
 0xe8a   : > { %8386 = vrcp.f32 %v5575_v47 }
 0xe8d   : > { %v5579_v55 = vpop.xlane.xlu1 %5578 }
 0xe94   : > { %v8387_v5 = vpop.eup %8386 }
 0xeb2   : > { %v5577_v60 = vpop.xlane.xlu0 %5576 }
 0xeb3   : > { %8388 = vrcp.f32 %v5577_v60 }
 0xeb4   : > { %8390 = vrcp.f32 %v5579_v55 }
 0xebd   : > { %v8389_v35 = vpop.eup %8388 }
 0xebe   : > { %v8391_v14 = vpop.eup %8390 }
 0xecc   : > { %v7469_v0 = vpop.f32.mrb[144].mxu1 }
 0xecd   : > { %v5646_v29 = vpop.f32.mrb[145].mxu1  ;;  %v5727_v51 = vmul.f32 %v8365_v50, %v7469_v0 }
 0xece   : > { %v5725_v32 = vmul.f32 %v8361_v6, %v5646_v29  ;;  %v7470_v30 = vpop.f32.mrb[146].mxu1 }
 0xecf   : > { %v5649_v3 = vpop.f32.mrb[147].mxu1  ;;  %v5728_v2 = vmul.f32 %v8367_v1, %v7470_v30 }
 0xed0   : > { %v5726_v58 = vmul.f32 %v8363_v43, %v5649_v3  ;;  %7487 = vmatprep.mubr.msk.f32.mxu1 %vm695_vm0, %v5725_v32 }
 0xed2   : > { %7488 = vmatmul.mubr.msk.f32.vlgmr.msra.gmra.mrb[32].mxu1 %vm695_vm0, %v5726_v58 }
 0xed3   : > { %7490 = vmatprep.mubr.msk.f32.mxu1 %vm695_vm0, %v5727_v51 }
 0xed4   : > { %v7473_v17 = vpop.f32.mrb[148].mxu1 }
 0xed5   : > { %v5662_v7 = vpop.f32.mrb[149].mxu1  ;;  %v5731_v27 = vmul.f32 %v8373_v49, %v7473_v17 }
 0xed6   : > { %v5729_v42 = vmul.f32 %v8369_v33, %v5662_v7  ;;  %v7474_v20 = vpop.f32.mrb[150].mxu1  ;;  %7491 = vmatmul.mubr.msk.f32.gmra.mrb[34].mxu1 %vm695_vm0, %v5728_v2 }
 0xed7   : > { %v5665_v11 = vpop.f32.mrb[151].mxu1  ;;  %v5732_v18 = vmul.f32 %v8375_v54, %v7474_v20 }
 0xed8   : > { %v5730_v46 = vmul.f32 %v8371_v22, %v5665_v11  ;;  %7493 = vmatprep.mubr.msk.f32.mxu1 %vm695_vm0, %v5729_v42 }
 0xeda   : > { %7494 = vmatmul.mubr.msk.f32.gmra.mrb[36].mxu1 %vm695_vm0, %v5730_v46 }
 0xedb   : > { %7496 = vmatprep.mubr.msk.f32.mxu1 %vm695_vm0, %v5731_v27 }
 0xedc   : > { %v7477_v13 = vpop.f32.mrb[152].mxu1 }
 0xedd   : > { %v5678_v26 = vpop.f32.mrb[153].mxu1  ;;  %v5735_v44 = vmul.f32 %v8381_v40, %v7477_v13 }
 0xede   : > { %v5733_v9 = vmul.f32 %v8377_v59, %v5678_v26  ;;  %v7478_v62 = vpop.f32.mrb[154].mxu1  ;;  %7497 = vmatmul.mubr.msk.f32.gmra.mrb[38].mxu1 %vm695_vm0, %v5732_v18 }
 0xedf   : > { %v5681_v39 = vpop.f32.mrb[155].mxu1  ;;  %v5736_v21 = vmul.f32 %v8383_v48, %v7478_v62 }
 0xee0   : > { %v5734_v53 = vmul.f32 %v8379_v57, %v5681_v39  ;;  %7499 = vmatprep.mubr.msk.f32.mxu1 %vm695_vm0, %v5733_v9 }
 0xee2   : > { %7500 = vmatmul.mubr.msk.f32.gmra.mrb[40].mxu1 %vm695_vm0, %v5734_v53 }
 0xee3   : > { %7502 = vmatprep.mubr.msk.f32.mxu1 %vm695_vm0, %v5735_v44 }
 0xee6   : > { %7503 = vmatmul.mubr.msk.f32.gmra.mrb[42].mxu1 %vm695_vm0, %v5736_v21 }
 0xefa   : > { %v7481_v25 = vpop.f32.mrb[156].mxu1 }
 0xefb   : > { %v5694_v31 = vpop.f32.mrb[157].mxu1  ;;  %v5739_v28 = vmul.f32 %v8389_v35, %v7481_v25 }
 0xefc   : > { %v5737_v8 = vmul.f32 %v8385_v19, %v5694_v31  ;;  %v7482_v56 = vpop.f32.mrb[158].mxu1 }
 0xefd   : > { %v5697_v16 = vpop.f32.mrb[159].mxu1  ;;  %v5740_v10 = vmul.f32 %v8391_v14, %v7482_v56 }
 0xefe   : > { %v5738_v63 = vmul.f32 %v8387_v5, %v5697_v16  ;;  %7505 = vmatprep.mubr.msk.f32.mxu1 %vm695_vm0, %v5737_v8 }
 0xf00   : > { %7506 = vmatmul.mubr.msk.f32.gmra.mrb[44].mxu1 %vm695_vm0, %v5738_v63 }
 0xf01   : > { %7508 = vmatprep.mubr.msk.f32.mxu1 %vm695_vm0, %v5739_v28 }
 0xf04   : > { %7509 = vmatmul.mubr.msk.f32.gmra.mrb[46].mxu1 %vm695_vm0, %v5740_v10 }
 0xfa5   : > { %v7489_v41 = vpop.f32.mrb[32].mxu1 }
 0xfa6   : > { %v7607_v12 = vadd.f32 %v7489_v41, %v6087_v24  ;;  %v5857_v38 = vpop.f32.mrb[33].mxu1 }
 0xfa7   : > { %v7608_v4 = vadd.f32 %v6087_v24, %v5857_v38 }
 0xfa8   : > { %5953 = vst [vmem:[%s10621_s20 + $0x8] sm:$0xff] %v7607_v12 }
 0xfa9   : > { %5952 = vst [vmem:[%s10621_s20] sm:$0xff] %v7608_v4  ;;  %v7492_v45 = vpop.f32.mrb[34].mxu1 }
 0xfaa   : > { %v7609_v23 = vadd.f32 %v7492_v45, %v6087_v24  ;;  %v5867_v52 = vpop.f32.mrb[35].mxu1 }
 0xfab   : > { %v7610_v15 = vadd.f32 %v6087_v24, %v5867_v52 }
 0xfac   : > { %5955 = vst [vmem:[%s10621_s20 + $0x18] sm:$0xff] %v7609_v23 }
 0xfad   : > { %5954 = vst [vmem:[%s10621_s20 + $0x10] sm:$0xff] %v7610_v15  ;;  %v7495_v0 = vpop.f32.mrb[36].mxu1 }
 0xfae   : > { %v7611_v6 = vadd.f32 %v7495_v0, %v6087_v24  ;;  %v5877_v29 = vpop.f32.mrb[37].mxu1 }
 0xfaf   : > { %v7612_v32 = vadd.f32 %v6087_v24, %v5877_v29 }
 0xfb0   : > { %5957 = vst [vmem:[%s10621_s20 + $0x28] sm:$0xff] %v7611_v6 }
 0xfb1   : > { %5956 = vst [vmem:[%s10621_s20 + $0x20] sm:$0xff] %v7612_v32  ;;  %v7498_v30 = vpop.f32.mrb[38].mxu1 }
 0xfb2   : > { %v7613_v43 = vadd.f32 %v7498_v30, %v6087_v24  ;;  %v5887_v37 = vpop.f32.mrb[39].mxu1 }
 0xfb3   : > { %v7614_v3 = vadd.f32 %v6087_v24, %v5887_v37 }
 0xfb4   : > { %5959 = vst [vmem:[%s10621_s20 + $0x38] sm:$0xff] %v7613_v43 }
 0xfb5   : > { %5958 = vst [vmem:[%s10621_s20 + $0x30] sm:$0xff] %v7614_v3  ;;  %v7501_v50 = vpop.f32.mrb[40].mxu1 }
 0xfb6   : > { %v7615_v58 = vadd.f32 %v7501_v50, %v6087_v24  ;;  %v5897_v51 = vpop.f32.mrb[41].mxu1 }
 0xfb7   : > { %v7616_v1 = vadd.f32 %v6087_v24, %v5897_v51 }
 0xfb8   : > { %5961 = vst [vmem:[%s10621_s20 + $0x48] sm:$0xff] %v7615_v58 }
 0xfb9   : > { %5960 = vst [vmem:[%s10621_s20 + $0x40] sm:$0xff] %v7616_v1  ;;  %v7504_v34 = vpop.f32.mrb[42].mxu1 }
 0xfba   : > { %v7617_v2 = vadd.f32 %v7504_v34, %v6087_v24  ;;  %v5907_v17 = vpop.f32.mrb[43].mxu1 }
 0xfbb   : > { %v7618_v33 = vadd.f32 %v6087_v24, %v5907_v17 }
 0xfbc   : > { %5963 = vst [vmem:[%s10621_s20 + $0x58] sm:$0xff] %v7617_v2 }
 0xfbd   : > { %5962 = vst [vmem:[%s10621_s20 + $0x50] sm:$0xff] %v7618_v33 }
 0xfd3   : > { %v7507_v7 = vpop.f32.mrb[44].mxu1 }
 0xfd4   : > { %v7619_v36 = vadd.f32 %v7507_v7, %v6087_v24  ;;  %v5917_v42 = vpop.f32.mrb[45].mxu1 }
 0xfd5   : > { %v7620_v20 = vadd.f32 %v6087_v24, %v5917_v42 }
 0xfd6   : > { %5965 = vst [vmem:[%s10621_s20 + $0x68] sm:$0xff] %v7619_v36 }
 0xfd7   : > { %5964 = vst [vmem:[%s10621_s20 + $0x60] sm:$0xff] %v7620_v20  ;;  %v7510_v22 = vpop.f32.mrb[46].mxu1 }
 0xfd8   : > { %v7621_v11 = vadd.f32 %v7510_v22, %v6087_v24  ;;  %v5927_v49 = vpop.f32.mrb[47].mxu1 }
 0xfd9   : > { %v7622_v46 = vadd.f32 %v6087_v24, %v5927_v49 }
 0xfda   : > { %5967 = vst [vmem:[%s10621_s20 + $0x78] sm:$0xff] %v7621_v11 }
 0xfdb   : > { %5966 = vst [vmem:[%s10621_s20 + $0x70] sm:$0xff] %v7622_v46 }
 0xfdc   : > { %8491 = shalt.err (!%p8488_p2)
}
 0xfdd   : > { %s8492_s8 = scalar_lea.hbm %s10642_s24, 2048  ;;  %s8496_s9 = scalar_lea.hbm %s10694_s4, 4096 }
 0xfde   : > { %p8493_p13 = scmp.ne.s32.totalorder %s10642_s24, %s8492_s8  ;;  %p8497_p4 = scmp.lt.u32.totalorder %s10642_s24, %s10694_s4 }
 0xfdf   : > { %p8498_p7 = scmp.lt.u32.totalorder %s8496_s9, %s8492_s8  ;;  %p8500_p11 = scmp.lt.u32.totalorder %s8492_s8, %s10642_s24 }
 0xfe0   : > { %p8494_p6 = pnand %p8493_p13, %p10841_p0 }
 0xfe1   : > { %p8499_p8 = por %p8498_p7, %p8497_p4 }
 0xfe2   : > { %p8495_p10 = pneg %p8494_p6 }
 0xfe3   : > { %p8501_p1 = por %p8500_p11, %p8499_p8 }
 0xfe5   : > { %p8502_p3 = pnand %p8501_p1, %p8495_p10 }
 0xfe7   : > { %8505 = shalt.err (!%p8502_p3)
}
 0xfe8   : > { %s8566_s20 = smov 128   ;;  %s8567_s29 = smov 8  }
 0xfe9   : > { %7809 = dma.vmem_to_hbm [thread:$0]  (%p10841_p0), %s10644_s5, 2048, %s10642_s24, %s5969_s19, %s8566_s20, %s8566_s20, %s8567_s29  }
 0xfea PF: > { %s5997_s12 = sand.u32 1, %s8536_s15   ;;  %p10842_p5 = scmp.ne.s32.totalorder %s10750_s22, 0 }
 0xfeb   : > { %p10843_p9 = scmp.ge.s32.totalorder %s8548_s18, 2  ;;  %s5998_s13 = scalar_lea.sflag [#allocation5], %s5997_s12 }
 0xfed   : > { %p7823_p12 = pnand %p10843_p9, %p10842_p5 }
 0xfef   : > { %8531 = dma.done.wait (!%p7823_p12), %s5998_s13, 2048  }
 0xff0   : > { %8533 = vsyncadd (!%p7823_p12), %s5998_s13, 4294965248  ;;  %p18_p2 = scmp.ge.s32.totalorder %s8706_s11, 4   ;;  %s10844_s15 = smov %s8540_s16 }
 0xff1   : > { %s10845_s16 = smov %s8544_s17  ;;  %s10846_s17 = smov %s8715_s14 }
 0xff2   : > { %s10847_s18 = smov %s8706_s11  ;;  %20 = sbr.rel (!%p18_p2) target bundleno = 6 (0x6), region = 89 }
 0xff9   :  { %6003 = vsyncpa [#allocation4], 1 }
 0xffa   :  { %6005 = vsyncpa [#allocation4 + $0x1], 1 }
 0xffb   :  { %6006 = vsyncpa [#allocation7], 1 }
 0xffc   :  { %6007 = vsyncpa [#allocation5], 1 }
 0xffd   :  { %6009 = vsyncpa [#allocation5 + $0x1], 1 }

</bundles_post_ra>
